<compile_context>
chip_gen: v7x
topology: tpu7x:2x2x1
jax: 0.10.0
libtpu: 0.0.40
codegen_flags: <defaults>
</compile_context>

<pallas_src>
import functools

import numpy as np
import jax
import jax.numpy as jnp
from jax.experimental import pallas as pl
from jax.experimental.pallas import tpu as pltpu

# ------------------------- model config (swin_base_patch4_window7_224) --------
IN_CHANS = 3
IMG = 224
PATCH = 4
EMBED_DIM = 128
DEPTHS = (2, 2, 18, 2)
HEADS = (4, 8, 16, 32)
WINDOW = 7
OUT_CH = 512          # conv1: 1024 -> 512
NEG = -1e9            # padded-key mask value

TM_PREFS = (2048, 1024, 896, 784, 512, 448, 256, 224, 128, 112, 64, 56, 32, 16, 8)
VMEM_CAP = 48 * 1024 * 1024
VMEM_FLOOR = 24 * 1024 * 1024
VMEM_HEADROOM = 16 * 1024 * 1024


def _round_up(x, m):
    return ((x + m - 1) // m) * m


def _pick_tm(M):
    """Largest 8-aligned divisor tile that still gives >=2 grid steps."""
    if M % 8 != 0:
        return M                      # full-extent block is always legal
    for t in TM_PREFS:
        if t <= M and M % t == 0 and M // t >= 2:
            return t
    return M


def _vmem_limit(tiles, extra=0):
    """Per-call scoped-VMEM limit from double-buffered tile footprint."""
    total = extra
    for shape, dtype in tiles:
        total += 2 * int(np.prod(shape)) * jnp.dtype(dtype).itemsize
    total += VMEM_HEADROOM
    return int(min(VMEM_CAP, max(VMEM_FLOOR, total)))


def _gelu(y):
    # exact erf-GELU (matches torch.nn.GELU default)
    return jax.nn.gelu(y, approximate=False)


# ----------------------------------- Pallas kernels ---------------------------
def _fused_matmul_kernel(*refs, in_ln, activation, has_res, out_ln):
    """[LN(A)] @ W + bias [+GELU] [+res] [-> LN]  (full-K, full-N tiles)."""
    it = iter(refs)
    a_ref = next(it)
    if in_ln:
        ig_ref = next(it)
        ib_ref = next(it)
    w_ref = next(it)
    bias_ref = next(it)
    if has_res:
        res_ref = next(it)
    if out_ln:
        og_ref = next(it)
        ob_ref = next(it)
    o_ref = next(it)

    a = a_ref[...]
    if in_ln:
        x = a.astype(jnp.float32)
        mu = jnp.mean(x, axis=-1, keepdims=True)
        xc = x - mu
        var = jnp.mean(xc * xc, axis=-1, keepdims=True)
        x = (xc * jax.lax.rsqrt(var + 1e-5)) * ig_ref[...] + ib_ref[...]
        a = x.astype(w_ref.dtype)

    y = jnp.dot(a, w_ref[...], preferred_element_type=jnp.float32)
    y = y + bias_ref[...]
    if activation == "gelu":
        y = _gelu(y)
    if has_res:
        y = y + res_ref[...].astype(jnp.float32)
    if out_ln:
        mu = jnp.mean(y, axis=-1, keepdims=True)
        yc = y - mu
        var = jnp.mean(yc * yc, axis=-1, keepdims=True)
        y = (yc * jax.lax.rsqrt(var + 1e-5)) * og_ref[...] + ob_ref[...]
    o_ref[...] = y.astype(o_ref.dtype)


def _window_attn_kernel(qkv_ref, bias_ref, o_ref, *, heads, hd):
    """All-heads window attention on a lane-dense (G, Np, C) output tile.

    qkv_ref: (1, G, Np, 3C) bf16; bias_ref: (heads, {G|1}, Np, Np) f32;
    o_ref: (1, G, Np, C) bf16.  q-scale already folded into the qkv weights.
    """
    C = heads * hd
    for h in range(heads):
        q = qkv_ref[0, :, :, h * hd:(h + 1) * hd]
        k = qkv_ref[0, :, :, C + h * hd:C + (h + 1) * hd]
        v = qkv_ref[0, :, :, 2 * C + h * hd:2 * C + (h + 1) * hd]
        s = jnp.einsum('gqd,gkd->gqk', q, k,
                       preferred_element_type=jnp.float32) + bias_ref[h]
        m = jnp.max(s, axis=-1, keepdims=True)
        e = jnp.exp(s - m)
        inv = pl.reciprocal(jnp.sum(e, axis=-1, keepdims=True), approx=True)
        p = (e * inv).astype(v.dtype)
        o = jnp.einsum('gqk,gkd->gqd', p, v,
                       preferred_element_type=jnp.float32)
        o_ref[0, :, :, h * hd:(h + 1) * hd] = o.astype(o_ref.dtype)


# Probe whether erf-GELU lowers inside a Pallas TPU kernel; if not, keep it
# unfused and apply exact GELU outside (semantics preserved either way).
def _probe_fused_gelu():
    def k(x_ref, o_ref):
        o_ref[...] = _gelu(x_ref[...])
    try:
        r = pl.pallas_call(
            k, out_shape=jax.ShapeDtypeStruct((8, 128), jnp.float32)
        )(jnp.zeros((8, 128), jnp.float32))
        jax.block_until_ready(r)
        return True
    except Exception:
        return False


_FUSE_GELU = _probe_fused_gelu()


# ----------------------------------- Pallas wrappers ---------------------------
def fused_matmul(a, w, bias, *, in_ln=None, activation=None, residual=None,
                 out_ln=None, out_dtype=jnp.bfloat16):
    """a:(M,K) [LN] @ w:(K,N) + bias [+gelu] [+residual] [LN] -> (M,N)."""
    M, K = a.shape
    N = w.shape[1]
    tm = _pick_tm(M)
    grid = (M // tm,)
    fuse_act = activation if (activation != "gelu" or _FUSE_GELU) else None
    const2 = lambda i: (0, 0)
    row_map = lambda i: (i, 0)

    specs = [pl.BlockSpec((tm, K), row_map)]
    args = [a]
    tiles = [((tm, K), a.dtype)]
    if in_ln is not None:
        g, b = in_ln
        specs += [pl.BlockSpec((1, K), const2), pl.BlockSpec((1, K), const2)]
        args += [g.reshape(1, K).astype(jnp.float32),
                 b.reshape(1, K).astype(jnp.float32)]
        tiles += [((1, K), jnp.float32)] * 2
    specs += [pl.BlockSpec((K, N), const2), pl.BlockSpec((1, N), const2)]
    args += [w, bias.reshape(1, N).astype(jnp.float32)]
    tiles += [((K, N), w.dtype), ((1, N), jnp.float32)]
    if residual is not None:
        specs.append(pl.BlockSpec((tm, N), row_map))
        args.append(residual)
        tiles.append(((tm, N), residual.dtype))
    if out_ln is not None:
        og, ob = out_ln
        specs += [pl.BlockSpec((1, N), const2), pl.BlockSpec((1, N), const2)]
        args += [og.reshape(1, N).astype(jnp.float32),
                 ob.reshape(1, N).astype(jnp.float32)]
        tiles += [((1, N), jnp.float32)] * 2
    tiles.append(((tm, N), out_dtype))

    out = pl.pallas_call(
        functools.partial(_fused_matmul_kernel,
                          in_ln=in_ln is not None, activation=fuse_act,
                          has_res=residual is not None,
                          out_ln=out_ln is not None),
        out_shape=jax.ShapeDtypeStruct((M, N), out_dtype),
        grid=grid,
        in_specs=specs,
        out_specs=pl.BlockSpec((tm, N), row_map),
        compiler_params=pltpu.CompilerParams(
            dimension_semantics=("parallel",),
            vmem_limit_bytes=_vmem_limit(tiles, extra=tm * N * 4)),
    )(*args)
    if activation == "gelu" and fuse_act is None:
        out = _gelu(out.astype(jnp.float32)).astype(out_dtype)
    return out


def _attn_group(nW):
    for g in (64, 32, 16, 8, 4, 2, 1):
        if nW % g == 0:
            return g
    return 1


def pallas_window_attention(qkv, bias, *, heads):
    """qkv: (B, nW, Np, 3C) bf16; bias: (heads, nWb, Np, Np) f32, nWb in {1,nW}.

    Returns (B, nW, Np, C) bf16 with heads concatenated head-major on the last
    (lane-dense) axis, matching torch's attn.transpose(1,2).reshape(.., C).
    """
    B, nW, Np, threeC = qkv.shape
    C = threeC // 3
    hd = C // heads
    nWb = bias.shape[1]
    G = _attn_group(nW)

    qkv_spec = pl.BlockSpec((1, G, Np, threeC), lambda b, g: (b, g, 0, 0))
    if nWb == 1:
        bias_spec = pl.BlockSpec((heads, 1, Np, Np), lambda b, g: (0, 0, 0, 0))
        gb = 1
    else:
        bias_spec = pl.BlockSpec((heads, G, Np, Np), lambda b, g: (0, g, 0, 0))
        gb = G
    out_spec = pl.BlockSpec((1, G, Np, C), lambda b, g: (b, g, 0, 0))

    tiles = [((1, G, Np, threeC), qkv.dtype),
             ((heads, gb, Np, Np), bias.dtype),
             ((1, G, Np, C), jnp.bfloat16)]
    extra = 6 * G * Np * Np * 4          # per-head f32 softmax intermediates

    return pl.pallas_call(
        functools.partial(_window_attn_kernel, heads=heads, hd=hd),
        out_shape=jax.ShapeDtypeStruct((B, nW, Np, C), jnp.bfloat16),
        grid=(B, nW // G),
        in_specs=[qkv_spec, bias_spec],
        out_specs=out_spec,
        compiler_params=pltpu.CompilerParams(
            dimension_semantics=("parallel", "parallel"),
            vmem_limit_bytes=_vmem_limit(tiles, extra=extra)),
    )(qkv, bias)


# ------------------------------- model pieces (glue + kernels) -----------------
@jax.jit
def patch_embed_apply(x, pe):
    # Conv2d(3,128,4,4,stride=4) as im2col matmul; LayerNorm(128) fused into the
    # matmul epilogue (N=128 fits one tile).  NHWC bf16 out.
    B, Cin, Hi, Wi = x.shape
    Ho, Wo = Hi // PATCH, Wi // PATCH
    patches = x.reshape(B, Cin, Ho, PATCH, Wo, PATCH)
    patches = patches.transpose(0, 2, 4, 1, 3, 5).reshape(
        B * Ho * Wo, Cin * PATCH * PATCH).astype(jnp.bfloat16)
    y = fused_matmul(patches, pe['proj_w'], pe['proj_b'],
                     out_ln=(pe['norm_g'], pe['norm_b']))
    return y.reshape(B, Ho, Wo, EMBED_DIM)


@jax.jit
def patch_merging_apply(x, p):
    B, H, W, C = x.shape
    x = x.reshape(B, H // 2, 2, W // 2, 2, C).transpose(0, 1, 3, 4, 2, 5)
    x = x.reshape(B * (H // 2) * (W // 2), 4 * C)
    # LayerNorm(4C) fused into the (bias-free) reduction Linear.
    y = fused_matmul(x, p['red_w'], p['red_b'],
                     in_ln=(p['norm_g'], p['norm_b']))
    return y.reshape(B, H // 2, W // 2, 2 * C)


@functools.partial(jax.jit, static_argnames=("heads", "window", "shift"))
def swin_block_apply(x, p, attn_bias, *, heads, window, shift):
    B, H, W, C = x.shape
    N = window * window
    Np = attn_bias.shape[-1]          # padded tokens per window (49 -> 64)
    nh, nw = H // window, W // window
    nW = nh * nw
    B_ = B * nW

    shortcut = x

    # ---- window attention branch (norm1 fused into qkv projection) ----
    # TODO(synk): cyclic-shift roll and window partition/merge are still XLA
    # relayout passes; folding them into BlockSpec index_maps is not done here.
    xs = x
    if shift > 0:
        xs = jnp.roll(xs, shift=(-shift, -shift), axis=(1, 2))
    xw = xs.reshape(B, nh, window, nw, window, C)
    xw = xw.transpose(0, 1, 3, 2, 4, 5).reshape(B_, N, C)
    xw = jnp.pad(xw, ((0, 0), (0, Np - N), (0, 0)))        # pad tokens 49->64

    qkv = fused_matmul(xw.reshape(B_ * Np, C), p['qkv_w'], p['qkv_b'],
                       in_ln=(p['norm1_g'], p['norm1_b']))
    qkv = qkv.reshape(B, nW, Np, 3 * C)                    # pure reshape

    o = pallas_window_attention(qkv, attn_bias, heads=heads)
    o = fused_matmul(o.reshape(B_ * Np, C), p['proj_w'], p['proj_b'])
    o = o.reshape(B_, Np, C)[:, :N, :]                     # drop padded tokens
    o = o.reshape(B, nh, nw, window, window, C).transpose(0, 1, 3, 2, 4, 5)
    o = o.reshape(B, H, W, C)
    if shift > 0:
        o = jnp.roll(o, shift=(shift, shift), axis=(1, 2))
    x = shortcut + o

    # ---- MLP branch: norm2+fc1+GELU fused; residual add fused into fc2 ----
    xr = x.reshape(B * H * W, C)
    h1 = fused_matmul(xr, p['fc1_w'], p['fc1_b'],
                      in_ln=(p['norm2_g'], p['norm2_b']), activation="gelu")
    out = fused_matmul(h1, p['fc2_w'], p['fc2_b'], residual=xr)
    return out.reshape(B, H, W, C)


@jax.jit
def head_apply(x, norm_g, norm_b, conv_w, conv_b):
    # final LayerNorm(1024) fused into the 1x1 conv (1024->512); head=Identity;
    # output permuted to NCHW in f32.
    B, H, W, C = x.shape
    y = fused_matmul(x.reshape(-1, C), conv_w, conv_b,
                     in_ln=(norm_g, norm_b), out_dtype=jnp.float32)
    return y.reshape(B, H, W, OUT_CH).transpose(0, 3, 1, 2)   # (B, 512, 7, 7)


def model_forward(params, x):
    x = patch_embed_apply(x, params['patch_embed'])
    for si in range(4):
        st = params['stages'][si]
        if st['downsample'] is not None:
            x = patch_merging_apply(x, st['downsample'])
        for blk in st['blocks']:
            x = swin_block_apply(x, blk['params'], blk['attn_bias'],
                                 heads=HEADS[si], window=blk['window'],
                                 shift=blk['shift'])
    return head_apply(x, params['norm_g'], params['norm_b'],
                      params['conv1_w'], params['conv1_b'])


# ------------------------------- deterministic synthetic params ----------------
class ParamGen:
    def __init__(self, seed):
        self._key = jax.random.PRNGKey(seed)
        self._count = 0

    def normal(self, shape, std=0.02):
        self._count += 1
        k = jax.random.fold_in(self._key, self._count)
        return std * jax.random.normal(k, shape, dtype=jnp.float32)


def _make_rel_pos_index(ws):
    coords = np.stack(np.meshgrid(np.arange(ws), np.arange(ws), indexing='ij'))
    cf = coords.reshape(2, -1)
    rel = (cf[:, :, None] - cf[:, None, :]).transpose(1, 2, 0)
    rel[..., 0] += ws - 1
    rel[..., 1] += ws - 1
    rel[..., 0] *= 2 * ws - 1
    return rel.sum(-1).astype(np.int32)  # (N, N)


def _make_attn_mask(res, ws, shift):
    img = np.zeros((res, res), np.float32)
    cnt = 0
    for hs in (slice(0, -ws), slice(-ws, -shift), slice(-shift, None)):
        for wss in (slice(0, -ws), slice(-ws, -shift), slice(-shift, None)):
            img[hs, wss] = cnt
            cnt += 1
    mw = img.reshape(res // ws, ws, res // ws, ws)
    mw = mw.transpose(0, 2, 1, 3).reshape(-1, ws * ws)          # (nW, N)
    diff = mw[:, None, :] - mw[:, :, None]
    return np.where(diff != 0, -100.0, 0.0).astype(np.float32)  # (nW, N, N)


def init_params(seed=0):
    pg = ParamGen(seed)
    f32 = jnp.float32
    bf16 = jnp.bfloat16
    params = {
        'patch_embed': {
            # conv weight pre-reshaped to (Cin*P*P, embed) matmul layout, bf16
            'proj_w': pg.normal((EMBED_DIM, IN_CHANS, PATCH, PATCH))
                        .reshape(EMBED_DIM, -1).T.astype(bf16),
            'proj_b': jnp.zeros((EMBED_DIM,), f32),
            'norm_g': jnp.ones((EMBED_DIM,), f32),
            'norm_b': jnp.zeros((EMBED_DIM,), f32),
        }
    }
    stages = []
    res = IMG // PATCH
    in_dim = EMBED_DIM
    for si in range(4):
        dim = EMBED_DIM * (2 ** si)
        heads = HEADS[si]
        hd = dim // heads
        stage = {}
        if si > 0:
            stage['downsample'] = {
                'norm_g': jnp.ones((4 * in_dim,), f32),
                'norm_b': jnp.zeros((4 * in_dim,), f32),
                'red_w': pg.normal((4 * in_dim, 2 * in_dim)).astype(bf16),
                'red_b': jnp.zeros((2 * in_dim,), f32),     # Linear has no bias
            }
            res //= 2
        else:
            stage['downsample'] = None
        window = min(WINDOW, res)
        N = window * window
        Np = _round_up(N, 16)          # 49 -> 64 (bf16 sublane packing)
        rel_idx = jnp.asarray(_make_rel_pos_index(window).reshape(-1))
        # fold the attention q-scale (hd**-0.5) into the q-columns of the qkv proj
        qscale = jnp.concatenate([jnp.full((dim,), hd ** -0.5, f32),
                                  jnp.ones((2 * dim,), f32)])
        blocks = []
        for bi in range(DEPTHS[si]):
            shift = 0 if (bi % 2 == 0 or res <= WINDOW) else WINDOW // 2
            bp = {
                'norm1_g': jnp.ones((dim,), f32), 'norm1_b': jnp.zeros((dim,), f32),
                'qkv_w': (pg.normal((dim, 3 * dim)) * qscale[None, :]).astype(bf16),
                'qkv_b': jnp.zeros((3 * dim,), f32),
                'proj_w': pg.normal((dim, dim)).astype(bf16),
                'proj_b': jnp.zeros((dim,), f32),
                'norm2_g': jnp.ones((dim,), f32), 'norm2_b': jnp.zeros((dim,), f32),
                'fc1_w': pg.normal((dim, 4 * dim)).astype(bf16),
                'fc1_b': jnp.zeros((4 * dim,), f32),
                'fc2_w': pg.normal((4 * dim, dim)).astype(bf16),
                'fc2_b': jnp.zeros((dim,), f32),
            }
            table = pg.normal(((2 * window - 1) ** 2, heads))
            rel = jnp.take(table, rel_idx, axis=0).reshape(N, N, heads)
            rel = rel.transpose(2, 0, 1)                           # (heads, N, N)
            if shift > 0:
                mask = jnp.asarray(_make_attn_mask(res, window, shift))  # (nW,N,N)
                core = rel[:, None] + mask[None, :]                # (heads,nW,N,N)
            else:
                core = rel[:, None]                                # (heads,1,N,N)
            nWb = core.shape[1]
            attn_bias = jnp.zeros((heads, nWb, Np, Np), f32)
            attn_bias = attn_bias.at[:, :, :N, :N].set(core)
            attn_bias = attn_bias.at[:, :, :, N:].set(NEG)         # mask padded keys
            blocks.append({'params': bp, 'attn_bias': attn_bias,
                           'window': window, 'shift': shift})
        stage['blocks'] = blocks
        stages.append(stage)
        in_dim = dim
    params['stages'] = stages
    num_features = EMBED_DIM * 8  # 1024
    params['norm_g'] = jnp.ones((num_features,), f32)
    params['norm_b'] = jnp.zeros((num_features,), f32)
    params['conv1_w'] = pg.normal((num_features, OUT_CH)).astype(bf16)  # (1024,512)
    params['conv1_b'] = jnp.zeros((OUT_CH,), f32)
    return params


# TODO(synk): dropout / DropPath / pretrained-weight loading are not modelled
# (inference mode with synthetic deterministic weights).

if __name__ == "__main__":
    params = init_params(seed=0)
    x = jax.random.normal(jax.random.PRNGKey(0), (2, IN_CHANS, IMG, IMG),
                          dtype=jnp.float32)
    out = model_forward(params, x)
    out = jax.block_until_ready(out)
    assert out.shape == (2, OUT_CH, 7, 7), out.shape
    assert bool(jnp.isfinite(out).all())
    print("KERNEL_OK")
</pallas_src>

<mosaic_0001>
module attributes {stable_mosaic.version = 11 : i64} {
  func.func @_fused_matmul_kernel(%arg0: i32, %arg1: memref<896x48xbf16, #tpu.memory_space<vmem>>, %arg2: memref<48x128xbf16, #tpu.memory_space<vmem>>, %arg3: memref<1x128xf32, #tpu.memory_space<vmem>>, %arg4: memref<1x128xf32, #tpu.memory_space<vmem>>, %arg5: memref<1x128xf32, #tpu.memory_space<vmem>>, %arg6: memref<896x128xbf16, #tpu.memory_space<vmem>>) attributes {dimension_semantics = [#tpu.dimension_semantics<parallel>], iteration_bounds = array<i64: 7>, scalar_prefetch = 0 : i64, scratch_operands = 0 : i64, tpu.core_type = #tpu.core_type<tc>, window_params = [{transform_indices = @transform_0, window_bounds = array<i64: 896, 48>}, {pipeline_mode = #tpu.pipeline_mode<synchronous>, transform_indices = @transform_1, window_bounds = array<i64: 48, 128>}, {pipeline_mode = #tpu.pipeline_mode<synchronous>, transform_indices = @transform_2, window_bounds = array<i64: 1, 128>}, {pipeline_mode = #tpu.pipeline_mode<synchronous>, transform_indices = @transform_3, window_bounds = array<i64: 1, 128>}, {pipeline_mode = #tpu.pipeline_mode<synchronous>, transform_indices = @transform_4, window_bounds = array<i64: 1, 128>}, {transform_indices = @transform_5, window_bounds = array<i64: 896, 128>}]} {
    %c0 = arith.constant 0 : index
    %c0_0 = arith.constant 0 : index
    %0 = vector.load %arg1[%c0, %c0_0] : memref<896x48xbf16, #tpu.memory_space<vmem>>, vector<896x48xbf16>
    %c0_1 = arith.constant 0 : index
    %c0_2 = arith.constant 0 : index
    %1 = vector.load %arg2[%c0_1, %c0_2] : memref<48x128xbf16, #tpu.memory_space<vmem>>, vector<48x128xbf16>
    %cst = arith.constant dense<0.000000e+00> : vector<896x128xf32>
    %2 = tpu.matmul %0, %1, %cst {dimension_numbers = #tpu.dot_dimension_numbers<[1], [0], [0], [1], [0, 0, 1, 1], [], []>} : vector<896x48xbf16>, vector<48x128xbf16>, vector<896x128xf32> -> vector<896x128xf32>
    %c0_3 = arith.constant 0 : index
    %c0_4 = arith.constant 0 : index
    %3 = vector.load %arg3[%c0_3, %c0_4] : memref<1x128xf32, #tpu.memory_space<vmem>>, vector<1x128xf32>
    %4 = vector.broadcast %3 : vector<1x128xf32> to vector<896x128xf32>
    %5 = arith.addf %2, %4 : vector<896x128xf32>
    %cst_5 = arith.constant dense<0.000000e+00> : vector<896xf32>
    %6 = vector.multi_reduction <add>, %5, %cst_5 [1] : vector<896x128xf32> to vector<896xf32>
    %7 = vector.shape_cast %6 : vector<896xf32> to vector<896x1xf32>
    %cst_6 = arith.constant 1.280000e+02 : f32
    %8 = vector.broadcast %cst_6 : f32 to vector<896x1xf32>
    %9 = arith.divf %7, %8 : vector<896x1xf32>
    %10 = vector.broadcast %9 : vector<896x1xf32> to vector<896x128xf32>
    %11 = arith.subf %5, %10 : vector<896x128xf32>
    %12 = arith.mulf %11, %11 : vector<896x128xf32>
    %cst_7 = arith.constant dense<0.000000e+00> : vector<896xf32>
    %13 = vector.multi_reduction <add>, %12, %cst_7 [1] : vector<896x128xf32> to vector<896xf32>
    %14 = vector.shape_cast %13 : vector<896xf32> to vector<896x1xf32>
    %cst_8 = arith.constant 1.280000e+02 : f32
    %15 = vector.broadcast %cst_8 : f32 to vector<896x1xf32>
    %16 = arith.divf %14, %15 : vector<896x1xf32>
    %cst_9 = arith.constant 9.99999974E-6 : f32
    %17 = vector.broadcast %cst_9 : f32 to vector<896x1xf32>
    %18 = arith.addf %16, %17 : vector<896x1xf32>
    %19 = math.rsqrt %18 : vector<896x1xf32>
    %20 = vector.broadcast %19 : vector<896x1xf32> to vector<896x128xf32>
    %21 = arith.mulf %11, %20 : vector<896x128xf32>
    %c0_10 = arith.constant 0 : index
    %c0_11 = arith.constant 0 : index
    %22 = vector.load %arg4[%c0_10, %c0_11] : memref<1x128xf32, #tpu.memory_space<vmem>>, vector<1x128xf32>
    %23 = vector.broadcast %22 : vector<1x128xf32> to vector<896x128xf32>
    %24 = arith.mulf %21, %23 : vector<896x128xf32>
    %c0_12 = arith.constant 0 : index
    %c0_13 = arith.constant 0 : index
    %25 = vector.load %arg5[%c0_12, %c0_13] : memref<1x128xf32, #tpu.memory_space<vmem>>, vector<1x128xf32>
    %26 = vector.broadcast %25 : vector<1x128xf32> to vector<896x128xf32>
    %27 = arith.addf %24, %26 : vector<896x128xf32>
    %28 = arith.truncf %27 : vector<896x128xf32> to vector<896x128xbf16>
    %c0_14 = arith.constant 0 : index
    %c0_15 = arith.constant 0 : index
    %29 = vector.load %arg6[%c0_14, %c0_15] : memref<896x128xbf16, #tpu.memory_space<vmem>>, vector<896x128xbf16>
    tpu.vector_store %arg6[%c0_14, %c0_15], %28 {strides = array<i32>} : memref<896x128xbf16, #tpu.memory_space<vmem>>, vector<896x128xbf16>,
    return
  }
  func.func @transform_0(%arg0: i32) -> (i32, i32) {
    %c0_i32 = arith.constant 0 : i32
    %c0_i32_0 = arith.constant 0 : i32
    return %arg0, %c0_i32 : i32, i32
  }
  func.func @transform_1(%arg0: i32) -> (i32, i32) {
    %c0_i32 = arith.constant 0 : i32
    %c0_i32_0 = arith.constant 0 : i32
    %c0_i32_1 = arith.constant 0 : i32
    return %c0_i32, %c0_i32_0 : i32, i32
  }
  func.func @transform_2(%arg0: i32) -> (i32, i32) {
    %c0_i32 = arith.constant 0 : i32
    %c0_i32_0 = arith.constant 0 : i32
    %c0_i32_1 = arith.constant 0 : i32
    return %c0_i32, %c0_i32_0 : i32, i32
  }
  func.func @transform_3(%arg0: i32) -> (i32, i32) {
    %c0_i32 = arith.constant 0 : i32
    %c0_i32_0 = arith.constant 0 : i32
    %c0_i32_1 = arith.constant 0 : i32
    return %c0_i32, %c0_i32_0 : i32, i32
  }
  func.func @transform_4(%arg0: i32) -> (i32, i32) {
    %c0_i32 = arith.constant 0 : i32
    %c0_i32_0 = arith.constant 0 : i32
    %c0_i32_1 = arith.constant 0 : i32
    return %c0_i32, %c0_i32_0 : i32, i32
  }
  func.func @transform_5(%arg0: i32) -> (i32, i32) {
    %c0_i32 = arith.constant 0 : i32
    %c0_i32_0 = arith.constant 0 : i32
    return %arg0, %c0_i32 : i32, i32
  }
}

</mosaic_0001>

<bundles_post_ra>
// kernel: patch_embed_apply.1
= control target key start
LH: loop header
LB: loop body
LE: loop exit
PB: predicated region body
PF: predicated region fallthrough
CT: control target
= control target key end

     0   :  { %10 = vsyncpa [#allocation3], 0  ;;  %s7021_s0 = inlined_call_operand.vmem [shape: bf16[6272,48], index: 0, kind: input, shape index: {}]   ;;  %s7022_s1 = inlined_call_operand.vmem [shape: bf16[48,128], index: 1, kind: input, shape index: {}]   ;;  %s7023_s2 = inlined_call_operand.vmem [shape: f32[1,128], index: 2, kind: input, shape index: {}]   ;;  %s7024_s3 = inlined_call_operand.vmem [shape: f32[1,128], index: 3, kind: input, shape index: {}]   ;;  %s7025_s4 = inlined_call_operand.vmem [shape: f32[1,128], index: 4, kind: input, shape index: {}]   ;;  %s7026_s5 = inlined_call_operand.hbm [shape: bf16[6272,128], index: 5, kind: output, shape index: {}]  }
   0x1   :  { %12 = vsyncpa [#allocation3 + $0x1], 0  ;;  %s4702_s18 = smov 0   ;;  %s4704_s19 = smov 0  }
   0x2   :  { %s4706_s20 = smov 0   ;;  %s4708_s21 = smov 0  }
   0x3 LB: > { %s4723_s22 = sadd.s32 4294967295, %s4667_s21   ;;  %s3407_s23 = sadd.s32 4294967294, %s4667_s21   ;;  %s4667_s21 = sphi %s4708_s21, %s7590_s21   ;;  %s4663_s20 = sphi %s4706_s20, %s7589_s20   ;;  %s4659_s19 = sphi %s4704_s19, %s7588_s19   ;;  %s4655_s18 = sphi %s4702_s18, %s7587_s18  }
   0x4   : > { %s4727_s24 = sadd.s32 1, %s4667_s21   ;;  %s135_s25 = sadd.s32 1, %s4663_s20 }
   0x5   : > { %s132_s26 = ssub.s32 %s4667_s21, %s4727_s24  ;;  %p145_p0 = scmp.ne.s32.totalorder %s4663_s20, %s4659_s19 }
   0x6   : > { %p133_p1 = scmp.eq.s32.totalorder %s132_s26, 0  ;;  %p146_p2 = scmp.eq.s32.totalorder %s4723_s22, 6 }
   0x7   : > { %p151_p3 = scmp.ne.s32.totalorder %s4659_s19, %s4655_s18  ;;  %p152_p4 = scmp.eq.s32.totalorder %s3407_s23, 6 }
   0x8   : > { %s4738_s27 = scalar_select %p133_p1, %s4663_s20, %s135_s25  }
   0x9   : > { %p4740_p5 = por %p146_p2, %p145_p0  ;;  %p4744_p6 = por %p152_p4, %p151_p3 }
   0xa   : > { %p3410_p7 = scmp.ge.s32.totalorder %s4667_s21, 1  ;;  %p191_p8 = scmp.lt.s32.totalorder %s4667_s21, 8 }
   0xc   : > { %p192_p9 = pnand %p3410_p7, %p191_p8 }
   0xe   : > { %195 = sbr.rel (%p192_p9) target bundleno = 873 (0x369), region = 40 }
  0x15   : > { %v4318_v0 = vld [vmem:[%s7022_s1] sm:$0xff]   ;;  %s219_s7 = smul.u32 112, %s4723_s22  ;;  %v4319_v1 = vld [vmem:[%s7022_s1 + $0x8] sm:$0xff]   ;;  %v4320_v2 = vld [vmem:[%s7022_s1 + $0x10] sm:$0xff]   ;;  %vm650_vm0 = vcmask 392192   ;;  %s216_s26 = sand.u32 1, %s4659_s19  }
  0x16   : > { %4152 = vmatprep.subr.bf16.mxu0 %v4318_v0  ;;  %4270 = vmatprep.subr.bf16.mxu1 %v4318_v0  ;;  %v4880_v59 = vld [vmem:[%s7023_s2] ss:$0 sm:$0xff]  ;;  %s3757_s17 = smul.u32 7168, %s4723_s22  ;;  %s6980_s22 = scalar_lea.sflag [#allocation3], %s216_s26 }
  0x17   : > { %p220_p10 = scmp.lt.s32.totalorder %s219_s7, 783  ;;  %4153 = vmatpush3.bf16.msra.mxu0 %v4318_v0  ;;  %4273 = vmatpush3.bf16.msra.mxu1 %v4318_v0  ;;  %s4669_s9 = smov [#allocation2]  }
  0x18   : > { %4154 = vmatprep.subr.bf16.mxu0 %v4319_v1  ;;  %4271 = vmatprep.subr.bf16.mxu1 %v4319_v1  ;;  %s6973_s6 = scalar_lea.hbm %s7026_s5, %s3757_s17  ;;  %s4609_s10 = sshll.u32 %s4669_s9, 4  ;;  %s4610_s10 = int_to_ptr.vmem [resolvable:$false] %s4609_s10 }
  0x19   : > { %s7592_s7 = smov (!%p220_p10, %s219_s7), 783  ;;  %s4611_s11 = scalar_lea.vmem %s4610_s10, 14336 }
  0x1a   : > { %s3411_s12 = sshll.u32 %s7592_s7, 2  ;;  %s6431_s7 = smul.u32 448, %s216_s26 }
  0x1b   : > { %4155 = vmatpush3.bf16.msra.mxu0 %v4319_v1  ;;  %4274 = vmatpush3.bf16.msra.mxu1 %v4319_v1  ;;  %s4763_s15 = scalar_lea.vmem %s7021_s0, %s3411_s12 }
  0x1c   : > { %4156 = vmatprep.subr.bf16.mxu0 %v4320_v2  ;;  %4272 = vmatprep.subr.bf16.mxu1 %v4320_v2  ;;  %v4321_v3 = vld [vmem:[%s4763_s15] sm:$0xff]   ;;  %v4323_v5 = vld [vmem:[%s4763_s15 + $0x8] sm:$0xff]   ;;  %v4325_v7 = vld [vmem:[%s4763_s15 + $0x10] sm:$0xff]   ;;  %s6467_s8 = scalar_lea.vmem [#allocation2], %s6431_s7 }
  0x1d   : > { %v4322_v4 = vld [vmem:[%s4763_s15 + $0xe0] sm:$0xff]   ;;  %4158 = vmatprep.mubr.msk.bf16.mxu0 %vm650_vm0, %v4321_v3  ;;  %v4324_v6 = vld [vmem:[%s4763_s15 + $0xe8] sm:$0xff]   ;;  %v4327_v8 = vld [vmem:[%s4763_s15 + $0xf0] sm:$0xff]   ;;  %s3345_s23 = sshll.u32 %s6467_s8, 4  ;;  %s6975_s23 = int_to_ptr.vmem [resolvable:$true] %s3345_s23 }
  0x1e   : > { %4214 = vmatprep.mubr.msk.bf16.mxu1 %vm650_vm0, %v4322_v4  ;;  %v4326_v9 = vld [vmem:[%s4763_s15 + $0x18] sm:$0xff]   ;;  %v4329_v11 = vld [vmem:[%s4763_s15 + $0x20] sm:$0xff]   ;;  %v4330_v13 = vld [vmem:[%s4763_s15 + $0x28] sm:$0xff]   ;;  %s4605_s7 = scalar_lea.vmem %s6975_s23, 7168  ;;  %p4612_p0 = scmp.lt.s32.totalorder %s6975_s23, %s4610_s10 }
  0x1f   : > { %4157 = vmatpush3.bf16.msra.mxu0 %v4320_v2  ;;  %4275 = vmatpush3.bf16.msra.mxu1 %v4320_v2  ;;  %v4328_v10 = vld [vmem:[%s4763_s15 + $0xf8] sm:$0xff]   ;;  %v4331_v12 = vld [vmem:[%s4763_s15 + $0x100] sm:$0xff]   ;;  %v4332_v14 = vld [vmem:[%s4763_s15 + $0x108] sm:$0xff]   ;;  %p4606_p11 = scmp.ne.s32.totalorder %s6975_s23, %s4605_s7  ;;  %p4613_p1 = scmp.lt.s32.totalorder %s4611_s11, %s4605_s7 }
  0x20   : > { %v4333_v15 = vld [vmem:[%s4763_s15 + $0x30] sm:$0xff]   ;;  %v4334_v17 = vld [vmem:[%s4763_s15 + $0x38] sm:$0xff]   ;;  %v4337_v19 = vld [vmem:[%s4763_s15 + $0x40] sm:$0xff]  }
  0x21   : > { %v4335_v16 = vld [vmem:[%s4763_s15 + $0x110] sm:$0xff]   ;;  %v4336_v18 = vld [vmem:[%s4763_s15 + $0x118] sm:$0xff]   ;;  %v4339_v20 = vld [vmem:[%s4763_s15 + $0x120] sm:$0xff]   ;;  %p4607_p12 = pnand %p4606_p11, %p4740_p5  ;;  %p4614_p2 = por %p4613_p1, %p4612_p0 }
  0x22   : > { %4159 = vmatmul.mubr.msk.bf16.vlgmr.msra.gmra.mrb[0].mxu0 %vm650_vm0, %v4323_v5  ;;  %4215 = vmatmul.mubr.msk.bf16.vlgmr.msra.gmra.mrb[0].mxu1 %vm650_vm0, %v4324_v6  ;;  %v4338_v21 = vld [vmem:[%s4763_s15 + $0x48] sm:$0xff]   ;;  %v4341_v23 = vld [vmem:[%s4763_s15 + $0x50] sm:$0xff]   ;;  %v4342_v25 = vld [vmem:[%s4763_s15 + $0x58] sm:$0xff]  }
  0x23   : > { %4162 = vmatprep.mubr.msk.bf16.mxu0 %vm650_vm0, %v4325_v7  ;;  %4218 = vmatprep.mubr.msk.bf16.mxu1 %vm650_vm0, %v4327_v8  ;;  %v4340_v22 = vld [vmem:[%s4763_s15 + $0x128] sm:$0xff]   ;;  %v4343_v24 = vld [vmem:[%s4763_s15 + $0x130] sm:$0xff]   ;;  %v4344_v26 = vld [vmem:[%s4763_s15 + $0x138] sm:$0xff]   ;;  %p4608_p13 = pneg %p4607_p12 }
  0x24   : > { %v4345_v27 = vld [vmem:[%s4763_s15 + $0x60] sm:$0xff]   ;;  %v4346_v29 = vld [vmem:[%s4763_s15 + $0x68] sm:$0xff]   ;;  %v4349_v31 = vld [vmem:[%s4763_s15 + $0x70] sm:$0xff]  }
  0x25   : > { %v4347_v28 = vld [vmem:[%s4763_s15 + $0x140] sm:$0xff]   ;;  %v4348_v30 = vld [vmem:[%s4763_s15 + $0x148] sm:$0xff]   ;;  %v4351_v32 = vld [vmem:[%s4763_s15 + $0x150] sm:$0xff]   ;;  %p4615_p3 = pnand %p4614_p2, %p4608_p13 }
  0x26   : > { %v4350_v33 = vld [vmem:[%s4763_s15 + $0x78] sm:$0xff]   ;;  %v4353_v35 = vld [vmem:[%s4763_s15 + $0x80] sm:$0xff]   ;;  %v4354_v37 = vld [vmem:[%s4763_s15 + $0x88] sm:$0xff]  }
  0x27   : > { %v4352_v34 = vld [vmem:[%s4763_s15 + $0x158] sm:$0xff]   ;;  %v4355_v36 = vld [vmem:[%s4763_s15 + $0x160] sm:$0xff]   ;;  %v4356_v38 = vld [vmem:[%s4763_s15 + $0x168] sm:$0xff]  }
  0x28   : > { %v4357_v39 = vld [vmem:[%s4763_s15 + $0x90] sm:$0xff]   ;;  %v4358_v41 = vld [vmem:[%s4763_s15 + $0x98] sm:$0xff]   ;;  %v4361_v43 = vld [vmem:[%s4763_s15 + $0xa0] sm:$0xff]  }
  0x29   : > { %v4359_v40 = vld [vmem:[%s4763_s15 + $0x170] sm:$0xff]   ;;  %v4360_v42 = vld [vmem:[%s4763_s15 + $0x178] sm:$0xff]   ;;  %v4363_v44 = vld [vmem:[%s4763_s15 + $0x180] sm:$0xff]  }
  0x2a   : > { %4163 = vmatmul.mubr.msk.bf16.gmra.mrb[4].mxu0 %vm650_vm0, %v4326_v9  ;;  %4219 = vmatmul.mubr.msk.bf16.gmra.mrb[4].mxu1 %vm650_vm0, %v4328_v10  ;;  %v4362_v45 = vld [vmem:[%s4763_s15 + $0xa8] sm:$0xff]   ;;  %v4365_v47 = vld [vmem:[%s4763_s15 + $0xb0] sm:$0xff]   ;;  %v4366_v49 = vld [vmem:[%s4763_s15 + $0xb8] sm:$0xff]  }
  0x2b   : > { %4166 = vmatprep.mubr.msk.bf16.mxu0 %vm650_vm0, %v4329_v11  ;;  %4222 = vmatprep.mubr.msk.bf16.mxu1 %vm650_vm0, %v4331_v12  ;;  %v4364_v46 = vld [vmem:[%s4763_s15 + $0x188] sm:$0xff]   ;;  %v4367_v48 = vld [vmem:[%s4763_s15 + $0x190] sm:$0xff]   ;;  %v4368_v50 = vld [vmem:[%s4763_s15 + $0x198] sm:$0xff]  }
  0x2c   : > { %v4369_v51 = vld [vmem:[%s4763_s15 + $0xc0] sm:$0xff]   ;;  %v4370_v53 = vld [vmem:[%s4763_s15 + $0xc8] sm:$0xff]   ;;  %v4373_v55 = vld [vmem:[%s4763_s15 + $0xd0] sm:$0xff]  }
  0x2d   : > { %v4371_v52 = vld [vmem:[%s4763_s15 + $0x1a0] sm:$0xff]   ;;  %v4372_v54 = vld [vmem:[%s4763_s15 + $0x1a8] sm:$0xff]   ;;  %v4375_v56 = vld [vmem:[%s4763_s15 + $0x1b0] sm:$0xff]  }
  0x2e   : > { %v4374_v57 = vld [vmem:[%s4763_s15 + $0xd8] sm:$0xff]  }
  0x2f   : > { %v4376_v58 = vld [vmem:[%s4763_s15 + $0x1b8] sm:$0xff]  }
  0x32   : > { %4167 = vmatmul.mubr.msk.bf16.gmra.mrb[8].mxu0 %vm650_vm0, %v4330_v13  ;;  %4223 = vmatmul.mubr.msk.bf16.gmra.mrb[8].mxu1 %vm650_vm0, %v4332_v14 }
  0x33   : > { %4170 = vmatprep.mubr.msk.bf16.mxu0 %vm650_vm0, %v4333_v15  ;;  %4226 = vmatprep.mubr.msk.bf16.mxu1 %vm650_vm0, %v4335_v16 }
  0x3a   : > { %4171 = vmatmul.mubr.msk.bf16.gmra.mrb[12].mxu0 %vm650_vm0, %v4334_v17  ;;  %4227 = vmatmul.mubr.msk.bf16.gmra.mrb[12].mxu1 %vm650_vm0, %v4336_v18 }
  0x3b   : > { %4174 = vmatprep.mubr.msk.bf16.mxu0 %vm650_vm0, %v4337_v19  ;;  %4230 = vmatprep.mubr.msk.bf16.mxu1 %vm650_vm0, %v4339_v20 }
  0x42   : > { %4175 = vmatmul.mubr.msk.bf16.gmra.mrb[16].mxu0 %vm650_vm0, %v4338_v21  ;;  %4231 = vmatmul.mubr.msk.bf16.gmra.mrb[16].mxu1 %vm650_vm0, %v4340_v22 }
  0x43   : > { %4178 = vmatprep.mubr.msk.bf16.mxu0 %vm650_vm0, %v4341_v23  ;;  %4234 = vmatprep.mubr.msk.bf16.mxu1 %vm650_vm0, %v4343_v24 }
  0x4a   : > { %4179 = vmatmul.mubr.msk.bf16.gmra.mrb[20].mxu0 %vm650_vm0, %v4342_v25  ;;  %4235 = vmatmul.mubr.msk.bf16.gmra.mrb[20].mxu1 %vm650_vm0, %v4344_v26 }
  0x4b   : > { %4182 = vmatprep.mubr.msk.bf16.mxu0 %vm650_vm0, %v4345_v27  ;;  %4238 = vmatprep.mubr.msk.bf16.mxu1 %vm650_vm0, %v4347_v28 }
  0x52   : > { %4183 = vmatmul.mubr.msk.bf16.gmra.mrb[24].mxu0 %vm650_vm0, %v4346_v29  ;;  %4239 = vmatmul.mubr.msk.bf16.gmra.mrb[24].mxu1 %vm650_vm0, %v4348_v30 }
  0x53   : > { %4186 = vmatprep.mubr.msk.bf16.mxu0 %vm650_vm0, %v4349_v31  ;;  %4242 = vmatprep.mubr.msk.bf16.mxu1 %vm650_vm0, %v4351_v32 }
  0x5a   : > { %4187 = vmatmul.mubr.msk.bf16.gmra.mrb[28].mxu0 %vm650_vm0, %v4350_v33  ;;  %4243 = vmatmul.mubr.msk.bf16.gmra.mrb[28].mxu1 %vm650_vm0, %v4352_v34 }
  0x5b   : > { %4190 = vmatprep.mubr.msk.bf16.mxu0 %vm650_vm0, %v4353_v35  ;;  %4246 = vmatprep.mubr.msk.bf16.mxu1 %vm650_vm0, %v4355_v36 }
  0x62   : > { %4191 = vmatmul.mubr.msk.bf16.gmra.mrb[32].mxu0 %vm650_vm0, %v4354_v37  ;;  %4247 = vmatmul.mubr.msk.bf16.gmra.mrb[32].mxu1 %vm650_vm0, %v4356_v38 }
  0x63   : > { %4194 = vmatprep.mubr.msk.bf16.mxu0 %vm650_vm0, %v4357_v39  ;;  %4250 = vmatprep.mubr.msk.bf16.mxu1 %vm650_vm0, %v4359_v40 }
  0x6a   : > { %4195 = vmatmul.mubr.msk.bf16.gmra.mrb[36].mxu0 %vm650_vm0, %v4358_v41  ;;  %4251 = vmatmul.mubr.msk.bf16.gmra.mrb[36].mxu1 %vm650_vm0, %v4360_v42 }
  0x6b   : > { %4198 = vmatprep.mubr.msk.bf16.mxu0 %vm650_vm0, %v4361_v43  ;;  %4254 = vmatprep.mubr.msk.bf16.mxu1 %vm650_vm0, %v4363_v44 }
  0x72   : > { %4199 = vmatmul.mubr.msk.bf16.gmra.mrb[40].mxu0 %vm650_vm0, %v4362_v45  ;;  %4255 = vmatmul.mubr.msk.bf16.gmra.mrb[40].mxu1 %vm650_vm0, %v4364_v46 }
  0x73   : > { %4202 = vmatprep.mubr.msk.bf16.mxu0 %vm650_vm0, %v4365_v47  ;;  %4258 = vmatprep.mubr.msk.bf16.mxu1 %vm650_vm0, %v4367_v48 }
  0x7a   : > { %4203 = vmatmul.mubr.msk.bf16.gmra.mrb[44].mxu0 %vm650_vm0, %v4366_v49  ;;  %4259 = vmatmul.mubr.msk.bf16.gmra.mrb[44].mxu1 %vm650_vm0, %v4368_v50 }
  0x7b   : > { %4206 = vmatprep.mubr.msk.bf16.mxu0 %vm650_vm0, %v4369_v51  ;;  %4262 = vmatprep.mubr.msk.bf16.mxu1 %vm650_vm0, %v4371_v52 }
  0x82   : > { %4207 = vmatmul.mubr.msk.bf16.gmra.mrb[48].mxu0 %vm650_vm0, %v4370_v53  ;;  %4263 = vmatmul.mubr.msk.bf16.gmra.mrb[48].mxu1 %vm650_vm0, %v4372_v54 }
  0x83   : > { %4210 = vmatprep.mubr.msk.bf16.mxu0 %vm650_vm0, %v4373_v55  ;;  %4266 = vmatprep.mubr.msk.bf16.mxu1 %vm650_vm0, %v4375_v56 }
  0x8a   : > { %4211 = vmatmul.mubr.msk.bf16.gmra.mrb[52].mxu0 %vm650_vm0, %v4374_v57  ;;  %4267 = vmatmul.mubr.msk.bf16.gmra.mrb[52].mxu1 %vm650_vm0, %v4376_v58 }
  0xf5   : > { %v4160_v60 = vpop.f32.mrb[0].mxu0  ;;  %v4216_v61 = vpop.f32.mrb[0].mxu1 }
  0xf6   : > { %v4883_v62 = vadd.f32 %v4160_v60, %v4880_v59  ;;  %v4886_v63 = vadd.f32 %v4216_v61, %v4880_v59  ;;  %v853_v0 = vpop.f32.mrb[1].mxu0  ;;  %v1077_v1 = vpop.f32.mrb[1].mxu1 }
  0xf7   : > { %v4161_v2 = vpop.f32.mrb[2].mxu0  ;;  %v4217_v3 = vpop.f32.mrb[2].mxu1  ;;  %v4891_v6 = vadd.f32 %v4880_v59, %v853_v0  ;;  %v4899_v10 = vadd.f32 %v4880_v59, %v1077_v1 }
  0xf8   : > { %7215 = vst [vmem:[#allocation5_spill] sm:$0xff] %v4886_v63  ;;  %1416 = vadd.xlane.f32.xlu0 %v4886_v63  ;;  %v1080_v4 = vpop.f32.mrb[3].mxu1  ;;  %1304 = vadd.xlane.f32.xlu1 %v4883_v62  ;;  %v856_v5 = vpop.f32.mrb[3].mxu0  ;;  %v4894_v7 = vadd.f32 %v4161_v2, %v4880_v59  ;;  %v4902_v11 = vadd.f32 %v4217_v3, %v4880_v59 }
  0xf9   : > { %7216 = vst [vmem:[#allocation6_spill] sm:$0xff] %v4891_v6  ;;  %7218 = vst [vmem:[#allocation8_spill] sm:$0xff] %v4899_v10  ;;  %v4907_v18 = vadd.f32 %v4880_v59, %v1080_v4  ;;  %v4910_v19 = vadd.f32 %v4880_v59, %v856_v5 }
  0xfa   : > { %7217 = vst [vmem:[#allocation7_spill] sm:$0xff] %v4894_v7  ;;  %7219 = vst [vmem:[#allocation9_spill] sm:$0xff] %v4902_v11 }
  0xfb   : > { %7220 = vst [vmem:[#allocation10_spill] sm:$0xff] %v4907_v18  ;;  %7221 = vst [vmem:[#allocation11_spill] sm:$0xff] %v4910_v19 }
  0xfc   : > { %1306 = vadd.xlane.f32.xlu1 %v4894_v7  ;;  %1300 = vadd.xlane.f32.xlu0 %v4891_v6 }
  0xfd   : > { %v4164_v8 = vpop.f32.mrb[4].mxu0  ;;  %v4220_v9 = vpop.f32.mrb[4].mxu1 }
  0xfe   : > { %v869_v12 = vpop.f32.mrb[5].mxu0  ;;  %v1093_v13 = vpop.f32.mrb[5].mxu1  ;;  %v4915_v22 = vadd.f32 %v4164_v8, %v4880_v59  ;;  %v4923_v30 = vadd.f32 %v4220_v9, %v4880_v59 }
  0xff   : > { %v4165_v14 = vpop.f32.mrb[6].mxu0  ;;  %v4221_v15 = vpop.f32.mrb[6].mxu1  ;;  %v4931_v34 = vadd.f32 %v4880_v59, %v869_v12  ;;  %v4943_v42 = vadd.f32 %v4880_v59, %v1093_v13 }
 0x100   : > { %1418 = vadd.xlane.f32.xlu1 %v4902_v11  ;;  %1412 = vadd.xlane.f32.xlu0 %v4899_v10  ;;  %v872_v16 = vpop.f32.mrb[7].mxu0  ;;  %v1096_v17 = vpop.f32.mrb[7].mxu1  ;;  %7222 = vst [vmem:[#allocation12_spill] sm:$0xff] %v4915_v22  ;;  %v4918_v23 = vadd.f32 %v4165_v14, %v4880_v59  ;;  %7224 = vst [vmem:[#allocation14_spill] sm:$0xff] %v4923_v30  ;;  %v4926_v31 = vadd.f32 %v4221_v15, %v4880_v59 }
 0x101   : > { %7226 = vst [vmem:[#allocation16_spill] sm:$0xff] %v4931_v34  ;;  %v4934_v35 = vadd.f32 %v4880_v59, %v872_v16  ;;  %7228 = vst [vmem:[#allocation18_spill] sm:$0xff] %v4943_v42  ;;  %v4946_v43 = vadd.f32 %v4880_v59, %v1096_v17 }
 0x102   : > { %7223 = vst [vmem:[#allocation13_spill] sm:$0xff] %v4918_v23  ;;  %7225 = vst [vmem:[#allocation15_spill] sm:$0xff] %v4926_v31 }
 0x103   : > { %7227 = vst [vmem:[#allocation17_spill] sm:$0xff] %v4934_v35  ;;  %7229 = vst [vmem:[#allocation19_spill] sm:$0xff] %v4946_v43 }
 0x104   : > { %1414 = vadd.xlane.f32.xlu1 %v4907_v18  ;;  %1302 = vadd.xlane.f32.xlu0 %v4910_v19 }
 0x105   : > { %v4168_v20 = vpop.f32.mrb[8].mxu0  ;;  %v4224_v21 = vpop.f32.mrb[8].mxu1 }
 0x106   : > { %v885_v24 = vpop.f32.mrb[9].mxu0  ;;  %v1109_v25 = vpop.f32.mrb[9].mxu1  ;;  %v4955_v46 = vadd.f32 %v4168_v20, %v4880_v59  ;;  %v4973_v54 = vadd.f32 %v4224_v21, %v4880_v59 }
 0x107   : > { %v4169_v26 = vpop.f32.mrb[10].mxu0  ;;  %v4225_v27 = vpop.f32.mrb[10].mxu1  ;;  %v4985_v58 = vadd.f32 %v4880_v59, %v885_v24  ;;  %v5005_v5 = vadd.f32 %v4880_v59, %v1109_v25 }
 0x108   : > { %1314 = vadd.xlane.f32.xlu1 %v4918_v23  ;;  %1312 = vadd.xlane.f32.xlu0 %v4915_v22  ;;  %v888_v28 = vpop.f32.mrb[11].mxu0  ;;  %v1112_v29 = vpop.f32.mrb[11].mxu1  ;;  %7230 = vst [vmem:[#allocation20_spill] sm:$0xff] %v4955_v46  ;;  %v4958_v47 = vadd.f32 %v4169_v26, %v4880_v59  ;;  %7232 = vst [vmem:[#allocation22_spill] sm:$0xff] %v4973_v54  ;;  %v4976_v55 = vadd.f32 %v4225_v27, %v4880_v59 }
 0x109   : > { %7234 = vst [vmem:[#allocation24_spill] sm:$0xff] %v4985_v58  ;;  %v4988_v60 = vadd.f32 %v4880_v59, %v888_v28  ;;  %7236 = vst [vmem:[#allocation26_spill] sm:$0xff] %v5005_v5  ;;  %v5008_v8 = vadd.f32 %v4880_v59, %v1112_v29 }
 0x10a   : > { %7231 = vst [vmem:[#allocation21_spill] sm:$0xff] %v4958_v47  ;;  %7233 = vst [vmem:[#allocation23_spill] sm:$0xff] %v4976_v55 }
 0x10b   : > { %7235 = vst [vmem:[#allocation25_spill] sm:$0xff] %v4988_v60  ;;  %7237 = vst [vmem:[#allocation27_spill] sm:$0xff] %v5008_v8 }
 0x10c   : > { %1426 = vadd.xlane.f32.xlu1 %v4926_v31  ;;  %1424 = vadd.xlane.f32.xlu0 %v4923_v30 }
 0x10d   : > { %v4172_v32 = vpop.f32.mrb[12].mxu0  ;;  %v4228_v33 = vpop.f32.mrb[12].mxu1 }
 0x10e   : > { %v901_v36 = vpop.f32.mrb[13].mxu0  ;;  %v4936_v37 = vpop.f32.mrb[13].mxu1  ;;  %v5017_v13 = vadd.f32 %v4172_v32, %v4880_v59  ;;  %v5037_v25 = vadd.f32 %v4228_v33, %v4880_v59 }
 0x10f   : > { %v4173_v38 = vpop.f32.mrb[14].mxu0  ;;  %v4229_v39 = vpop.f32.mrb[14].mxu1  ;;  %v5049_v29 = vadd.f32 %v4880_v59, %v901_v36  ;;  %v5070_v36 = vadd.f32 %v4880_v59, %v4936_v37 }
 0x110   : > { %1310 = vadd.xlane.f32.xlu1 %v4934_v35  ;;  %1308 = vadd.xlane.f32.xlu0 %v4931_v34  ;;  %v904_v40 = vpop.f32.mrb[15].mxu0  ;;  %v4940_v41 = vpop.f32.mrb[15].mxu1  ;;  %7238 = vst [vmem:[#allocation28_spill] sm:$0xff] %v5017_v13  ;;  %v5020_v14 = vadd.f32 %v4173_v38, %v4880_v59  ;;  %7240 = vst [vmem:[#allocation30_spill] sm:$0xff] %v5037_v25  ;;  %v5040_v26 = vadd.f32 %v4229_v39, %v4880_v59 }
 0x111   : > { %7242 = vst [vmem:[#allocation32_spill] sm:$0xff] %v5049_v29  ;;  %v5052_v32 = vadd.f32 %v4880_v59, %v904_v40  ;;  %7244 = vst [vmem:[#allocation34_spill] sm:$0xff] %v5070_v36  ;;  %v5074_v40 = vadd.f32 %v4880_v59, %v4940_v41 }
 0x112   : > { %7239 = vst [vmem:[#allocation29_spill] sm:$0xff] %v5020_v14  ;;  %7241 = vst [vmem:[#allocation31_spill] sm:$0xff] %v5040_v26 }
 0x113   : > { %7243 = vst [vmem:[#allocation33_spill] sm:$0xff] %v5052_v32  ;;  %7245 = vst [vmem:[#allocation35_spill] sm:$0xff] %v5074_v40 }
 0x114   : > { %1422 = vadd.xlane.f32.xlu1 %v4946_v43  ;;  %1420 = vadd.xlane.f32.xlu0 %v4943_v42 }
 0x115   : > { %v4950_v44 = vpop.f32.mrb[16].mxu0  ;;  %v4952_v45 = vpop.f32.mrb[16].mxu1 }
 0x116   : > { %v4960_v48 = vpop.f32.mrb[17].mxu0  ;;  %v4962_v49 = vpop.f32.mrb[17].mxu1 }
 0x117   : > { %v4177_v50 = vpop.f32.mrb[18].mxu0  ;;  %v4964_v51 = vpop.f32.mrb[18].mxu1 }
 0x118   : > { %1322 = vadd.xlane.f32.xlu1 %v4958_v47  ;;  %1320 = vadd.xlane.f32.xlu0 %v4955_v46  ;;  %v4968_v52 = vpop.f32.mrb[19].mxu0  ;;  %v4970_v53 = vpop.f32.mrb[19].mxu1 }
 0x119   : > { %v5145_v46 = vadd.f32 %v4880_v59, %v4970_v53 }
 0x11b   : > { %7253 = vst [vmem:[#allocation43_spill] sm:$0xff] %v5145_v46 }
 0x11c   : > { %1434 = vadd.xlane.f32.xlu1 %v4976_v55  ;;  %1432 = vadd.xlane.f32.xlu0 %v4973_v54 }
 0x11d   : > { %v4980_v56 = vpop.f32.mrb[20].mxu0  ;;  %v4982_v57 = vpop.f32.mrb[20].mxu1 }
 0x11e   : > { %v4990_v61 = vpop.f32.mrb[21].mxu0  ;;  %v4992_v0 = vpop.f32.mrb[21].mxu1 }
 0x11f   : > { %v4994_v1 = vpop.f32.mrb[22].mxu0  ;;  %v4996_v2 = vpop.f32.mrb[22].mxu1 }
 0x120   : > { %1318 = vadd.xlane.f32.xlu1 %v4988_v60  ;;  %1316 = vadd.xlane.f32.xlu0 %v4985_v58  ;;  %v5000_v3 = vpop.f32.mrb[23].mxu0  ;;  %v5002_v4 = vpop.f32.mrb[23].mxu1  ;;  %v5181_v34 = vadd.f32 %v4996_v2, %v4880_v59 }
 0x121   : > { %v5217_v22 = vadd.f32 %v4880_v59, %v5002_v4 }
 0x122   : > { %7257 = vst [vmem:[#allocation47_spill] sm:$0xff] %v5181_v34 }
 0x123   : > { %7261 = vst [vmem:[#allocation51_spill] sm:$0xff] %v5217_v22 }
 0x124   : > { %1430 = vadd.xlane.f32.xlu1 %v5008_v8  ;;  %1428 = vadd.xlane.f32.xlu0 %v5005_v5  ;;  %v5087_v5 = vadd.f32 %v4177_v50, %v4880_v59  ;;  %v5109_v50 = vadd.f32 %v4964_v51, %v4880_v59 }
 0x125   : > { %v5012_v9 = vpop.f32.mrb[24].mxu0  ;;  %v5014_v12 = vpop.f32.mrb[24].mxu1 }
 0x126   : > { %v5022_v15 = vpop.f32.mrb[25].mxu0  ;;  %v5024_v16 = vpop.f32.mrb[25].mxu1  ;;  %7247 = vst [vmem:[#allocation37_spill] sm:$0xff] %v5087_v5  ;;  %7249 = vst [vmem:[#allocation39_spill] sm:$0xff] %v5109_v50 }
 0x127   : > { %v5026_v17 = vpop.f32.mrb[26].mxu0  ;;  %v5028_v20 = vpop.f32.mrb[26].mxu1 }
 0x128   : > { %1330 = vadd.xlane.f32.xlu1 %v5020_v14  ;;  %1328 = vadd.xlane.f32.xlu0 %v5017_v13  ;;  %v5032_v21 = vpop.f32.mrb[27].mxu0  ;;  %v5034_v24 = vpop.f32.mrb[27].mxu1  ;;  %v5253_v19 = vadd.f32 %v5028_v20, %v4880_v59 }
 0x129   : > { %v5289_v7 = vadd.f32 %v4880_v59, %v5034_v24 }
 0x12a   : > { %7265 = vst [vmem:[#allocation55_spill] sm:$0xff] %v5253_v19 }
 0x12c   : > { %1442 = vadd.xlane.f32.xlu1 %v5040_v26  ;;  %1440 = vadd.xlane.f32.xlu0 %v5037_v25 }
 0x12d   : > { %v5044_v27 = vpop.f32.mrb[28].mxu0  ;;  %v5046_v28 = vpop.f32.mrb[28].mxu1 }
 0x12e   : > { %v5054_v38 = vpop.f32.mrb[29].mxu0  ;;  %v5056_v33 = vpop.f32.mrb[29].mxu1 }
 0x12f   : > { %v5058_v39 = vpop.f32.mrb[30].mxu0  ;;  %v5060_v13 = vpop.f32.mrb[30].mxu1 }
 0x130   : > { %1326 = vadd.xlane.f32.xlu1 %v5052_v32  ;;  %1324 = vadd.xlane.f32.xlu0 %v5049_v29  ;;  %v5064_v25 = vpop.f32.mrb[31].mxu0  ;;  %v5066_v26 = vpop.f32.mrb[31].mxu1  ;;  %v5084_v29 = vadd.f32 %v4950_v44, %v4880_v59  ;;  %v5105_v44 = vadd.f32 %v4952_v45, %v4880_v59  ;;  %v5123_v45 = vadd.f32 %v4880_v59, %v4968_v52 }
 0x131   : > { %v5141_v52 = vadd.f32 %v4880_v59, %v4962_v49  ;;  %v5159_v49 = vadd.f32 %v4994_v1, %v4880_v59  ;;  %v5177_v1 = vadd.f32 %v4982_v57, %v4880_v59  ;;  %v5195_v57 = vadd.f32 %v4880_v59, %v5000_v3 }
 0x132   : > { %7246 = vst [vmem:[#allocation36_spill] sm:$0xff] %v5084_v29  ;;  %7248 = vst [vmem:[#allocation38_spill] sm:$0xff] %v5105_v44  ;;  %v5213_v3 = vadd.f32 %v4880_v59, %v4992_v0  ;;  %v5231_v0 = vadd.f32 %v5026_v17, %v4880_v59  ;;  %v5249_v17 = vadd.f32 %v5014_v12, %v4880_v59 }
 0x133   : > { %7251 = vst [vmem:[#allocation41_spill] sm:$0xff] %v5123_v45  ;;  %7252 = vst [vmem:[#allocation42_spill] sm:$0xff] %v5141_v52  ;;  %v5267_v12 = vadd.f32 %v4880_v59, %v5032_v21  ;;  %v5285_v21 = vadd.f32 %v4880_v59, %v5024_v16  ;;  %v5305_v16 = vadd.f32 %v5046_v28, %v4880_v59 }
 0x134   : > { %1438 = vadd.xlane.f32.xlu1 %v5074_v40  ;;  %1436 = vadd.xlane.f32.xlu0 %v5070_v36  ;;  %7255 = vst [vmem:[#allocation45_spill] sm:$0xff] %v5159_v49  ;;  %7256 = vst [vmem:[#allocation46_spill] sm:$0xff] %v5177_v1  ;;  %v5309_v24 = vadd.f32 %v5060_v13, %v4880_v59  ;;  %v5325_v13 = vadd.f32 %v4880_v59, %v5056_v33 }
 0x135   : > { %v5078_v14 = vpop.f32.mrb[32].mxu0  ;;  %v5080_v32 = vpop.f32.mrb[32].mxu1  ;;  %7259 = vst [vmem:[#allocation49_spill] sm:$0xff] %v5195_v57  ;;  %7260 = vst [vmem:[#allocation50_spill] sm:$0xff] %v5213_v3  ;;  %v5329_v28 = vadd.f32 %v4880_v59, %v5066_v26 }
 0x136   : > { %v5089_v37 = vpop.f32.mrb[33].mxu0  ;;  %v5091_v8 = vpop.f32.mrb[33].mxu1  ;;  %7263 = vst [vmem:[#allocation53_spill] sm:$0xff] %v5231_v0  ;;  %7264 = vst [vmem:[#allocation54_spill] sm:$0xff] %v5249_v17  ;;  %v5345_v26 = vadd.f32 %v5080_v32, %v4880_v59 }
 0x137   : > { %v5093_v41 = vpop.f32.mrb[34].mxu0  ;;  %v5095_v40 = vpop.f32.mrb[34].mxu1  ;;  %7267 = vst [vmem:[#allocation57_spill] sm:$0xff] %v5267_v12  ;;  %v5365_v32 = vadd.f32 %v4880_v59, %v5091_v8 }
 0x138   : > { %1338 = vadd.xlane.f32.xlu1 %v5087_v5  ;;  %1336 = vadd.xlane.f32.xlu0 %v5084_v29  ;;  %v5099_v36 = vpop.f32.mrb[35].mxu0  ;;  %v5101_v58 = vpop.f32.mrb[35].mxu1  ;;  %v5119_v29 = vadd.f32 %v4880_v59, %v4960_v48  ;;  %7269 = vst [vmem:[#allocation59_spill] sm:$0xff] %v5345_v26  ;;  %v5349_v33 = vadd.f32 %v5095_v40, %v4880_v59 }
 0x139   : > { %7273 = vst [vmem:[#allocation63_spill] sm:$0xff] %v5365_v32  ;;  %v5369_v40 = vadd.f32 %v4880_v59, %v5101_v58 }
 0x13a   : > { %7250 = vst [vmem:[#allocation40_spill] sm:$0xff] %v5119_v29  ;;  %7270 = vst [vmem:[#allocation60_spill] sm:$0xff] %v5349_v33 }
 0x13b   : > { %7274 = vst [vmem:[#allocation64_spill] sm:$0xff] %v5369_v40 }
 0x13c   : > { %1450 = vadd.xlane.f32.xlu1 %v5109_v50  ;;  %1448 = vadd.xlane.f32.xlu0 %v5105_v44 }
 0x13d   : > { %v5113_v60 = vpop.f32.mrb[36].mxu0  ;;  %v5115_v5 = vpop.f32.mrb[36].mxu1 }
 0x13e   : > { %v5125_v54 = vpop.f32.mrb[37].mxu0  ;;  %v5127_v51 = vpop.f32.mrb[37].mxu1 }
 0x13f   : > { %v5129_v55 = vpop.f32.mrb[38].mxu0  ;;  %v5131_v50 = vpop.f32.mrb[38].mxu1 }
 0x140   : > { %1334 = vadd.xlane.f32.xlu1 %v5123_v45  ;;  %1332 = vadd.xlane.f32.xlu0 %v5119_v29  ;;  %v5135_v44 = vpop.f32.mrb[39].mxu0  ;;  %v5137_v48 = vpop.f32.mrb[39].mxu1  ;;  %v5155_v29 = vadd.f32 %v4980_v56, %v4880_v59  ;;  %v5383_v8 = vadd.f32 %v5129_v55, %v4880_v59 }
 0x142   : > { %7254 = vst [vmem:[#allocation44_spill] sm:$0xff] %v5155_v29  ;;  %7276 = vst [vmem:[#allocation66_spill] sm:$0xff] %v5383_v8 }
 0x144   : > { %1446 = vadd.xlane.f32.xlu1 %v5145_v46  ;;  %1444 = vadd.xlane.f32.xlu0 %v5141_v52 }
 0x145   : > { %v5149_v47 = vpop.f32.mrb[40].mxu0  ;;  %v5151_v45 = vpop.f32.mrb[40].mxu1 }
 0x146   : > { %v5161_v42 = vpop.f32.mrb[41].mxu0  ;;  %v5163_v53 = vpop.f32.mrb[41].mxu1 }
 0x147   : > { %v5165_v43 = vpop.f32.mrb[42].mxu0  ;;  %v5167_v46 = vpop.f32.mrb[42].mxu1 }
 0x148   : > { %1346 = vadd.xlane.f32.xlu1 %v5159_v49  ;;  %1344 = vadd.xlane.f32.xlu0 %v5155_v29  ;;  %v5171_v52 = vpop.f32.mrb[43].mxu0  ;;  %v5173_v56 = vpop.f32.mrb[43].mxu1  ;;  %v5191_v29 = vadd.f32 %v4880_v59, %v4990_v61 }
 0x14a   : > { %7258 = vst [vmem:[#allocation48_spill] sm:$0xff] %v5191_v29 }
 0x14c   : > { %1458 = vadd.xlane.f32.xlu1 %v5181_v34  ;;  %1456 = vadd.xlane.f32.xlu0 %v5177_v1 }
 0x14d   : > { %v5185_v35 = vpop.f32.mrb[44].mxu0  ;;  %v5187_v49 = vpop.f32.mrb[44].mxu1 }
 0x14e   : > { %v5197_v30 = vpop.f32.mrb[45].mxu0  ;;  %v5199_v2 = vpop.f32.mrb[45].mxu1 }
 0x14f   : > { %v5201_v31 = vpop.f32.mrb[46].mxu0  ;;  %v5203_v34 = vpop.f32.mrb[46].mxu1 }
 0x150   : > { %1342 = vadd.xlane.f32.xlu1 %v5195_v57  ;;  %1340 = vadd.xlane.f32.xlu0 %v5191_v29  ;;  %v5207_v1 = vpop.f32.mrb[47].mxu0  ;;  %v5209_v61 = vpop.f32.mrb[47].mxu1  ;;  %v5227_v29 = vadd.f32 %v5012_v9, %v4880_v59 }
 0x152   : > { %7262 = vst [vmem:[#allocation52_spill] sm:$0xff] %v5227_v29 }
 0x154   : > { %1454 = vadd.xlane.f32.xlu1 %v5217_v22  ;;  %1452 = vadd.xlane.f32.xlu0 %v5213_v3 }
 0x155   : > { %v5221_v23 = vpop.f32.mrb[48].mxu0  ;;  %v5223_v57 = vpop.f32.mrb[48].mxu1 }
 0x156   : > { %v5233_v18 = vpop.f32.mrb[49].mxu0  ;;  %v5235_v4 = vpop.f32.mrb[49].mxu1 }
 0x157   : > { %v5237_v10 = vpop.f32.mrb[50].mxu0  ;;  %v5239_v22 = vpop.f32.mrb[50].mxu1 }
 0x158   : > { %1354 = vadd.xlane.f32.xlu1 %v5231_v0  ;;  %1352 = vadd.xlane.f32.xlu0 %v5227_v29  ;;  %v5243_v3 = vpop.f32.mrb[51].mxu0  ;;  %v5245_v9 = vpop.f32.mrb[51].mxu1  ;;  %v5263_v29 = vadd.f32 %v4880_v59, %v5022_v15 }
 0x15a   : > { %7266 = vst [vmem:[#allocation56_spill] sm:$0xff] %v5263_v29 }
 0x15c   : > { %1466 = vadd.xlane.f32.xlu1 %v5253_v19  ;;  %1464 = vadd.xlane.f32.xlu0 %v5249_v17 }
 0x15d   : > { %v5257_v6 = vpop.f32.mrb[52].mxu0  ;;  %v5259_v0 = vpop.f32.mrb[52].mxu1 }
 0x15e   : > { %v5269_v11 = vpop.f32.mrb[53].mxu0  ;;  %v5271_v20 = vpop.f32.mrb[53].mxu1 }
 0x15f   : > { %v5273_v63 = vpop.f32.mrb[54].mxu0  ;;  %v5275_v19 = vpop.f32.mrb[54].mxu1 }
 0x160   : > { %1350 = vadd.xlane.f32.xlu1 %v5267_v12  ;;  %1348 = vadd.xlane.f32.xlu0 %v5263_v29  ;;  %v5279_v17 = vpop.f32.mrb[55].mxu0  ;;  %v5281_v15 = vpop.f32.mrb[55].mxu1  ;;  %v5295_v12 = vadd.f32 %v5044_v27, %v4880_v59  ;;  %v5299_v29 = vadd.f32 %v5058_v39, %v4880_v59  ;;  %v5315_v27 = vadd.f32 %v4880_v59, %v5054_v38 }
 0x161   : > { %v5319_v39 = vadd.f32 %v4880_v59, %v5064_v25  ;;  %v5335_v25 = vadd.f32 %v5078_v14, %v4880_v59  ;;  %v5339_v38 = vadd.f32 %v5093_v41, %v4880_v59  ;;  %v5355_v14 = vadd.f32 %v4880_v59, %v5089_v37 }
 0x162   : > { %v5359_v41 = vadd.f32 %v4880_v59, %v5099_v36 }
 0x163   : > { %7268 = vst [vmem:[#allocation58_spill] sm:$0xff] %v5335_v25  ;;  %7271 = vst [vmem:[#allocation61_spill] sm:$0xff] %v5355_v14 }
 0x164   : > { %1462 = vadd.xlane.f32.xlu1 %v5289_v7  ;;  %1460 = vadd.xlane.f32.xlu0 %v5285_v21  ;;  %7272 = vst [vmem:[#allocation62_spill] sm:$0xff] %v5359_v41 }
 0x168   : > { %1362 = vadd.xlane.f32.xlu1 %v5299_v29  ;;  %1360 = vadd.xlane.f32.xlu0 %v5295_v12 }
 0x16c   : > { %1474 = vadd.xlane.f32.xlu1 %v5309_v24  ;;  %1472 = vadd.xlane.f32.xlu0 %v5305_v16 }
 0x170   : > { %1358 = vadd.xlane.f32.xlu1 %v5319_v39  ;;  %1356 = vadd.xlane.f32.xlu0 %v5315_v27 }
 0x174   : > { %1470 = vadd.xlane.f32.xlu1 %v5329_v28  ;;  %1468 = vadd.xlane.f32.xlu0 %v5325_v13 }
 0x178   : > { %1370 = vadd.xlane.f32.xlu1 %v5339_v38  ;;  %1368 = vadd.xlane.f32.xlu0 %v5335_v25 }
 0x17c   : > { %1482 = vadd.xlane.f32.xlu1 %v5349_v33  ;;  %1480 = vadd.xlane.f32.xlu0 %v5345_v26  ;;  %v7315_v26 = vld [vmem:[#allocation7_spill] sm:$0xff] }
 0x180   : > { %1366 = vadd.xlane.f32.xlu1 %v5359_v41  ;;  %1364 = vadd.xlane.f32.xlu0 %v5355_v14  ;;  %v5379_v41 = vadd.f32 %v5113_v60, %v4880_v59  ;;  %v5397_v60 = vadd.f32 %v5131_v50, %v4880_v59 }
 0x182   : > { %7275 = vst [vmem:[#allocation65_spill] sm:$0xff] %v5379_v41  ;;  %7278 = vst [vmem:[#allocation68_spill] sm:$0xff] %v5397_v60 }
 0x184   : > { %1478 = vadd.xlane.f32.xlu1 %v5369_v40  ;;  %1476 = vadd.xlane.f32.xlu0 %v5365_v32  ;;  %v5393_v32 = vadd.f32 %v5115_v5, %v4880_v59  ;;  %v5411_v5 = vadd.f32 %v4880_v59, %v5135_v44 }
 0x185   : > { %v5373_v37 = vpop.xlane.xlu0 %1416  ;;  %v5375_v36 = vpop.xlane.xlu1 %1304 }
 0x186   : > { %7277 = vst [vmem:[#allocation67_spill] sm:$0xff] %v5393_v32  ;;  %7280 = vst [vmem:[#allocation70_spill] sm:$0xff] %v5411_v5 }
 0x188   : > { %1378 = vadd.xlane.f32.xlu1 %v5383_v8  ;;  %1376 = vadd.xlane.f32.xlu0 %v5379_v41  ;;  %v5407_v41 = vadd.f32 %v4880_v59, %v5125_v54  ;;  %v5425_v54 = vadd.f32 %v4880_v59, %v5137_v48 }
 0x189   : > { %v5387_v58 = vpop.xlane.xlu1 %1306  ;;  %v5389_v40 = vpop.xlane.xlu0 %1300 }
 0x18a   : > { %7279 = vst [vmem:[#allocation69_spill] sm:$0xff] %v5407_v41  ;;  %7282 = vst [vmem:[#allocation72_spill] sm:$0xff] %v5425_v54  ;;  %v1528_v14 = vmul.f32 0.0078125, %v5387_v58  ;;  %v1525_v33 = vmul.f32 0.0078125, %v5389_v40 }
 0x18c   : > { %1490 = vadd.xlane.f32.xlu1 %v5397_v60  ;;  %1488 = vadd.xlane.f32.xlu0 %v5393_v32  ;;  %v5421_v32 = vadd.f32 %v4880_v59, %v5127_v51  ;;  %v5439_v51 = vadd.f32 %v5165_v43, %v4880_v59 }
 0x18d   : > { %v5401_v55 = vpop.xlane.xlu1 %1418  ;;  %v5403_v8 = vpop.xlane.xlu0 %1412 }
 0x18e   : > { %7281 = vst [vmem:[#allocation71_spill] sm:$0xff] %v5421_v32  ;;  %7284 = vst [vmem:[#allocation74_spill] sm:$0xff] %v5439_v51 }
 0x190   : > { %1374 = vadd.xlane.f32.xlu1 %v5411_v5  ;;  %1372 = vadd.xlane.f32.xlu0 %v5407_v41  ;;  %v5435_v41 = vadd.f32 %v5149_v47, %v4880_v59  ;;  %v5453_v47 = vadd.f32 %v5167_v46, %v4880_v59 }
 0x191   : > { %v5415_v50 = vpop.xlane.xlu1 %1414  ;;  %v5417_v60 = vpop.xlane.xlu0 %1302 }
 0x192   : > { %7283 = vst [vmem:[#allocation73_spill] sm:$0xff] %v5435_v41  ;;  %7286 = vst [vmem:[#allocation76_spill] sm:$0xff] %v5453_v47 }
 0x194   : > { %1486 = vadd.xlane.f32.xlu1 %v5425_v54  ;;  %1484 = vadd.xlane.f32.xlu0 %v5421_v32  ;;  %v5449_v32 = vadd.f32 %v5151_v45, %v4880_v59  ;;  %v5467_v45 = vadd.f32 %v4880_v59, %v5171_v52 }
 0x195   : > { %v5429_v44 = vpop.xlane.xlu1 %1314  ;;  %v5431_v5 = vpop.xlane.xlu0 %1312 }
 0x196   : > { %7285 = vst [vmem:[#allocation75_spill] sm:$0xff] %v5449_v32  ;;  %7288 = vst [vmem:[#allocation78_spill] sm:$0xff] %v5467_v45 }
 0x198   : > { %1386 = vadd.xlane.f32.xlu1 %v5439_v51  ;;  %1384 = vadd.xlane.f32.xlu0 %v5435_v41  ;;  %v5463_v41 = vadd.f32 %v4880_v59, %v5161_v42  ;;  %v5481_v42 = vadd.f32 %v4880_v59, %v5173_v56 }
 0x199   : > { %v5443_v48 = vpop.xlane.xlu1 %1426  ;;  %v5445_v54 = vpop.xlane.xlu0 %1424 }
 0x19a   : > { %7287 = vst [vmem:[#allocation77_spill] sm:$0xff] %v5463_v41  ;;  %7290 = vst [vmem:[#allocation80_spill] sm:$0xff] %v5481_v42 }
 0x19c   : > { %1498 = vadd.xlane.f32.xlu1 %v5453_v47  ;;  %1496 = vadd.xlane.f32.xlu0 %v5449_v32  ;;  %v5477_v32 = vadd.f32 %v4880_v59, %v5163_v53  ;;  %v5495_v53 = vadd.f32 %v5201_v31, %v4880_v59 }
 0x19d   : > { %v5457_v43 = vpop.xlane.xlu1 %1310  ;;  %v5459_v51 = vpop.xlane.xlu0 %1308 }
 0x19e   : > { %7289 = vst [vmem:[#allocation79_spill] sm:$0xff] %v5477_v32  ;;  %7292 = vst [vmem:[#allocation82_spill] sm:$0xff] %v5495_v53 }
 0x1a0   : > { %1382 = vadd.xlane.f32.xlu1 %v5467_v45  ;;  %1380 = vadd.xlane.f32.xlu0 %v5463_v41  ;;  %v5491_v41 = vadd.f32 %v5185_v35, %v4880_v59  ;;  %v5509_v35 = vadd.f32 %v5203_v34, %v4880_v59 }
 0x1a1   : > { %v5471_v46 = vpop.xlane.xlu1 %1422  ;;  %v5473_v47 = vpop.xlane.xlu0 %1420 }
 0x1a2   : > { %7291 = vst [vmem:[#allocation81_spill] sm:$0xff] %v5491_v41  ;;  %7294 = vst [vmem:[#allocation84_spill] sm:$0xff] %v5509_v35 }
 0x1a4   : > { %1494 = vadd.xlane.f32.xlu1 %v5481_v42  ;;  %1492 = vadd.xlane.f32.xlu0 %v5477_v32  ;;  %v5505_v32 = vadd.f32 %v5187_v49, %v4880_v59  ;;  %v5523_v49 = vadd.f32 %v4880_v59, %v5207_v1 }
 0x1a5   : > { %v5485_v52 = vpop.xlane.xlu1 %1322  ;;  %v5487_v45 = vpop.xlane.xlu0 %1320 }
 0x1a6   : > { %7293 = vst [vmem:[#allocation83_spill] sm:$0xff] %v5505_v32  ;;  %7296 = vst [vmem:[#allocation86_spill] sm:$0xff] %v5523_v49 }
 0x1a8   : > { %1394 = vadd.xlane.f32.xlu1 %v5495_v53  ;;  %1392 = vadd.xlane.f32.xlu0 %v5491_v41  ;;  %v5519_v41 = vadd.f32 %v4880_v59, %v5197_v30  ;;  %v5537_v30 = vadd.f32 %v4880_v59, %v5209_v61 }
 0x1a9   : > { %v5499_v56 = vpop.xlane.xlu1 %1434  ;;  %v5501_v42 = vpop.xlane.xlu0 %1432 }
 0x1aa   : > { %7295 = vst [vmem:[#allocation85_spill] sm:$0xff] %v5519_v41  ;;  %7298 = vst [vmem:[#allocation88_spill] sm:$0xff] %v5537_v30 }
 0x1ac   : > { %1506 = vadd.xlane.f32.xlu1 %v5509_v35  ;;  %1504 = vadd.xlane.f32.xlu0 %v5505_v32  ;;  %v5533_v32 = vadd.f32 %v4880_v59, %v5199_v2  ;;  %v5551_v2 = vadd.f32 %v5237_v10, %v4880_v59 }
 0x1ad   : > { %v5513_v31 = vpop.xlane.xlu1 %1318  ;;  %v5515_v53 = vpop.xlane.xlu0 %1316 }
 0x1ae   : > { %7297 = vst [vmem:[#allocation87_spill] sm:$0xff] %v5533_v32  ;;  %7300 = vst [vmem:[#allocation90_spill] sm:$0xff] %v5551_v2 }
 0x1b0   : > { %1390 = vadd.xlane.f32.xlu1 %v5523_v49  ;;  %1388 = vadd.xlane.f32.xlu0 %v5519_v41  ;;  %v5547_v41 = vadd.f32 %v5221_v23, %v4880_v59  ;;  %v5565_v23 = vadd.f32 %v5239_v22, %v4880_v59 }
 0x1b1   : > { %v5527_v34 = vpop.xlane.xlu1 %1430  ;;  %v5529_v35 = vpop.xlane.xlu0 %1428 }
 0x1b2   : > { %7299 = vst [vmem:[#allocation89_spill] sm:$0xff] %v5547_v41  ;;  %7302 = vst [vmem:[#allocation92_spill] sm:$0xff] %v5565_v23 }
 0x1b4   : > { %1502 = vadd.xlane.f32.xlu1 %v5537_v30  ;;  %1500 = vadd.xlane.f32.xlu0 %v5533_v32  ;;  %v5561_v32 = vadd.f32 %v5223_v57, %v4880_v59  ;;  %v5579_v57 = vadd.f32 %v4880_v59, %v5243_v3 }
 0x1b5   : > { %v5541_v1 = vpop.xlane.xlu1 %1330  ;;  %v5543_v49 = vpop.xlane.xlu0 %1328 }
 0x1b6   : > { %7301 = vst [vmem:[#allocation91_spill] sm:$0xff] %v5561_v32  ;;  %7304 = vst [vmem:[#allocation94_spill] sm:$0xff] %v5579_v57 }
 0x1b8   : > { %1402 = vadd.xlane.f32.xlu1 %v5551_v2  ;;  %1400 = vadd.xlane.f32.xlu0 %v5547_v41  ;;  %v5575_v41 = vadd.f32 %v4880_v59, %v5233_v18  ;;  %v5593_v18 = vadd.f32 %v4880_v59, %v5245_v9 }
 0x1b9   : > { %v5555_v61 = vpop.xlane.xlu1 %1442  ;;  %v5557_v30 = vpop.xlane.xlu0 %1440 }
 0x1ba   : > { %7303 = vst [vmem:[#allocation93_spill] sm:$0xff] %v5575_v41  ;;  %7306 = vst [vmem:[#allocation96_spill] sm:$0xff] %v5593_v18 }
 0x1bc   : > { %1514 = vadd.xlane.f32.xlu1 %v5565_v23  ;;  %1512 = vadd.xlane.f32.xlu0 %v5561_v32  ;;  %v5589_v32 = vadd.f32 %v4880_v59, %v5235_v4  ;;  %v5607_v4 = vadd.f32 %v5273_v63, %v4880_v59 }
 0x1bd   : > { %v5569_v10 = vpop.xlane.xlu1 %1326  ;;  %v5571_v2 = vpop.xlane.xlu0 %1324 }
 0x1be   : > { %7305 = vst [vmem:[#allocation95_spill] sm:$0xff] %v5589_v32  ;;  %7308 = vst [vmem:[#allocation98_spill] sm:$0xff] %v5607_v4 }
 0x1c0   : > { %1398 = vadd.xlane.f32.xlu1 %v5579_v57  ;;  %1396 = vadd.xlane.f32.xlu0 %v5575_v41  ;;  %v5603_v41 = vadd.f32 %v5257_v6, %v4880_v59  ;;  %v5621_v6 = vadd.f32 %v5275_v19, %v4880_v59  ;;  %v5637_v19 = vadd.f32 %v4880_v59, %v5279_v17 }
 0x1c1   : > { %v5583_v22 = vpop.xlane.xlu1 %1438  ;;  %v5585_v23 = vpop.xlane.xlu0 %1436  ;;  %v5654_v17 = vsub.f32 %v7315_v26, %v1528_v14  ;;  %v7320_v26 = vld [vmem:[#allocation9_spill] sm:$0xff] }
 0x1c2   : > { %7307 = vst [vmem:[#allocation97_spill] sm:$0xff] %v5603_v41  ;;  %7310 = vst [vmem:[#allocation100_spill] sm:$0xff] %v5621_v6 }
 0x1c3   : > { %7312 = vst [vmem:[#allocation102_spill] sm:$0xff] %v5637_v19  ;;  %7316 = vst [vmem:[#allocation7_spill] sm:$0xff] %v5654_v17 }
 0x1c4   : > { %1510 = vadd.xlane.f32.xlu1 %v5593_v18  ;;  %1508 = vadd.xlane.f32.xlu0 %v5589_v32  ;;  %v5617_v32 = vadd.f32 %v5259_v0, %v4880_v59  ;;  %v5633_v0 = vadd.f32 %v4880_v59, %v5269_v11 }
 0x1c5   : > { %v5597_v3 = vpop.xlane.xlu1 %1338  ;;  %v5599_v57 = vpop.xlane.xlu0 %1336 }
 0x1c6   : > { %7309 = vst [vmem:[#allocation99_spill] sm:$0xff] %v5617_v32  ;;  %7311 = vst [vmem:[#allocation101_spill] sm:$0xff] %v5633_v0 }
 0x1c8   : > { %1410 = vadd.xlane.f32.xlu1 %v5607_v4  ;;  %1408 = vadd.xlane.f32.xlu0 %v5603_v41  ;;  %v1527_v41 = vmul.f32 0.0078125, %v5375_v36 }
 0x1c9   : > { %v5611_v9 = vpop.xlane.xlu1 %1450  ;;  %v5613_v18 = vpop.xlane.xlu0 %1448 }
 0x1ca   : > { %v5651_v11 = vsub.f32 %v4883_v62, %v1527_v41 }
 0x1cc   : > { %1522 = vadd.xlane.f32.xlu1 %v5621_v6  ;;  %1520 = vadd.xlane.f32.xlu0 %v5617_v32  ;;  %v1583_v32 = vmul.f32 0.0078125, %v5373_v37  ;;  %v5644_v6 = vadd.f32 %v4880_v59, %v5271_v20  ;;  %7314 = vst [vmem:[#allocation104_spill] sm:$0xff] %v5651_v11  ;;  %v7318_v20 = vld [vmem:[#allocation5_spill] sm:$0xff] }
 0x1cd   : > { %v5625_v63 = vpop.xlane.xlu1 %1334  ;;  %v5627_v4 = vpop.xlane.xlu0 %1332 }
 0x1ce   : > { %7313 = vst [vmem:[#allocation103_spill] sm:$0xff] %v5644_v6  ;;  %v5664_v37 = vsub.f32 %v7318_v20, %v1583_v32  ;;  %v7322_v32 = vld [vmem:[#allocation6_spill] sm:$0xff] }
 0x1cf   : > { %v5680_v20 = vsub.f32 %v7322_v32, %v1525_v33  ;;  %v1532_v33 = vmul.f32 0.0078125, %v5429_v44  ;;  %v7330_v44 = vld [vmem:[#allocation13_spill] sm:$0xff] }
 0x1d0   : > { %1406 = vadd.xlane.f32.xlu1 %v5637_v19  ;;  %1404 = vadd.xlane.f32.xlu0 %v5633_v0  ;;  %v1584_v19 = vmul.f32 0.0078125, %v5401_v55  ;;  %v5659_v0 = vadd.f32 %v4880_v59, %v5281_v15  ;;  %7319 = vst [vmem:[#allocation5_spill] sm:$0xff] %v5664_v37  ;;  %v1526_v55 = vmul.f32 0.0078125, %v5417_v60  ;;  %v1752_v59 = vmul.f32 %v5654_v17, %v5654_v17 }
 0x1d1   : > { %v5646_v36 = vpop.xlane.xlu1 %1446  ;;  %v5648_v58 = vpop.xlane.xlu0 %1444  ;;  %v1751_v15 = vmul.f32 %v5651_v11, %v5651_v11  ;;  %7323 = vst [vmem:[#allocation6_spill] sm:$0xff] %v5680_v20  ;;  %v1581_v60 = vmul.f32 0.0078125, %v5403_v8 }
 0x1d2   : > { %7317 = vst [vmem:[#allocation105_spill] sm:$0xff] %v5659_v0  ;;  %v5672_v14 = vsub.f32 %v7320_v26, %v1584_v19  ;;  %v1807_v19 = vmul.f32 %v5664_v37, %v5664_v37  ;;  %v1582_v26 = vmul.f32 0.0078125, %v5415_v50  ;;  %v7326_v37 = vld [vmem:[#allocation8_spill] sm:$0xff]  ;;  %v7328_v50 = vld [vmem:[#allocation10_spill] sm:$0xff] }
 0x1d3   : > { %v5702_v8 = vsub.f32 %v7326_v37, %v1581_v60  ;;  %v1588_v60 = vmul.f32 0.0078125, %v5443_v48 }
 0x1d4   : > { %1518 = vadd.xlane.f32.xlu1 %v5659_v0  ;;  %1516 = vadd.xlane.f32.xlu0 %v5644_v6  ;;  %7321 = vst [vmem:[#allocation9_spill] sm:$0xff] %v5672_v14  ;;  %v7324_v0 = vld [vmem:[#allocation11_spill] sm:$0xff]  ;;  %v5705_v25 = vsub.f32 %v7328_v50, %v1582_v26  ;;  %v1587_v26 = vmul.f32 0.0078125, %v5445_v54 }
 0x1d5   : > { %v5667_v62 = vpop.xlane.xlu1 %1346  ;;  %v5669_v41 = vpop.xlane.xlu0 %1344  ;;  %v5691_v17 = vsub.f32 %v7324_v0, %v1526_v55  ;;  %7327 = vst [vmem:[#allocation8_spill] sm:$0xff] %v5702_v8  ;;  %v1749_v55 = vmul.f32 %v5680_v20, %v5680_v20  ;;  %v1585_v20 = vmul.f32 0.0078125, %v5473_v47 }
 0x1d6   : > { %7329 = vst [vmem:[#allocation10_spill] sm:$0xff] %v5705_v25  ;;  %v1806_v50 = vmul.f32 %v5705_v25, %v5705_v25 }
 0x1d7   : > { %7325 = vst [vmem:[#allocation11_spill] sm:$0xff] %v5691_v17  ;;  %v1750_v0 = vmul.f32 %v5691_v17, %v5691_v17 }
 0x1d8   : > { %1867 = vadd.xlane.f32.xlu1 %v1752_v59  ;;  %1865 = vadd.xlane.f32.xlu0 %v1751_v15  ;;  %v1808_v59 = vmul.f32 %v5672_v14, %v5672_v14  ;;  %v1531_v15 = vmul.f32 0.0078125, %v5431_v5  ;;  %v5712_v5 = vsub.f32 %v7330_v44, %v1532_v33  ;;  %v7334_v44 = vld [vmem:[#allocation15_spill] sm:$0xff] }
 0x1d9   : > { %v5682_v40 = vpop.xlane.xlu1 %1458  ;;  %v5684_v6 = vpop.xlane.xlu0 %1456  ;;  %v5736_v54 = vsub.f32 %v7334_v44, %v1588_v60  ;;  %v7340_v44 = vld [vmem:[#allocation16_spill] sm:$0xff] }
 0x1da   : > { %7331 = vst [vmem:[#allocation13_spill] sm:$0xff] %v5712_v5 }
 0x1db   : > { %7335 = vst [vmem:[#allocation15_spill] sm:$0xff] %v5736_v54 }
 0x1dc   : > { %1979 = vadd.xlane.f32.xlu1 %v1808_v59  ;;  %1977 = vadd.xlane.f32.xlu0 %v1807_v19  ;;  %v7332_v19 = vld [vmem:[#allocation12_spill] sm:$0xff] }
 0x1dd   : > { %v5697_v32 = vpop.xlane.xlu1 %1342  ;;  %v5699_v11 = vpop.xlane.xlu0 %1340  ;;  %v5715_v59 = vsub.f32 %v7332_v19, %v1531_v15  ;;  %v7336_v19 = vld [vmem:[#allocation14_spill] sm:$0xff] }
 0x1de   : > { %v5739_v25 = vsub.f32 %v7336_v19, %v1587_v26 }
 0x1df   : > { %7333 = vst [vmem:[#allocation12_spill] sm:$0xff] %v5715_v59  ;;  %v1755_v48 = vmul.f32 %v5715_v59, %v5715_v59  ;;  %v7338_v59 = vld [vmem:[#allocation17_spill] sm:$0xff] }
 0x1e0   : > { %1863 = vadd.xlane.f32.xlu1 %v1750_v0  ;;  %1861 = vadd.xlane.f32.xlu0 %v1749_v55  ;;  %v1805_v0 = vmul.f32 %v5702_v8, %v5702_v8  ;;  %v1756_v55 = vmul.f32 %v5712_v5, %v5712_v5  ;;  %7337 = vst [vmem:[#allocation14_spill] sm:$0xff] %v5739_v25  ;;  %v1530_v8 = vmul.f32 0.0078125, %v5457_v43 }
 0x1e1   : > { %v5717_v14 = vpop.xlane.xlu1 %1454  ;;  %v5719_v37 = vpop.xlane.xlu0 %1452  ;;  %v1812_v43 = vmul.f32 %v5736_v54, %v5736_v54 }
 0x1e2   : > { %v5750_v60 = vsub.f32 %v7338_v59, %v1530_v8  ;;  %v1536_v59 = vmul.f32 0.0078125, %v5485_v52 }
 0x1e4   : > { %1975 = vadd.xlane.f32.xlu1 %v1806_v50  ;;  %1973 = vadd.xlane.f32.xlu0 %v1805_v0  ;;  %v1529_v50 = vmul.f32 0.0078125, %v5459_v51  ;;  %v1586_v0 = vmul.f32 0.0078125, %v5471_v46  ;;  %7339 = vst [vmem:[#allocation17_spill] sm:$0xff] %v5750_v60  ;;  %v1811_v51 = vmul.f32 %v5739_v25, %v5739_v25  ;;  %v7342_v46 = vld [vmem:[#allocation19_spill] sm:$0xff]  ;;  %v1533_v25 = vmul.f32 0.0078125, %v5515_v53 }
 0x1e5   : > { %v5727_v33 = vpop.xlane.xlu1 %1354  ;;  %v5729_v15 = vpop.xlane.xlu0 %1352 }
 0x1e6   : > { %v5753_v26 = vsub.f32 %v7340_v44, %v1529_v50  ;;  %v5760_v47 = vsub.f32 %v7342_v46, %v1586_v0  ;;  %v1535_v50 = vmul.f32 0.0078125, %v5487_v45  ;;  %v1754_v44 = vmul.f32 %v5750_v60, %v5750_v60  ;;  %v7346_v46 = vld [vmem:[#allocation21_spill] sm:$0xff] }
 0x1e7   : > { %v5784_v45 = vsub.f32 %v7346_v46, %v1536_v59  ;;  %v7352_v46 = vld [vmem:[#allocation22_spill] sm:$0xff] }
 0x1e8   : > { %1875 = vadd.xlane.f32.xlu1 %v1756_v55  ;;  %1873 = vadd.xlane.f32.xlu0 %v1755_v48  ;;  %7341 = vst [vmem:[#allocation16_spill] sm:$0xff] %v5753_v26  ;;  %7343 = vst [vmem:[#allocation19_spill] sm:$0xff] %v5760_v47  ;;  %v7344_v55 = vld [vmem:[#allocation18_spill] sm:$0xff] }
 0x1e9   : > { %v5745_v5 = vpop.xlane.xlu1 %1466  ;;  %v5747_v17 = vpop.xlane.xlu0 %1464  ;;  %v5763_v48 = vsub.f32 %v7344_v55, %v1585_v20  ;;  %7347 = vst [vmem:[#allocation21_spill] sm:$0xff] %v5784_v45  ;;  %v7348_v55 = vld [vmem:[#allocation20_spill] sm:$0xff] }
 0x1ea   : > { %v5787_v60 = vsub.f32 %v7348_v55, %v1535_v50 }
 0x1eb   : > { %7345 = vst [vmem:[#allocation18_spill] sm:$0xff] %v5763_v48  ;;  %v1809_v52 = vmul.f32 %v5763_v48, %v5763_v48  ;;  %v7350_v48 = vld [vmem:[#allocation23_spill] sm:$0xff] }
 0x1ec   : > { %1987 = vadd.xlane.f32.xlu1 %v1812_v43  ;;  %1985 = vadd.xlane.f32.xlu0 %v1811_v51  ;;  %v1753_v43 = vmul.f32 %v5753_v26, %v5753_v26  ;;  %v1810_v51 = vmul.f32 %v5760_v47, %v5760_v47  ;;  %7349 = vst [vmem:[#allocation20_spill] sm:$0xff] %v5787_v60  ;;  %v1592_v26 = vmul.f32 0.0078125, %v5499_v56 }
 0x1ed   : > { %v5765_v19 = vpop.xlane.xlu1 %1350  ;;  %v5767_v8 = vpop.xlane.xlu0 %1348  ;;  %v1760_v56 = vmul.f32 %v5784_v45, %v5784_v45 }
 0x1ee   : > { %v5798_v59 = vsub.f32 %v7350_v48, %v1592_v26  ;;  %v1590_v48 = vmul.f32 0.0078125, %v5527_v34 }
 0x1f0   : > { %1871 = vadd.xlane.f32.xlu1 %v1754_v44  ;;  %1869 = vadd.xlane.f32.xlu0 %v1753_v43  ;;  %v1591_v44 = vmul.f32 0.0078125, %v5501_v42  ;;  %v1534_v43 = vmul.f32 0.0078125, %v5513_v31  ;;  %7351 = vst [vmem:[#allocation23_spill] sm:$0xff] %v5798_v59  ;;  %v1759_v42 = vmul.f32 %v5787_v60, %v5787_v60  ;;  %v7354_v31 = vld [vmem:[#allocation25_spill] sm:$0xff]  ;;  %v1595_v60 = vmul.f32 0.0078125, %v5557_v30 }
 0x1f1   : > { %v5775_v0 = vpop.xlane.xlu1 %1462  ;;  %v5777_v20 = vpop.xlane.xlu0 %1460 }
 0x1f2   : > { %v5801_v50 = vsub.f32 %v7352_v46, %v1591_v44  ;;  %v5808_v53 = vsub.f32 %v7354_v31, %v1534_v43  ;;  %v1589_v44 = vmul.f32 0.0078125, %v5529_v35  ;;  %v1816_v46 = vmul.f32 %v5798_v59, %v5798_v59  ;;  %v7358_v31 = vld [vmem:[#allocation27_spill] sm:$0xff] }
 0x1f3   : > { %v5832_v35 = vsub.f32 %v7358_v31, %v1590_v48  ;;  %v7364_v31 = vld [vmem:[#allocation28_spill] sm:$0xff] }
 0x1f4   : > { %1983 = vadd.xlane.f32.xlu1 %v1810_v51  ;;  %1981 = vadd.xlane.f32.xlu0 %v1809_v52  ;;  %7353 = vst [vmem:[#allocation22_spill] sm:$0xff] %v5801_v50  ;;  %7355 = vst [vmem:[#allocation25_spill] sm:$0xff] %v5808_v53  ;;  %v7356_v51 = vld [vmem:[#allocation24_spill] sm:$0xff] }
 0x1f5   : > { %v5793_v47 = vpop.xlane.xlu1 %1362  ;;  %v5795_v54 = vpop.xlane.xlu0 %1360  ;;  %v5811_v52 = vsub.f32 %v7356_v51, %v1533_v25  ;;  %7359 = vst [vmem:[#allocation27_spill] sm:$0xff] %v5832_v35  ;;  %v7360_v51 = vld [vmem:[#allocation26_spill] sm:$0xff] }
 0x1f6   : > { %v5835_v59 = vsub.f32 %v7360_v51, %v1589_v44 }
 0x1f7   : > { %7357 = vst [vmem:[#allocation24_spill] sm:$0xff] %v5811_v52  ;;  %v1757_v34 = vmul.f32 %v5811_v52, %v5811_v52  ;;  %v7362_v52 = vld [vmem:[#allocation29_spill] sm:$0xff] }
 0x1f8   : > { %1883 = vadd.xlane.f32.xlu1 %v1760_v56  ;;  %1881 = vadd.xlane.f32.xlu0 %v1759_v42  ;;  %v1815_v56 = vmul.f32 %v5801_v50, %v5801_v50  ;;  %v1758_v42 = vmul.f32 %v5808_v53, %v5808_v53  ;;  %7361 = vst [vmem:[#allocation26_spill] sm:$0xff] %v5835_v59  ;;  %v1540_v50 = vmul.f32 0.0078125, %v5541_v1 }
 0x1f9   : > { %v5813_v55 = vpop.xlane.xlu1 %1474  ;;  %v5815_v26 = vpop.xlane.xlu0 %1472  ;;  %v1814_v1 = vmul.f32 %v5832_v35, %v5832_v35 }
 0x1fa   : > { %v5846_v48 = vsub.f32 %v7362_v52, %v1540_v50  ;;  %v1538_v52 = vmul.f32 0.0078125, %v5569_v10 }
 0x1fc   : > { %1995 = vadd.xlane.f32.xlu1 %v1816_v46  ;;  %1993 = vadd.xlane.f32.xlu0 %v1815_v56  ;;  %v1539_v46 = vmul.f32 0.0078125, %v5543_v49  ;;  %v1596_v56 = vmul.f32 0.0078125, %v5555_v61  ;;  %7363 = vst [vmem:[#allocation29_spill] sm:$0xff] %v5846_v48  ;;  %v1813_v49 = vmul.f32 %v5835_v59, %v5835_v59  ;;  %v7366_v61 = vld [vmem:[#allocation31_spill] sm:$0xff]  ;;  %v1543_v59 = vmul.f32 0.0078125, %v5599_v57 }
 0x1fd   : > { %v5823_v43 = vpop.xlane.xlu1 %1358  ;;  %v5825_v25 = vpop.xlane.xlu0 %1356 }
 0x1fe   : > { %v5849_v44 = vsub.f32 %v7364_v31, %v1539_v46  ;;  %v5856_v30 = vsub.f32 %v7366_v61, %v1596_v56  ;;  %v1537_v46 = vmul.f32 0.0078125, %v5571_v2  ;;  %v1764_v31 = vmul.f32 %v5846_v48, %v5846_v48  ;;  %v7370_v61 = vld [vmem:[#allocation33_spill] sm:$0xff] }
 0x1ff   : > { %v5880_v2 = vsub.f32 %v7370_v61, %v1538_v52  ;;  %v7376_v61 = vld [vmem:[#allocation34_spill] sm:$0xff] }
 0x200   : > { %1879 = vadd.xlane.f32.xlu1 %v1758_v42  ;;  %1877 = vadd.xlane.f32.xlu0 %v1757_v34  ;;  %7365 = vst [vmem:[#allocation28_spill] sm:$0xff] %v5849_v44  ;;  %7367 = vst [vmem:[#allocation31_spill] sm:$0xff] %v5856_v30  ;;  %v7368_v42 = vld [vmem:[#allocation30_spill] sm:$0xff] }
 0x201   : > { %v5841_v53 = vpop.xlane.xlu1 %1470  ;;  %v5843_v45 = vpop.xlane.xlu0 %1468  ;;  %v5859_v34 = vsub.f32 %v7368_v42, %v1595_v60  ;;  %7371 = vst [vmem:[#allocation33_spill] sm:$0xff] %v5880_v2  ;;  %v7372_v42 = vld [vmem:[#allocation32_spill] sm:$0xff] }
 0x202   : > { %v5883_v48 = vsub.f32 %v7372_v42, %v1537_v46 }
 0x203   : > { %7369 = vst [vmem:[#allocation30_spill] sm:$0xff] %v5859_v34  ;;  %v1819_v10 = vmul.f32 %v5859_v34, %v5859_v34  ;;  %v7374_v34 = vld [vmem:[#allocation35_spill] sm:$0xff] }
 0x204   : > { %1991 = vadd.xlane.f32.xlu1 %v1814_v1  ;;  %1989 = vadd.xlane.f32.xlu0 %v1813_v49  ;;  %v1763_v1 = vmul.f32 %v5849_v44, %v5849_v44  ;;  %v1820_v49 = vmul.f32 %v5856_v30, %v5856_v30  ;;  %7373 = vst [vmem:[#allocation32_spill] sm:$0xff] %v5883_v48  ;;  %v1594_v44 = vmul.f32 0.0078125, %v5583_v22 }
 0x205   : > { %v5861_v51 = vpop.xlane.xlu1 %1370  ;;  %v5863_v50 = vpop.xlane.xlu0 %1368  ;;  %v1762_v22 = vmul.f32 %v5880_v2, %v5880_v2 }
 0x206   : > { %v5894_v52 = vsub.f32 %v7374_v34, %v1594_v44  ;;  %v1600_v34 = vmul.f32 0.0078125, %v5611_v9 }
 0x208   : > { %1891 = vadd.xlane.f32.xlu1 %v1764_v31  ;;  %1889 = vadd.xlane.f32.xlu0 %v1763_v1  ;;  %v1593_v31 = vmul.f32 0.0078125, %v5585_v23  ;;  %v1544_v1 = vmul.f32 0.0078125, %v5597_v3  ;;  %7375 = vst [vmem:[#allocation35_spill] sm:$0xff] %v5894_v52  ;;  %v1761_v23 = vmul.f32 %v5883_v48, %v5883_v48  ;;  %v7378_v3 = vld [vmem:[#allocation37_spill] sm:$0xff]  ;;  %v1597_v48 = vmul.f32 0.0078125, %v5648_v58 }
 0x209   : > { %v5871_v56 = vpop.xlane.xlu1 %1482  ;;  %v5873_v60 = vpop.xlane.xlu0 %1480 }
 0x20a   : > { %v5897_v46 = vsub.f32 %v7376_v61, %v1593_v31  ;;  %v5904_v57 = vsub.f32 %v7378_v3, %v1544_v1  ;;  %v1599_v31 = vmul.f32 0.0078125, %v5613_v18  ;;  %v1818_v61 = vmul.f32 %v5894_v52, %v5894_v52  ;;  %v7382_v3 = vld [vmem:[#allocation39_spill] sm:$0xff] }
 0x20b   : > { %v5928_v18 = vsub.f32 %v7382_v3, %v1600_v34  ;;  %v7388_v3 = vld [vmem:[#allocation40_spill] sm:$0xff] }
 0x20c   : > { %2003 = vadd.xlane.f32.xlu1 %v1820_v49  ;;  %2001 = vadd.xlane.f32.xlu0 %v1819_v10  ;;  %7377 = vst [vmem:[#allocation34_spill] sm:$0xff] %v5897_v46  ;;  %7379 = vst [vmem:[#allocation37_spill] sm:$0xff] %v5904_v57  ;;  %v7380_v49 = vld [vmem:[#allocation36_spill] sm:$0xff] }
 0x20d   : > { %v5889_v30 = vpop.xlane.xlu1 %1366  ;;  %v5891_v35 = vpop.xlane.xlu0 %1364  ;;  %v5907_v10 = vsub.f32 %v7380_v49, %v1543_v59  ;;  %7383 = vst [vmem:[#allocation39_spill] sm:$0xff] %v5928_v18  ;;  %v7384_v49 = vld [vmem:[#allocation38_spill] sm:$0xff] }
 0x20e   : > { %v5931_v52 = vsub.f32 %v7384_v49, %v1599_v31 }
 0x20f   : > { %7381 = vst [vmem:[#allocation36_spill] sm:$0xff] %v5907_v10  ;;  %v1767_v9 = vmul.f32 %v5907_v10, %v5907_v10  ;;  %v7386_v10 = vld [vmem:[#allocation41_spill] sm:$0xff] }
 0x210   : > { %1887 = vadd.xlane.f32.xlu1 %v1762_v22  ;;  %1885 = vadd.xlane.f32.xlu0 %v1761_v23  ;;  %v1817_v22 = vmul.f32 %v5897_v46, %v5897_v46  ;;  %v1768_v23 = vmul.f32 %v5904_v57, %v5904_v57  ;;  %7385 = vst [vmem:[#allocation38_spill] sm:$0xff] %v5931_v52  ;;  %v1542_v46 = vmul.f32 0.0078125, %v5625_v63 }
 0x211   : > { %v5909_v42 = vpop.xlane.xlu1 %1478  ;;  %v5911_v44 = vpop.xlane.xlu0 %1476  ;;  %v1824_v63 = vmul.f32 %v5928_v18, %v5928_v18 }
 0x212   : > { %v5942_v34 = vsub.f32 %v7386_v10, %v1542_v46  ;;  %v1548_v10 = vmul.f32 0.0078125, %v5667_v62 }
 0x214   : > { %1999 = vadd.xlane.f32.xlu1 %v1818_v61  ;;  %1997 = vadd.xlane.f32.xlu0 %v1817_v22  ;;  %v1541_v61 = vmul.f32 0.0078125, %v5627_v4  ;;  %v1598_v22 = vmul.f32 0.0078125, %v5646_v36  ;;  %7387 = vst [vmem:[#allocation41_spill] sm:$0xff] %v5942_v34  ;;  %v1823_v4 = vmul.f32 %v5931_v52, %v5931_v52  ;;  %v7390_v36 = vld [vmem:[#allocation43_spill] sm:$0xff]  ;;  %v1545_v52 = vmul.f32 0.0078125, %v5699_v11 }
 0x215   : > { %v5919_v1 = vpop.xlane.xlu1 %1378  ;;  %v5921_v59 = vpop.xlane.xlu0 %1376 }
 0x216   : > { %v5945_v31 = vsub.f32 %v7388_v3, %v1541_v61  ;;  %v5952_v58 = vsub.f32 %v7390_v36, %v1598_v22  ;;  %v1547_v61 = vmul.f32 0.0078125, %v5669_v41  ;;  %v1766_v3 = vmul.f32 %v5942_v34, %v5942_v34  ;;  %v7394_v36 = vld [vmem:[#allocation45_spill] sm:$0xff] }
 0x217   : > { %v5976_v41 = vsub.f32 %v7394_v36, %v1548_v10  ;;  %v7400_v36 = vld [vmem:[#allocation46_spill] sm:$0xff] }
 0x218   : > { %1899 = vadd.xlane.f32.xlu1 %v1768_v23  ;;  %1897 = vadd.xlane.f32.xlu0 %v1767_v9  ;;  %7389 = vst [vmem:[#allocation40_spill] sm:$0xff] %v5945_v31  ;;  %7391 = vst [vmem:[#allocation43_spill] sm:$0xff] %v5952_v58  ;;  %v7392_v23 = vld [vmem:[#allocation42_spill] sm:$0xff] }
 0x219   : > { %v5937_v57 = vpop.xlane.xlu1 %1490  ;;  %v5939_v2 = vpop.xlane.xlu0 %1488  ;;  %v5955_v9 = vsub.f32 %v7392_v23, %v1597_v48  ;;  %7395 = vst [vmem:[#allocation45_spill] sm:$0xff] %v5976_v41  ;;  %v7396_v23 = vld [vmem:[#allocation44_spill] sm:$0xff] }
 0x21a   : > { %v5979_v34 = vsub.f32 %v7396_v23, %v1547_v61 }
 0x21b   : > { %7393 = vst [vmem:[#allocation42_spill] sm:$0xff] %v5955_v9  ;;  %v1821_v62 = vmul.f32 %v5955_v9, %v5955_v9  ;;  %v7398_v9 = vld [vmem:[#allocation47_spill] sm:$0xff] }
 0x21c   : > { %2011 = vadd.xlane.f32.xlu1 %v1824_v63  ;;  %2009 = vadd.xlane.f32.xlu0 %v1823_v4  ;;  %v1765_v63 = vmul.f32 %v5945_v31, %v5945_v31  ;;  %v1822_v4 = vmul.f32 %v5952_v58, %v5952_v58  ;;  %7397 = vst [vmem:[#allocation44_spill] sm:$0xff] %v5979_v34  ;;  %v1604_v31 = vmul.f32 0.0078125, %v5682_v40 }
 0x21d   : > { %v5957_v49 = vpop.xlane.xlu1 %1374  ;;  %v5959_v46 = vpop.xlane.xlu0 %1372  ;;  %v1772_v40 = vmul.f32 %v5976_v41, %v5976_v41 }
 0x21e   : > { %v5990_v10 = vsub.f32 %v7398_v9, %v1604_v31  ;;  %v1602_v9 = vmul.f32 0.0078125, %v5717_v14 }
 0x220   : > { %1895 = vadd.xlane.f32.xlu1 %v1766_v3  ;;  %1893 = vadd.xlane.f32.xlu0 %v1765_v63  ;;  %v1603_v3 = vmul.f32 0.0078125, %v5684_v6  ;;  %v1546_v63 = vmul.f32 0.0078125, %v5697_v32  ;;  %7399 = vst [vmem:[#allocation47_spill] sm:$0xff] %v5990_v10  ;;  %v1771_v6 = vmul.f32 %v5979_v34, %v5979_v34  ;;  %v7402_v32 = vld [vmem:[#allocation49_spill] sm:$0xff]  ;;  %v1607_v34 = vmul.f32 0.0078125, %v5747_v17 }
 0x221   : > { %v5967_v22 = vpop.xlane.xlu1 %1486  ;;  %v5969_v48 = vpop.xlane.xlu0 %1484 }
 0x222   : > { %v5993_v61 = vsub.f32 %v7400_v36, %v1603_v3  ;;  %v6000_v11 = vsub.f32 %v7402_v32, %v1546_v63  ;;  %v1601_v3 = vmul.f32 0.0078125, %v5719_v37  ;;  %v1828_v36 = vmul.f32 %v5990_v10, %v5990_v10  ;;  %v7406_v32 = vld [vmem:[#allocation51_spill] sm:$0xff] }
 0x223   : > { %v6024_v37 = vsub.f32 %v7406_v32, %v1602_v9  ;;  %v7412_v32 = vld [vmem:[#allocation52_spill] sm:$0xff] }
 0x224   : > { %2007 = vadd.xlane.f32.xlu1 %v1822_v4  ;;  %2005 = vadd.xlane.f32.xlu0 %v1821_v62  ;;  %7401 = vst [vmem:[#allocation46_spill] sm:$0xff] %v5993_v61  ;;  %7403 = vst [vmem:[#allocation49_spill] sm:$0xff] %v6000_v11  ;;  %v7404_v4 = vld [vmem:[#allocation48_spill] sm:$0xff] }
 0x225   : > { %v5985_v58 = vpop.xlane.xlu1 %1386  ;;  %v5987_v18 = vpop.xlane.xlu0 %1384  ;;  %v6003_v62 = vsub.f32 %v7404_v4, %v1545_v52  ;;  %7407 = vst [vmem:[#allocation51_spill] sm:$0xff] %v6024_v37  ;;  %v7408_v4 = vld [vmem:[#allocation50_spill] sm:$0xff] }
 0x226   : > { %v6027_v10 = vsub.f32 %v7408_v4, %v1601_v3 }
 0x227   : > { %7405 = vst [vmem:[#allocation48_spill] sm:$0xff] %v6003_v62  ;;  %v1769_v14 = vmul.f32 %v6003_v62, %v6003_v62  ;;  %v7410_v62 = vld [vmem:[#allocation53_spill] sm:$0xff] }
 0x228   : > { %1907 = vadd.xlane.f32.xlu1 %v1772_v40  ;;  %1905 = vadd.xlane.f32.xlu0 %v1771_v6  ;;  %v1827_v40 = vmul.f32 %v5993_v61, %v5993_v61  ;;  %v1770_v6 = vmul.f32 %v6000_v11, %v6000_v11  ;;  %7409 = vst [vmem:[#allocation50_spill] sm:$0xff] %v6027_v10  ;;  %v1552_v61 = vmul.f32 0.0078125, %v5727_v33 }
 0x229   : > { %v6005_v23 = vpop.xlane.xlu1 %1498  ;;  %v6007_v31 = vpop.xlane.xlu0 %1496  ;;  %v1826_v33 = vmul.f32 %v6024_v37, %v6024_v37 }
 0x22a   : > { %v6038_v9 = vsub.f32 %v7410_v62, %v1552_v61  ;;  %v1550_v62 = vmul.f32 0.0078125, %v5765_v19 }
 0x22c   : > { %2019 = vadd.xlane.f32.xlu1 %v1828_v36  ;;  %2017 = vadd.xlane.f32.xlu0 %v1827_v40  ;;  %v1551_v36 = vmul.f32 0.0078125, %v5729_v15  ;;  %v1608_v40 = vmul.f32 0.0078125, %v5745_v5  ;;  %7411 = vst [vmem:[#allocation53_spill] sm:$0xff] %v6038_v9  ;;  %v1825_v15 = vmul.f32 %v6027_v10, %v6027_v10  ;;  %v7414_v5 = vld [vmem:[#allocation55_spill] sm:$0xff]  ;;  %v1555_v10 = vmul.f32 0.0078125, %v5795_v54 }
 0x22d   : > { %v6015_v63 = vpop.xlane.xlu1 %1382  ;;  %v6017_v52 = vpop.xlane.xlu0 %1380 }
 0x22e   : > { %v6041_v3 = vsub.f32 %v7412_v32, %v1551_v36  ;;  %v6048_v17 = vsub.f32 %v7414_v5, %v1608_v40  ;;  %v1549_v36 = vmul.f32 0.0078125, %v5767_v8  ;;  %v1776_v32 = vmul.f32 %v6038_v9, %v6038_v9  ;;  %v7417_v5 = vld [vmem:[#allocation57_spill] sm:$0xff] }
 0x22f   : > { %v6072_v8 = vsub.f32 %v7417_v5, %v1550_v62 }
 0x230   : > { %1903 = vadd.xlane.f32.xlu1 %v1770_v6  ;;  %1901 = vadd.xlane.f32.xlu0 %v1769_v14  ;;  %7413 = vst [vmem:[#allocation52_spill] sm:$0xff] %v6041_v3  ;;  %7415 = vst [vmem:[#allocation55_spill] sm:$0xff] %v6048_v17  ;;  %v7416_v6 = vld [vmem:[#allocation54_spill] sm:$0xff] }
 0x231   : > { %v6033_v11 = vpop.xlane.xlu1 %1494  ;;  %v6035_v41 = vpop.xlane.xlu0 %1492  ;;  %v6051_v14 = vsub.f32 %v7416_v6, %v1607_v34  ;;  %v7418_v6 = vld [vmem:[#allocation56_spill] sm:$0xff] }
 0x232   : > { %v6075_v9 = vsub.f32 %v7418_v6, %v1549_v36 }
 0x233   : > { %v1831_v19 = vmul.f32 %v6051_v14, %v6051_v14 }
 0x234   : > { %2015 = vadd.xlane.f32.xlu1 %v1826_v33  ;;  %2013 = vadd.xlane.f32.xlu0 %v1825_v15  ;;  %v1775_v33 = vmul.f32 %v6041_v3, %v6041_v3  ;;  %v1832_v15 = vmul.f32 %v6048_v17, %v6048_v17  ;;  %v1606_v3 = vmul.f32 0.0078125, %v5775_v0  ;;  %v1774_v0 = vmul.f32 %v6072_v8, %v6072_v8 }
 0x235   : > { %v6053_v4 = vpop.xlane.xlu1 %1394  ;;  %v6055_v61 = vpop.xlane.xlu0 %1392 }
 0x236   : > { %v6086_v62 = vsub.f32 %v5289_v7, %v1606_v3  ;;  %v1611_v3 = vmul.f32 0.0078125, %v5815_v26 }
 0x238   : > { %1915 = vadd.xlane.f32.xlu1 %v1776_v32  ;;  %1913 = vadd.xlane.f32.xlu0 %v1775_v33  ;;  %v1605_v32 = vmul.f32 0.0078125, %v5777_v20  ;;  %v1556_v33 = vmul.f32 0.0078125, %v5793_v47  ;;  %v1773_v20 = vmul.f32 %v6075_v9, %v6075_v9  ;;  %v6099_v47 = vsub.f32 %v5295_v12, %v1555_v10 }
 0x239   : > { %v6063_v40 = vpop.xlane.xlu1 %1506  ;;  %v6065_v34 = vpop.xlane.xlu0 %1504  ;;  %v6123_v6 = vsub.f32 %v5305_v16, %v1611_v3  ;;  %v1559_v3 = vmul.f32 0.0078125, %v5863_v50 }
 0x23a   : > { %v6089_v36 = vsub.f32 %v5285_v21, %v1605_v32  ;;  %v6096_v54 = vsub.f32 %v5299_v29, %v1556_v33  ;;  %v1612_v21 = vmul.f32 0.0078125, %v5813_v55  ;;  %v1779_v55 = vmul.f32 %v6099_v47, %v6099_v47 }
 0x23b   : > { %v1554_v32 = vmul.f32 0.0078125, %v5823_v43  ;;  %v1553_v33 = vmul.f32 0.0078125, %v5825_v25  ;;  %v1835_v25 = vmul.f32 %v6123_v6, %v6123_v6 }
 0x23c   : > { %2027 = vadd.xlane.f32.xlu1 %v1832_v15  ;;  %2025 = vadd.xlane.f32.xlu0 %v1831_v19  ;;  %v1830_v19 = vmul.f32 %v6086_v62, %v6086_v62  ;;  %v1829_v5 = vmul.f32 %v6089_v36, %v6089_v36  ;;  %v1780_v10 = vmul.f32 %v6096_v54, %v6096_v54 }
 0x23d   : > { %v6081_v17 = vpop.xlane.xlu1 %1390  ;;  %v6083_v37 = vpop.xlane.xlu0 %1388  ;;  %v6120_v26 = vsub.f32 %v5309_v24, %v1612_v21  ;;  %v6134_v24 = vsub.f32 %v5319_v39, %v1554_v32  ;;  %v6137_v16 = vsub.f32 %v5315_v27, %v1553_v33  ;;  %v1560_v27 = vmul.f32 0.0078125, %v5861_v51  ;;  %v7424_v33 = vld [vmem:[#allocation58_spill] sm:$0xff] }
 0x23f   : > { %7419 = vst [vmem:[#allocation54_spill] sm:$0xff] %v6134_v24  ;;  %7420 = vst [vmem:[#allocation57_spill] sm:$0xff] %v6137_v16  ;;  %v1836_v43 = vmul.f32 %v6120_v26, %v6120_v26  ;;  %v6168_v50 = vsub.f32 %v5339_v38, %v1560_v27  ;;  %v7428_v27 = vld [vmem:[#allocation59_spill] sm:$0xff] }
 0x240   : > { %1911 = vadd.xlane.f32.xlu1 %v1774_v0  ;;  %1909 = vadd.xlane.f32.xlu0 %v1773_v20  ;;  %v1610_v0 = vmul.f32 0.0078125, %v5841_v53  ;;  %v1609_v20 = vmul.f32 0.0078125, %v5843_v45 }
 0x241   : > { %v6101_v15 = vpop.xlane.xlu1 %1502  ;;  %v6103_v7 = vpop.xlane.xlu0 %1500  ;;  %7423 = vst [vmem:[#allocation107_spill] sm:$0xff] %v6168_v50 }
 0x242   : > { %v6144_v45 = vsub.f32 %v5329_v28, %v1610_v0  ;;  %v6147_v53 = vsub.f32 %v5325_v13, %v1609_v20  ;;  %v6171_v0 = vsub.f32 %v7424_v33, %v1559_v3  ;;  %v1616_v20 = vmul.f32 0.0078125, %v5871_v56 }
 0x243   : > { %v1784_v56 = vmul.f32 %v6168_v50, %v6168_v50  ;;  %v1617_v50 = vmul.f32 0.0078125, %v5969_v48  ;;  %v1566_v48 = vmul.f32 0.0078125, %v6015_v63  ;;  %v7450_v63 = vld [vmem:[#allocation71_spill] sm:$0xff] }
 0x244   : > { %2023 = vadd.xlane.f32.xlu1 %v1830_v19  ;;  %2021 = vadd.xlane.f32.xlu0 %v1829_v5  ;;  %7421 = vst [vmem:[#allocation56_spill] sm:$0xff] %v6144_v45  ;;  %7422 = vst [vmem:[#allocation106_spill] sm:$0xff] %v6147_v53  ;;  %v1834_v32 = vmul.f32 %v6144_v45, %v6144_v45  ;;  %v1833_v51 = vmul.f32 %v6147_v53, %v6147_v53  ;;  %v7426_v53 = vld [vmem:[#allocation60_spill] sm:$0xff] }
 0x245   : > { %v6111_v29 = vpop.xlane.xlu1 %1402  ;;  %v6113_v12 = vpop.xlane.xlu0 %1400  ;;  %7425 = vst [vmem:[#allocation58_spill] sm:$0xff] %v6171_v0  ;;  %v6182_v38 = vsub.f32 %v7426_v53, %v1616_v20  ;;  %v1613_v53 = vmul.f32 0.0078125, %v5911_v44  ;;  %v1619_v44 = vmul.f32 0.0078125, %v5939_v2  ;;  %v7439_v2 = vld [vmem:[#allocation65_spill] sm:$0xff] }
 0x247   : > { %7427 = vst [vmem:[#allocation60_spill] sm:$0xff] %v6182_v38 }
 0x248   : > { %1923 = vadd.xlane.f32.xlu1 %v1780_v10  ;;  %1921 = vadd.xlane.f32.xlu0 %v1779_v55  ;;  %v1778_v10 = vmul.f32 %v6134_v24, %v6134_v24  ;;  %v1777_v55 = vmul.f32 %v6137_v16, %v6137_v16  ;;  %v7443_v16 = vld [vmem:[#allocation67_spill] sm:$0xff] }
 0x249   : > { %v6129_v19 = vpop.xlane.xlu1 %1514  ;;  %v6131_v5 = vpop.xlane.xlu0 %1512  ;;  %v6240_v24 = vsub.f32 %v7443_v16, %v1619_v44  ;;  %v7448_v44 = vld [vmem:[#allocation72_spill] sm:$0xff] }
 0x24c   : > { %2035 = vadd.xlane.f32.xlu1 %v1836_v43  ;;  %2033 = vadd.xlane.f32.xlu0 %v1835_v25  ;;  %v1615_v43 = vmul.f32 0.0078125, %v5873_v60  ;;  %v1558_v25 = vmul.f32 0.0078125, %v5889_v30  ;;  %v1783_v60 = vmul.f32 %v6171_v0, %v6171_v0  ;;  %v1614_v30 = vmul.f32 0.0078125, %v5909_v42 }
 0x24d   : > { %v6149_v21 = vpop.xlane.xlu1 %1398  ;;  %v6151_v39 = vpop.xlane.xlu0 %1396  ;;  %v1563_v0 = vmul.f32 0.0078125, %v5921_v59  ;;  %v1840_v42 = vmul.f32 %v6182_v38, %v6182_v38 }
 0x24e   : > { %v6185_v3 = vsub.f32 %v7428_v27, %v1615_v43  ;;  %v1564_v27 = vmul.f32 0.0078125, %v5919_v1  ;;  %v1562_v1 = vmul.f32 0.0078125, %v5957_v49  ;;  %v1618_v49 = vmul.f32 0.0078125, %v5967_v22  ;;  %v7444_v22 = vld [vmem:[#allocation70_spill] sm:$0xff] }
 0x250   : > { %1919 = vadd.xlane.f32.xlu1 %v1778_v10  ;;  %1917 = vadd.xlane.f32.xlu0 %v1777_v55  ;;  %v1557_v10 = vmul.f32 0.0078125, %v5891_v35  ;;  %7429 = vst [vmem:[#allocation59_spill] sm:$0xff] %v6185_v3  ;;  %v7430_v35 = vld [vmem:[#allocation62_spill] sm:$0xff] }
 0x251   : > { %v6159_v28 = vpop.xlane.xlu1 %1510  ;;  %v6161_v13 = vpop.xlane.xlu0 %1508 }
 0x254   : > { %2031 = vadd.xlane.f32.xlu1 %v1834_v32  ;;  %2029 = vadd.xlane.f32.xlu0 %v1833_v51  ;;  %v6193_v32 = vsub.f32 %v7430_v35, %v1558_v25  ;;  %v7432_v51 = vld [vmem:[#allocation61_spill] sm:$0xff]  ;;  %v1839_v25 = vmul.f32 %v6185_v3, %v6185_v3  ;;  %v7435_v35 = vld [vmem:[#allocation63_spill] sm:$0xff] }
 0x255   : > { %v6177_v55 = vpop.xlane.xlu1 %1410  ;;  %v6179_v45 = vpop.xlane.xlu0 %1408  ;;  %v6196_v33 = vsub.f32 %v7432_v51, %v1557_v10  ;;  %v7433_v10 = vld [vmem:[#allocation64_spill] sm:$0xff]  ;;  %v6215_v51 = vsub.f32 %v7435_v35, %v1613_v53  ;;  %v1561_v53 = vmul.f32 0.0078125, %v5959_v46 }
 0x256   : > { %7431 = vst [vmem:[#allocation62_spill] sm:$0xff] %v6193_v32  ;;  %v1782_v3 = vmul.f32 %v6193_v32, %v6193_v32  ;;  %v1568_v32 = vmul.f32 0.0078125, %v5985_v58 }
 0x257   : > { %7436 = vst [vmem:[#allocation64_spill] sm:$0xff] %v6215_v51 }
 0x258   : > { %1931 = vadd.xlane.f32.xlu1 %v1784_v56  ;;  %1929 = vadd.xlane.f32.xlu0 %v1783_v60  ;;  %v1620_v56 = vmul.f32 0.0078125, %v5937_v57  ;;  %v6211_v60 = vsub.f32 %v7433_v10, %v1614_v30  ;;  %v1781_v57 = vmul.f32 %v6196_v33, %v6196_v33  ;;  %v7437_v30 = vld [vmem:[#allocation66_spill] sm:$0xff] }
 0x259   : > { %v6199_v20 = vpop.xlane.xlu1 %1522  ;;  %v6201_v43 = vpop.xlane.xlu0 %1520  ;;  %v6227_v10 = vsub.f32 %v7437_v30, %v1564_v27  ;;  %v1567_v27 = vmul.f32 0.0078125, %v5987_v18  ;;  %v1624_v30 = vmul.f32 0.0078125, %v6005_v23  ;;  %v1837_v18 = vmul.f32 %v6215_v51, %v6215_v51  ;;  %v7446_v23 = vld [vmem:[#allocation69_spill] sm:$0xff] }
 0x25a   : > { %7434 = vst [vmem:[#allocation61_spill] sm:$0xff] %v6211_v60  ;;  %v1838_v46 = vmul.f32 %v6211_v60, %v6211_v60  ;;  %v1565_v51 = vmul.f32 0.0078125, %v6017_v52  ;;  %v1622_v52 = vmul.f32 0.0078125, %v6033_v11 }
 0x25b   : > { %7438 = vst [vmem:[#allocation63_spill] sm:$0xff] %v6227_v10 }
 0x25c   : > { %2043 = vadd.xlane.f32.xlu1 %v1840_v42  ;;  %2041 = vadd.xlane.f32.xlu0 %v1839_v25  ;;  %v6230_v42 = vsub.f32 %v7439_v2, %v1563_v0  ;;  %v7441_v25 = vld [vmem:[#allocation68_spill] sm:$0xff]  ;;  %v6247_v0 = vsub.f32 %v7444_v22, %v1562_v1  ;;  %v1788_v1 = vmul.f32 %v6227_v10, %v6227_v10 }
 0x25d   : > { %v6218_v59 = vpop.xlane.xlu1 %1406  ;;  %v6220_v38 = vpop.xlane.xlu0 %1404  ;;  %v6235_v35 = vsub.f32 %v7441_v25, %v1620_v56  ;;  %v1623_v56 = vmul.f32 0.0078125, %v6007_v31  ;;  %v6268_v2 = vsub.f32 %v7450_v63, %v1617_v50  ;;  %v7452_v25 = vld [vmem:[#allocation74_spill] sm:$0xff]  ;;  %v1843_v50 = vmul.f32 %v6240_v24, %v6240_v24  ;;  %v7458_v63 = vld [vmem:[#allocation75_spill] sm:$0xff] }
 0x25e   : > { %7440 = vst [vmem:[#allocation66_spill] sm:$0xff] %v6230_v42  ;;  %7445 = vst [vmem:[#allocation68_spill] sm:$0xff] %v6247_v0  ;;  %v1787_v31 = vmul.f32 %v6230_v42, %v6230_v42  ;;  %v6271_v22 = vsub.f32 %v7452_v25, %v1568_v32  ;;  %v7460_v32 = vld [vmem:[#allocation78_spill] sm:$0xff] }
 0x25f   : > { %7442 = vst [vmem:[#allocation65_spill] sm:$0xff] %v6235_v35  ;;  %7451 = vst [vmem:[#allocation69_spill] sm:$0xff] %v6268_v2  ;;  %v6285_v42 = vsub.f32 %v7458_v63, %v1623_v56  ;;  %v6288_v25 = vsub.f32 %v7460_v32, %v1566_v48  ;;  %v7462_v56 = vld [vmem:[#allocation77_spill] sm:$0xff]  ;;  %v1621_v48 = vmul.f32 0.0078125, %v6035_v41  ;;  %v6305_v11 = vmul.f32 %v6268_v2, %v6268_v2  ;;  %v7463_v41 = vld [vmem:[#allocation80_spill] sm:$0xff] }
 0x260   : > { %1927 = vadd.xlane.f32.xlu1 %v1782_v3  ;;  %1925 = vadd.xlane.f32.xlu0 %v1781_v57  ;;  %v6258_v3 = vsub.f32 %v7446_v23, %v1561_v53  ;;  %v6261_v57 = vsub.f32 %v7448_v44, %v1618_v49  ;;  %7453 = vst [vmem:[#allocation72_spill] sm:$0xff] %v6271_v22  ;;  %v7454_v23 = vld [vmem:[#allocation73_spill] sm:$0xff]  ;;  %v7456_v44 = vld [vmem:[#allocation76_spill] sm:$0xff]  ;;  %v1572_v2 = vmul.f32 0.0078125, %v6053_v4  ;;  %v1628_v4 = vmul.f32 0.0078125, %v6063_v40 }
 0x261   : > { %v6251_v58 = vpop.xlane.xlu1 %1518  ;;  %v6253_v16 = vpop.xlane.xlu0 %1516  ;;  %v1844_v53 = vmul.f32 %v6235_v35, %v6235_v35  ;;  %v6277_v49 = vsub.f32 %v7454_v23, %v1567_v27  ;;  %v6280_v60 = vsub.f32 %v7456_v44, %v1624_v30  ;;  %7459 = vst [vmem:[#allocation73_spill] sm:$0xff] %v6285_v42  ;;  %7461 = vst [vmem:[#allocation76_spill] sm:$0xff] %v6288_v25  ;;  %v1626_v40 = vmul.f32 0.0078125, %v6101_v15  ;;  %v7473_v15 = vld [vmem:[#allocation83_spill] sm:$0xff] }
 0x262   : > { %7447 = vst [vmem:[#allocation67_spill] sm:$0xff] %v6258_v3  ;;  %7449 = vst [vmem:[#allocation70_spill] sm:$0xff] %v6261_v57  ;;  %v1786_v27 = vmul.f32 %v6247_v0, %v6247_v0  ;;  %v6300_v44 = vsub.f32 %v7462_v56, %v1565_v51  ;;  %v6320_v56 = vsub.f32 %v7463_v41, %v1622_v52 }
 0x263   : > { %7455 = vst [vmem:[#allocation71_spill] sm:$0xff] %v6277_v49  ;;  %7457 = vst [vmem:[#allocation74_spill] sm:$0xff] %v6280_v60  ;;  %v6313_v32 = vmul.f32 %v6277_v49, %v6277_v49  ;;  %v6317_v51 = vmul.f32 %v6280_v60, %v6280_v60  ;;  %v7465_v49 = vld [vmem:[#allocation79_spill] sm:$0xff] }
 0x264   : > { %2039 = vadd.xlane.f32.xlu1 %v1838_v46  ;;  %2037 = vadd.xlane.f32.xlu0 %v1837_v18  ;;  %v1785_v46 = vmul.f32 %v6258_v3, %v6258_v3  ;;  %v6297_v18 = vmul.f32 %v6261_v57, %v6261_v57  ;;  %7464 = vst [vmem:[#allocation75_spill] sm:$0xff] %v6320_v56 }
 0x265   : > { %v1868_v35 = vpop.xlane.xlu1 %1867  ;;  %v1866_v10 = vpop.xlane.xlu0 %1865  ;;  %v6333_v52 = vsub.f32 %v7465_v49, %v1621_v48  ;;  %v6338_v41 = vmul.f32 %v6300_v44, %v6300_v44 }
 0x266   : > { %v2088_v30 = vmul.f32 0.0078125, %v1868_v35  ;;  %v2087_v23 = vmul.f32 0.0078125, %v1866_v10  ;;  %v6309_v35 = vmul.f32 %v6271_v22, %v6271_v22 }
 0x267   : > { %7466 = vst [vmem:[#allocation78_spill] sm:$0xff] %v6333_v52 }
 0x268   : > { %v2200_v10 = vadd.f32 1e-05, %v2088_v30  ;;  %v2199_v63 = vadd.f32 1e-05, %v2087_v23  ;;  %1939 = vadd.xlane.f32.xlu1 %v1788_v1  ;;  %1937 = vadd.xlane.f32.xlu0 %v1787_v31  ;;  %v6325_v30 = vmul.f32 %v6285_v42, %v6285_v42  ;;  %v6329_v1 = vmul.f32 %v6288_v25, %v6288_v25 }
 0x269   : > { %v1980_v57 = vpop.xlane.xlu1 %1979  ;;  %v1978_v22 = vpop.xlane.xlu0 %1977  ;;  %v1571_v31 = vmul.f32 0.0078125, %v6055_v61  ;;  %v1627_v42 = vmul.f32 0.0078125, %v6065_v34  ;;  %v1570_v25 = vmul.f32 0.0078125, %v6081_v17  ;;  %v7467_v61 = vld [vmem:[#allocation82_spill] sm:$0xff]  ;;  %v7469_v34 = vld [vmem:[#allocation81_spill] sm:$0xff] }
 0x26a   : > { %4377 = vrsqrt.f32 %v2200_v10  ;;  %v2144_v23 = vmul.f32 0.0078125, %v1980_v57  ;;  %v2143_v60 = vmul.f32 0.0078125, %v1978_v22  ;;  %v6343_v57 = vsub.f32 %v7467_v61, %v1572_v2  ;;  %v7475_v61 = vld [vmem:[#allocation86_spill] sm:$0xff] }
 0x26b   : > { %4379 = vrsqrt.f32 %v2199_v63  ;;  %v1569_v22 = vmul.f32 0.0078125, %v6083_v37  ;;  %v6349_v10 = vmul.f32 %v6320_v56, %v6320_v56  ;;  %v6352_v63 = vsub.f32 %v7469_v34, %v1571_v31 }
 0x26c   : > { %v2256_v3 = vadd.f32 1e-05, %v2144_v23  ;;  %v2255_v0 = vadd.f32 1e-05, %v2143_v60  ;;  %2051 = vadd.xlane.f32.xlu1 %v1844_v53  ;;  %2049 = vadd.xlane.f32.xlu0 %v1843_v50  ;;  %7468 = vst [vmem:[#allocation77_spill] sm:$0xff] %v6343_v57  ;;  %v7471_v53 = vld [vmem:[#allocation84_spill] sm:$0xff]  ;;  %v6360_v37 = vmul.f32 %v6333_v52, %v6333_v52  ;;  %v6363_v23 = vsub.f32 %v7473_v15, %v1627_v42 }
 0x26d   : > { %v1864_v49 = vpop.xlane.xlu1 %1863  ;;  %v1862_v48 = vpop.xlane.xlu0 %1861  ;;  %7470 = vst [vmem:[#allocation80_spill] sm:$0xff] %v6352_v63  ;;  %v6355_v50 = vsub.f32 %v7471_v53, %v1628_v4  ;;  %v1625_v2 = vmul.f32 0.0078125, %v6103_v7  ;;  %v6366_v56 = vsub.f32 %v7475_v61, %v1570_v25  ;;  %v6377_v42 = vmul.f32 %v6343_v57, %v6343_v57 }
 0x26e   : > { %4381 = vrsqrt.f32 %v2256_v3  ;;  %v2086_v17 = vmul.f32 0.0078125, %v1864_v49  ;;  %v2085_v60 = vmul.f32 0.0078125, %v1862_v48  ;;  %7474 = vst [vmem:[#allocation82_spill] sm:$0xff] %v6363_v23  ;;  %v7477_v49 = vld [vmem:[#allocation85_spill] sm:$0xff]  ;;  %v7479_v48 = vld [vmem:[#allocation88_spill] sm:$0xff] }
 0x26f   : > { %7472 = vst [vmem:[#allocation79_spill] sm:$0xff] %v6355_v50  ;;  %4383 = vrsqrt.f32 %v2255_v0  ;;  %7476 = vst [vmem:[#allocation81_spill] sm:$0xff] %v6366_v56  ;;  %v6369_v4 = vsub.f32 %v7477_v49, %v1569_v22  ;;  %v6372_v7 = vsub.f32 %v7479_v48, %v1626_v40  ;;  %v1576_v0 = vmul.f32 0.0078125, %v6111_v29  ;;  %v6390_v29 = vld [vmem:[%s7024_s3] ss:$0 sm:$0xff]  ;;  %v7483_v49 = vld [vmem:[#allocation90_spill] sm:$0xff] }
 0x270   : > { %v2198_v31 = vadd.f32 1e-05, %v2086_v17  ;;  %v2197_v3 = vadd.f32 1e-05, %v2085_v60  ;;  %1935 = vadd.xlane.f32.xlu1 %v1786_v27  ;;  %1933 = vadd.xlane.f32.xlu0 %v1785_v46  ;;  %v6381_v27 = vmul.f32 %v6352_v63, %v6352_v63  ;;  %v7481_v46 = vld [vmem:[#allocation87_spill] sm:$0xff]  ;;  %v1575_v40 = vmul.f32 0.0078125, %v6113_v12 }
 0x271   : > { %7478 = vst [vmem:[#allocation84_spill] sm:$0xff] %v6369_v4  ;;  %7480 = vst [vmem:[#allocation83_spill] sm:$0xff] %v6372_v7  ;;  %v1976_v34 = vpop.xlane.xlu1 %1975  ;;  %v1974_v53 = vpop.xlane.xlu0 %1973  ;;  %v6384_v22 = vsub.f32 %v7481_v46, %v1625_v2  ;;  %v6394_v60 = vmul.f32 %v6355_v50, %v6355_v50  ;;  %v6401_v12 = vmul.f32 %v6363_v23, %v6363_v23  ;;  %v6422_v46 = vld [vmem:[%s7025_s4] ss:$0 sm:$0xff]  ;;  %v1632_v63 = vmul.f32 0.0078125, %v6129_v19 }
 0x272   : > { %4385 = vrsqrt.f32 %v2198_v31  ;;  %v2142_v25 = vmul.f32 0.0078125, %v1976_v34  ;;  %v2141_v17 = vmul.f32 0.0078125, %v1974_v53  ;;  %v6405_v2 = vmul.f32 %v6366_v56, %v6366_v56  ;;  %v7485_v34 = vld [vmem:[#allocation7_spill] sm:$0xff]  ;;  %v7486_v56 = vld [vmem:[#allocation104_spill] sm:$0xff] }
 0x273   : > { %7482 = vst [vmem:[#allocation86_spill] sm:$0xff] %v6384_v22  ;;  %4387 = vrsqrt.f32 %v2197_v3  ;;  %v6408_v48 = vsub.f32 %v7483_v49, %v1576_v0 }
 0x274   : > { %v4378_v15 = vpop.eup %4377  ;;  %v2254_v61 = vadd.f32 1e-05, %v2142_v25  ;;  %v2253_v31 = vadd.f32 1e-05, %v2141_v17  ;;  %2047 = vadd.xlane.f32.xlu1 %v6297_v18  ;;  %2045 = vadd.xlane.f32.xlu0 %v6305_v11  ;;  %v6413_v18 = vmul.f32 %v6369_v4, %v6369_v4  ;;  %v6417_v11 = vmul.f32 %v6372_v7, %v6372_v7 }
 0x275   : > { %v4380_v3 = vpop.eup %4379  ;;  %7484 = vst [vmem:[#allocation85_spill] sm:$0xff] %v6408_v48  ;;  %v2424_v53 = vmul.f32 %v4378_v15, %v7485_v34  ;;  %v1876_v25 = vpop.xlane.xlu1 %1875  ;;  %v7487_v34 = vld [vmem:[#allocation89_spill] sm:$0xff]  ;;  %v6435_v7 = vmul.f32 %v6384_v22, %v6384_v22  ;;  %v6446_v19 = vmul.f32 %v6408_v48, %v6408_v48 }
 0x276   : > { %v1874_v17 = vpop.xlane.xlu0 %1873  ;;  %v2423_v0 = vmul.f32 %v4380_v3, %v7486_v56  ;;  %4389 = vrsqrt.f32 %v2254_v61  ;;  %v2092_v49 = vmul.f32 0.0078125, %v1876_v25  ;;  %v6426_v23 = vsub.f32 %v7487_v34, %v1575_v40  ;;  %v7489_v25 = vld [vmem:[#allocation9_spill] sm:$0xff] }
 0x277   : > { %v2091_v15 = vmul.f32 0.0078125, %v1874_v17  ;;  %v2543_v4 = vmul.f32 %v6390_v29, %v2424_v53  ;;  %4391 = vrsqrt.f32 %v2253_v31  ;;  %v1631_v53 = vmul.f32 0.0078125, %v6131_v5 }
 0x278   : > { %7488 = vst [vmem:[#allocation88_spill] sm:$0xff] %v6426_v23  ;;  %v4382_v50 = vpop.eup %4381  ;;  %v2542_v56 = vmul.f32 %v6390_v29, %v2423_v0  ;;  %v2204_v61 = vadd.f32 1e-05, %v2092_v49  ;;  %1947 = vadd.xlane.f32.xlu1 %v6309_v35  ;;  %1945 = vadd.xlane.f32.xlu0 %v6313_v32  ;;  %v7490_v49 = vld [vmem:[#allocation5_spill] sm:$0xff] }
 0x279   : > { %v2203_v3 = vadd.f32 1e-05, %v2091_v15  ;;  %v4384_v40 = vpop.eup %4383  ;;  %v2662_v31 = vadd.f32 %v6422_v46, %v2543_v4  ;;  %v2480_v17 = vmul.f32 %v4382_v50, %v7489_v25  ;;  %v1988_v34 = vpop.xlane.xlu1 %1987  ;;  %v6453_v50 = vmul.f32 %v6426_v23, %v6426_v23  ;;  %v7491_v25 = vld [vmem:[#allocation92_spill] sm:$0xff] }
 0x27a   : > { %v1986_v22 = vpop.xlane.xlu0 %1985  ;;  %v2661_v0 = vadd.f32 %v6422_v46, %v2542_v56  ;;  %v2479_v15 = vmul.f32 %v4384_v40, %v7490_v49  ;;  %4393 = vrsqrt.f32 %v2204_v61  ;;  %v2148_v35 = vmul.f32 0.0078125, %v1988_v34 }
 0x27b   : > { %v2599_v32 = vmul.f32 %v6390_v29, %v2480_v17  ;;  %4395 = vrsqrt.f32 %v2203_v3  ;;  %v2147_v5 = vmul.f32 0.0078125, %v1986_v22  ;;  %v6456_v57 = vsub.f32 %v7491_v25, %v1632_v63  ;;  %v7492_v3 = vld [vmem:[#allocation91_spill] sm:$0xff] }
 0x27c   : > { %v4386_v4 = vpop.eup %4385  ;;  %v3766_v48 = vpack.c.bf16 %v2662_v31, %v2661_v0  ;;  %v2598_v56 = vmul.f32 %v6390_v29, %v2479_v15  ;;  %v2260_v52 = vadd.f32 1e-05, %v2148_v35  ;;  %2059 = vadd.xlane.f32.xlu1 %v6317_v51  ;;  %2057 = vadd.xlane.f32.xlu0 %v6325_v30  ;;  %v6462_v22 = vsub.f32 %v7492_v3, %v1631_v53  ;;  %v7493_v17 = vld [vmem:[#allocation11_spill] sm:$0xff]  ;;  %v7494_v51 = vld [vmem:[#allocation6_spill] sm:$0xff] }
 0x27d   : > { %v4388_v61 = vpop.eup %4387  ;;  %v2718_v40 = vadd.f32 %v6422_v46, %v2599_v32  ;;  %v2422_v34 = vmul.f32 %v4386_v4, %v7493_v17  ;;  %v2259_v49 = vadd.f32 1e-05, %v2147_v5  ;;  %v1872_v23 = vpop.xlane.xlu1 %1871  ;;  %v1574_v53 = vmul.f32 0.0078125, %v6149_v21  ;;  %v7495_v21 = vld [vmem:[#allocation10_spill] sm:$0xff] }
 0x27e   : > { %v1870_v63 = vpop.xlane.xlu0 %1869  ;;  %4038 = vst [vmem:[%s6467_s8 + $0x8] sm:$0xff] %v3766_v48   ;;  %v2717_v31 = vadd.f32 %v6422_v46, %v2598_v56  ;;  %v2421_v0 = vmul.f32 %v4388_v61, %v7494_v51  ;;  %4397 = vrsqrt.f32 %v2260_v52  ;;  %v2090_v30 = vmul.f32 0.0078125, %v1872_v23 }
 0x27f   : > { %v2541_v15 = vmul.f32 %v6390_v29, %v2422_v34  ;;  %4399 = vrsqrt.f32 %v2259_v49  ;;  %v2089_v35 = vmul.f32 0.0078125, %v1870_v63  ;;  %v1573_v5 = vmul.f32 0.0078125, %v6151_v39 }
 0x280   : > { %v4390_v32 = vpop.eup %4389  ;;  %v3906_v4 = vpack.c.bf16 %v2718_v40, %v2717_v31  ;;  %v2540_v25 = vmul.f32 %v6390_v29, %v2421_v0  ;;  %v2202_v48 = vadd.f32 1e-05, %v2090_v30  ;;  %1943 = vadd.xlane.f32.xlu1 %v6329_v1  ;;  %1941 = vadd.xlane.f32.xlu0 %v6338_v41  ;;  %v6482_v34 = vmul.f32 %v6456_v57, %v6456_v57  ;;  %v7496_v40 = vld [vmem:[#allocation8_spill] sm:$0xff]  ;;  %v7497_v0 = vld [vmem:[#allocation94_spill] sm:$0xff] }
 0x281   : > { %v4392_v52 = vpop.eup %4391  ;;  %v2660_v23 = vadd.f32 %v6422_v46, %v2541_v15  ;;  %v2478_v56 = vmul.f32 %v4390_v32, %v7495_v21  ;;  %v2201_v61 = vadd.f32 1e-05, %v2089_v35  ;;  %v1984_v3 = vpop.xlane.xlu1 %1983  ;;  %v6490_v31 = vmul.f32 %v6462_v22, %v6462_v22  ;;  %v7499_v21 = vld [vmem:[#allocation13_spill] sm:$0xff] }
 0x282   : > { %v1982_v17 = vpop.xlane.xlu0 %1981  ;;  %4066 = vst [vmem:[%s6467_s8 + $0xe8] sm:$0xff] %v3906_v4   ;;  %v2659_v39 = vadd.f32 %v6422_v46, %v2540_v25  ;;  %v2477_v49 = vmul.f32 %v4392_v52, %v7496_v40  ;;  %4401 = vrsqrt.f32 %v2202_v48  ;;  %v2146_v1 = vmul.f32 0.0078125, %v1984_v3  ;;  %v7498_v25 = vld [vmem:[#allocation93_spill] sm:$0xff] }
 0x283   : > { %v2597_v41 = vmul.f32 %v6390_v29, %v2478_v56  ;;  %4403 = vrsqrt.f32 %v2201_v61  ;;  %v2145_v63 = vmul.f32 0.0078125, %v1982_v17  ;;  %v6493_v30 = vsub.f32 %v7497_v0, %v1574_v53  ;;  %v7500_v17 = vld [vmem:[#allocation12_spill] sm:$0xff] }
 0x284   : > { %v4394_v51 = vpop.eup %4393  ;;  %v3761_v15 = vpack.c.bf16 %v2660_v23, %v2659_v39  ;;  %v2596_v35 = vmul.f32 %v6390_v29, %v2477_v49  ;;  %v2258_v32 = vadd.f32 1e-05, %v2146_v1  ;;  %2055 = vadd.xlane.f32.xlu1 %v6349_v10  ;;  %2053 = vadd.xlane.f32.xlu0 %v6360_v37  ;;  %v6499_v48 = vsub.f32 %v7498_v25, %v1573_v5 }
 0x285   : > { %v4396_v4 = vpop.eup %4395  ;;  %v2716_v52 = vadd.f32 %v6422_v46, %v2597_v41  ;;  %v2428_v56 = vmul.f32 %v4394_v51, %v7499_v21  ;;  %v2257_v61 = vadd.f32 1e-05, %v2145_v63  ;;  %v1884_v3 = vpop.xlane.xlu1 %1883  ;;  %v1630_v37 = vmul.f32 0.0078125, %v6159_v28  ;;  %v7501_v28 = vld [vmem:[#allocation15_spill] sm:$0xff] }
 0x286   : > { %v1882_v53 = vpop.xlane.xlu0 %1881  ;;  %3762 = vst [vmem:[%s6467_s8] sm:$0xff] %v3761_v15   ;;  %v2715_v23 = vadd.f32 %v6422_v46, %v2596_v35  ;;  %v2427_v39 = vmul.f32 %v4396_v4, %v7500_v17  ;;  %4405 = vrsqrt.f32 %v2258_v32  ;;  %v2096_v10 = vmul.f32 0.0078125, %v1884_v3 }
 0x287   : > { %v2547_v40 = vmul.f32 %v6390_v29, %v2428_v56  ;;  %4407 = vrsqrt.f32 %v2257_v61  ;;  %v2095_v5 = vmul.f32 0.0078125, %v1882_v53  ;;  %v1629_v1 = vmul.f32 0.0078125, %v6161_v13 }
 0x288   : > { %v4398_v49 = vpop.eup %4397  ;;  %v3901_v41 = vpack.c.bf16 %v2716_v52, %v2715_v23  ;;  %v2546_v63 = vmul.f32 %v6390_v29, %v2427_v39  ;;  %v2208_v51 = vadd.f32 1e-05, %v2096_v10  ;;  %1955 = vadd.xlane.f32.xlu1 %v6377_v42  ;;  %1953 = vadd.xlane.f32.xlu0 %v6381_v27  ;;  %v6516_v21 = vmul.f32 %v6493_v30, %v6493_v30  ;;  %v7502_v52 = vld [vmem:[#allocation14_spill] sm:$0xff]  ;;  %v7503_v23 = vld [vmem:[#allocation96_spill] sm:$0xff] }
 0x289   : > { %v4400_v0 = vpop.eup %4399  ;;  %v2666_v15 = vadd.f32 %v6422_v46, %v2547_v40  ;;  %v2484_v35 = vmul.f32 %v4398_v49, %v7501_v28  ;;  %v2207_v32 = vadd.f32 1e-05, %v2095_v5  ;;  %v1996_v4 = vpop.xlane.xlu1 %1995  ;;  %v6524_v3 = vmul.f32 %v6499_v48, %v6499_v48  ;;  %v7504_v49 = vld [vmem:[#allocation95_spill] sm:$0xff] }
 0x28a   : > { %v1994_v25 = vpop.xlane.xlu0 %1993  ;;  %4065 = vst [vmem:[%s6467_s8 + $0xe0] sm:$0xff] %v3901_v41   ;;  %v2665_v13 = vadd.f32 %v6422_v46, %v2546_v63  ;;  %v2483_v56 = vmul.f32 %v4400_v0, %v7502_v52  ;;  %4409 = vrsqrt.f32 %v2208_v51  ;;  %v2152_v42 = vmul.f32 0.0078125, %v1996_v4  ;;  %v7505_v51 = vld [vmem:[#allocation17_spill] sm:$0xff] }
 0x28b   : > { %v2603_v27 = vmul.f32 %v6390_v29, %v2484_v35  ;;  %4411 = vrsqrt.f32 %v2207_v32  ;;  %v2151_v61 = vmul.f32 0.0078125, %v1994_v25  ;;  %v6527_v17 = vsub.f32 %v7503_v23, %v1630_v37  ;;  %v7506_v32 = vld [vmem:[#allocation16_spill] sm:$0xff] }
 0x28c   : > { %v4402_v53 = vpop.eup %4401  ;;  %v3776_v39 = vpack.c.bf16 %v2666_v15, %v2665_v13  ;;  %v2602_v10 = vmul.f32 %v6390_v29, %v2483_v56  ;;  %v2264_v40 = vadd.f32 1e-05, %v2152_v42  ;;  %2067 = vadd.xlane.f32.xlu1 %v6394_v60  ;;  %2065 = vadd.xlane.f32.xlu0 %v6401_v12  ;;  %v6533_v41 = vsub.f32 %v7504_v49, %v1629_v1  ;;  %v7508_v49 = vld [vmem:[#allocation18_spill] sm:$0xff] }
 0x28d   : > { %v4404_v5 = vpop.eup %4403  ;;  %v2722_v63 = vadd.f32 %v6422_v46, %v2603_v27  ;;  %v2426_v0 = vmul.f32 %v4402_v53, %v7505_v51  ;;  %v2263_v28 = vadd.f32 1e-05, %v2151_v61  ;;  %v1880_v35 = vpop.xlane.xlu1 %1879  ;;  %v1580_v12 = vmul.f32 0.0078125, %v6177_v55  ;;  %v7507_v55 = vld [vmem:[#allocation19_spill] sm:$0xff] }
 0x28e   : > { %v1878_v37 = vpop.xlane.xlu0 %1877  ;;  %4040 = vst [vmem:[%s6467_s8 + $0x18] sm:$0xff] %v3776_v39   ;;  %v2721_v15 = vadd.f32 %v6422_v46, %v2602_v10  ;;  %v2425_v4 = vmul.f32 %v4404_v5, %v7506_v32  ;;  %4413 = vrsqrt.f32 %v2264_v40  ;;  %v2094_v60 = vmul.f32 0.0078125, %v1880_v35  ;;  %v7509_v35 = vld [vmem:[#allocation98_spill] sm:$0xff] }
 0x28f   : > { %v2545_v25 = vmul.f32 %v6390_v29, %v2426_v0  ;;  %4415 = vrsqrt.f32 %v2263_v28  ;;  %v2093_v1 = vmul.f32 0.0078125, %v1878_v37  ;;  %v1579_v52 = vmul.f32 0.0078125, %v6179_v45 }
 0x290   : > { %v4406_v13 = vpop.eup %4405  ;;  %v3916_v56 = vpack.c.bf16 %v2722_v63, %v2721_v15  ;;  %v2544_v42 = vmul.f32 %v6390_v29, %v2425_v4  ;;  %v2206_v27 = vadd.f32 1e-05, %v2094_v60  ;;  %1951 = vadd.xlane.f32.xlu1 %v6405_v2  ;;  %1949 = vadd.xlane.f32.xlu0 %v6413_v18  ;;  %v6550_v5 = vmul.f32 %v6527_v17, %v6527_v17 }
 0x291   : > { %v4408_v61 = vpop.eup %4407  ;;  %v2664_v53 = vadd.f32 %v6422_v46, %v2545_v25  ;;  %v2482_v23 = vmul.f32 %v4406_v13, %v7507_v55  ;;  %v2205_v39 = vadd.f32 1e-05, %v2093_v1  ;;  %v1992_v10 = vpop.xlane.xlu1 %1991  ;;  %v6558_v0 = vmul.f32 %v6533_v41, %v6533_v41  ;;  %v7510_v25 = vld [vmem:[#allocation97_spill] sm:$0xff]  ;;  %v7512_v55 = vld [vmem:[#allocation20_spill] sm:$0xff] }
 0x292   : > { %v1990_v40 = vpop.xlane.xlu0 %1989  ;;  %4068 = vst [vmem:[%s6467_s8 + $0xf8] sm:$0xff] %v3916_v56   ;;  %v2663_v45 = vadd.f32 %v6422_v46, %v2544_v42  ;;  %v2481_v63 = vmul.f32 %v4408_v61, %v7508_v49  ;;  %4417 = vrsqrt.f32 %v2206_v27  ;;  %v2150_v2 = vmul.f32 0.0078125, %v1992_v10  ;;  %v7511_v56 = vld [vmem:[#allocation21_spill] sm:$0xff] }
 0x293   : > { %v2601_v18 = vmul.f32 %v6390_v29, %v2482_v23  ;;  %4419 = vrsqrt.f32 %v2205_v39  ;;  %v2149_v51 = vmul.f32 0.0078125, %v1990_v40  ;;  %v6561_v37 = vsub.f32 %v7509_v35, %v1580_v12 }
 0x294   : > { %v4410_v28 = vpop.eup %4409  ;;  %v3771_v15 = vpack.c.bf16 %v2664_v53, %v2663_v45  ;;  %v2600_v32 = vmul.f32 %v6390_v29, %v2481_v63  ;;  %v2262_v4 = vadd.f32 1e-05, %v2150_v2  ;;  %2063 = vadd.xlane.f32.xlu1 %v6417_v11  ;;  %2061 = vadd.xlane.f32.xlu0 %v6435_v7  ;;  %v6567_v1 = vsub.f32 %v7510_v25, %v1579_v52 }
 0x295   : > { %v4412_v60 = vpop.eup %4411  ;;  %v2720_v13 = vadd.f32 %v6422_v46, %v2601_v18  ;;  %v2432_v42 = vmul.f32 %v4410_v28, %v7511_v56  ;;  %v2261_v27 = vadd.f32 1e-05, %v2149_v51  ;;  %v1892_v61 = vpop.xlane.xlu1 %1891  ;;  %v1636_v7 = vmul.f32 0.0078125, %v6199_v20  ;;  %v7513_v18 = vld [vmem:[#allocation23_spill] sm:$0xff] }
 0x296   : > { %v1890_v12 = vpop.xlane.xlu0 %1889  ;;  %4039 = vst [vmem:[%s6467_s8 + $0x10] sm:$0xff] %v3771_v15   ;;  %v2719_v53 = vadd.f32 %v6422_v46, %v2600_v32  ;;  %v2431_v23 = vmul.f32 %v4412_v60, %v7512_v55  ;;  %4421 = vrsqrt.f32 %v2262_v4  ;;  %v2100_v11 = vmul.f32 0.0078125, %v1892_v61  ;;  %v7514_v4 = vld [vmem:[#allocation22_spill] sm:$0xff] }
 0x297   : > { %v2551_v39 = vmul.f32 %v6390_v29, %v2432_v42  ;;  %4423 = vrsqrt.f32 %v2261_v27  ;;  %v2099_v52 = vmul.f32 0.0078125, %v1890_v12  ;;  %v6577_v40 = vmul.f32 0.0078125, %v6201_v43 }
 0x298   : > { %v4414_v10 = vpop.eup %4413  ;;  %v3911_v45 = vpack.c.bf16 %v2720_v13, %v2719_v53  ;;  %v2550_v49 = vmul.f32 %v6390_v29, %v2431_v23  ;;  %v2212_v63 = vadd.f32 1e-05, %v2100_v11  ;;  %1963 = vadd.xlane.f32.xlu1 %v6446_v19  ;;  %1961 = vadd.xlane.f32.xlu0 %v6453_v50  ;;  %v6586_v43 = vmul.f32 %v6561_v37, %v6561_v37  ;;  %v7515_v11 = vld [vmem:[#allocation25_spill] sm:$0xff] }
 0x299   : > { %v4416_v2 = vpop.eup %4415  ;;  %v2670_v20 = vadd.f32 %v6422_v46, %v2551_v39  ;;  %v2488_v51 = vmul.f32 %v4414_v10, %v7513_v18  ;;  %v2211_v28 = vadd.f32 1e-05, %v2099_v52  ;;  %v2004_v35 = vpop.xlane.xlu1 %2003  ;;  %v6594_v13 = vmul.f32 %v6567_v1, %v6567_v1 }
 0x29a   : > { %v2002_v15 = vpop.xlane.xlu0 %2001  ;;  %4067 = vst [vmem:[%s6467_s8 + $0xf0] sm:$0xff] %v3911_v45   ;;  %v2669_v32 = vadd.f32 %v6422_v46, %v2550_v49  ;;  %v2487_v60 = vmul.f32 %v4416_v2, %v7514_v4  ;;  %4425 = vrsqrt.f32 %v2212_v63  ;;  %v2156_v19 = vmul.f32 0.0078125, %v2004_v35  ;;  %v7516_v49 = vld [vmem:[#allocation24_spill] sm:$0xff] }
 0x29b   : > { %v2607_v50 = vmul.f32 %v6390_v29, %v2488_v51  ;;  %4427 = vrsqrt.f32 %v2211_v28  ;;  %v2155_v25 = vmul.f32 0.0078125, %v2002_v15  ;;  %v1578_v42 = vmul.f32 0.0078125, %v6218_v59  ;;  %v7518_v51 = vld [vmem:[#allocation102_spill] sm:$0xff] }
 0x29c   : > { %v4418_v56 = vpop.eup %4417  ;;  %v3786_v27 = vpack.c.bf16 %v2670_v20, %v2669_v32  ;;  %v2606_v61 = vmul.f32 %v6390_v29, %v2487_v60  ;;  %v2268_v12 = vadd.f32 1e-05, %v2156_v19  ;;  %2075 = vadd.xlane.f32.xlu1 %v6482_v34  ;;  %2073 = vadd.xlane.f32.xlu0 %v6490_v31  ;;  %v1577_v55 = vmul.f32 0.0078125, %v6220_v38  ;;  %v7517_v34 = vld [vmem:[#allocation100_spill] sm:$0xff] }
 0x29d   : > { %v4420_v53 = vpop.eup %4419  ;;  %v2726_v23 = vadd.f32 %v6422_v46, %v2607_v50  ;;  %v2430_v39 = vmul.f32 %v4418_v56, %v7515_v11  ;;  %v2267_v52 = vadd.f32 1e-05, %v2155_v25  ;;  %v1888_v10 = vpop.xlane.xlu1 %1887  ;;  %v6607_v20 = vsub.f32 %v7517_v34, %v1636_v7  ;;  %v7519_v7 = vld [vmem:[#allocation101_spill] sm:$0xff]  ;;  %v7520_v50 = vld [vmem:[#allocation27_spill] sm:$0xff] }
 0x29e   : > { %v1886_v45 = vpop.xlane.xlu0 %1885  ;;  %4042 = vst [vmem:[%s6467_s8 + $0x28] sm:$0xff] %v3786_v27   ;;  %v2725_v59 = vadd.f32 %v6422_v46, %v2606_v61  ;;  %v2429_v63 = vmul.f32 %v4420_v53, %v7516_v49  ;;  %4429 = vrsqrt.f32 %v2268_v12  ;;  %v2098_v2 = vmul.f32 0.0078125, %v1888_v10  ;;  %v7521_v12 = vld [vmem:[#allocation26_spill] sm:$0xff] }
 0x29f   : > { %v2549_v31 = vmul.f32 %v6390_v29, %v2430_v39  ;;  %4431 = vrsqrt.f32 %v2267_v52  ;;  %v2097_v38 = vmul.f32 0.0078125, %v1886_v45  ;;  %v6611_v28 = vsub.f32 %v7518_v51, %v1578_v42 }
 0x2a0   : > { %v4422_v18 = vpop.eup %4421  ;;  %v3926_v35 = vpack.c.bf16 %v2726_v23, %v2725_v59  ;;  %v2548_v15 = vmul.f32 %v6390_v29, %v2429_v63  ;;  %v2210_v32 = vadd.f32 1e-05, %v2098_v2  ;;  %1959 = vadd.xlane.f32.xlu1 %v6516_v21  ;;  %1957 = vadd.xlane.f32.xlu0 %v6524_v3  ;;  %v6617_v60 = vsub.f32 %v7519_v7, %v1577_v55 }
 0x2a1   : > { %v4424_v4 = vpop.eup %4423  ;;  %v2668_v19 = vadd.f32 %v6422_v46, %v2549_v31  ;;  %v2486_v25 = vmul.f32 %v4422_v18, %v7520_v50  ;;  %v2209_v56 = vadd.f32 1e-05, %v2097_v38  ;;  %v2000_v27 = vpop.xlane.xlu1 %1999  ;;  %v1634_v3 = vmul.f32 0.0078125, %v6251_v58  ;;  %v7522_v58 = vld [vmem:[#allocation29_spill] sm:$0xff]  ;;  %v7523_v18 = vld [vmem:[#allocation28_spill] sm:$0xff] }
 0x2a2   : > { %v1998_v42 = vpop.xlane.xlu0 %1997  ;;  %4070 = vst [vmem:[%s6467_s8 + $0x108] sm:$0xff] %v3926_v35   ;;  %v2667_v61 = vadd.f32 %v6422_v46, %v2548_v15  ;;  %v2485_v53 = vmul.f32 %v4424_v4, %v7521_v12  ;;  %4433 = vrsqrt.f32 %v2210_v32  ;;  %v2154_v21 = vmul.f32 0.0078125, %v2000_v27  ;;  %v7524_v4 = vld [vmem:[#allocation105_spill] sm:$0xff]  ;;  %v7525_v27 = vld [vmem:[#allocation103_spill] sm:$0xff] }
 0x2a3   : > { %v2605_v23 = vmul.f32 %v6390_v29, %v2486_v25  ;;  %4435 = vrsqrt.f32 %v2209_v56  ;;  %v2153_v55 = vmul.f32 0.0078125, %v1998_v42  ;;  %v1633_v39 = vmul.f32 0.0078125, %v6253_v16  ;;  %v7526_v12 = vld [vmem:[#allocation31_spill] sm:$0xff] }
 0x2a4   : > { %v4426_v11 = vpop.eup %4425  ;;  %v3781_v52 = vpack.c.bf16 %v2668_v19, %v2667_v61  ;;  %v2604_v10 = vmul.f32 %v6390_v29, %v2485_v53  ;;  %v2266_v45 = vadd.f32 1e-05, %v2154_v21  ;;  %2071 = vadd.xlane.f32.xlu1 %v6550_v5  ;;  %2069 = vadd.xlane.f32.xlu0 %v6558_v0  ;;  %v1802_v38 = vmul.f32 %v6611_v28, %v6611_v28 }
 0x2a5   : > { %v4428_v59 = vpop.eup %4427  ;;  %v2724_v49 = vadd.f32 %v6422_v46, %v2605_v23  ;;  %v2436_v63 = vmul.f32 %v4426_v11, %v7522_v58  ;;  %v2265_v2 = vadd.f32 1e-05, %v2153_v55  ;;  %v1900_v34 = vpop.xlane.xlu1 %1899  ;;  %v1801_v15 = vmul.f32 %v6617_v60, %v6617_v60  ;;  %v7527_v11 = vld [vmem:[#allocation30_spill] sm:$0xff] }
 0x2a6   : > { %v1898_v31 = vpop.xlane.xlu0 %1897  ;;  %4041 = vst [vmem:[%s6467_s8 + $0x20] sm:$0xff] %v3781_v52   ;;  %v2723_v16 = vadd.f32 %v6422_v46, %v2604_v10  ;;  %v2435_v51 = vmul.f32 %v4428_v59, %v7523_v18  ;;  %4437 = vrsqrt.f32 %v2266_v45  ;;  %v2104_v5 = vmul.f32 0.0078125, %v1900_v34 }
 0x2a7   : > { %v2555_v0 = vmul.f32 %v6390_v29, %v2436_v63  ;;  %4439 = vrsqrt.f32 %v2265_v2  ;;  %v2103_v35 = vmul.f32 0.0078125, %v1898_v31  ;;  %v6641_v7 = vsub.f32 %v7524_v4, %v1634_v3 }
 0x2a8   : > { %v4430_v32 = vpop.eup %4429  ;;  %v3921_v19 = vpack.c.bf16 %v2724_v49, %v2723_v16  ;;  %v2554_v50 = vmul.f32 %v6390_v29, %v2435_v51  ;;  %v2216_v25 = vadd.f32 1e-05, %v2104_v5  ;;  %1971 = vadd.xlane.f32.xlu1 %v6586_v43  ;;  %1969 = vadd.xlane.f32.xlu0 %v6594_v13  ;;  %v6647_v42 = vsub.f32 %v7525_v27, %v1633_v39  ;;  %v7528_v13 = vld [vmem:[#allocation99_spill] sm:$0xff] }
 0x2a9   : > { %v4432_v56 = vpop.eup %4431  ;;  %v2674_v61 = vadd.f32 %v6422_v46, %v2555_v0  ;;  %v2492_v53 = vmul.f32 %v4430_v32, %v7526_v12  ;;  %v2215_v21 = vadd.f32 1e-05, %v2103_v35  ;;  %v2012_v23 = vpop.xlane.xlu1 %2011  ;;  %v6656_v10 = vsub.f32 %v7528_v13, %v6577_v40  ;;  %v7529_v40 = vld [vmem:[#allocation33_spill] sm:$0xff]  ;;  %v7530_v32 = vld [vmem:[#allocation32_spill] sm:$0xff]  ;;  %v7532_v13 = vld [vmem:[#allocation34_spill] sm:$0xff] }
 0x2aa   : > { %v2010_v3 = vpop.xlane.xlu0 %2009  ;;  %4069 = vst [vmem:[%s6467_s8 + $0x100] sm:$0xff] %v3921_v19   ;;  %v2673_v55 = vadd.f32 %v6422_v46, %v2554_v50  ;;  %v2491_v52 = vmul.f32 %v4432_v56, %v7527_v11  ;;  %4441 = vrsqrt.f32 %v2216_v25  ;;  %v2160_v43 = vmul.f32 0.0078125, %v2012_v23 }
 0x2ab   : > { %v2611_v39 = vmul.f32 %v6390_v29, %v2492_v53  ;;  %4443 = vrsqrt.f32 %v2215_v21  ;;  %v2159_v45 = vmul.f32 0.0078125, %v2010_v3  ;;  %v1858_v2 = vmul.f32 %v6641_v7, %v6641_v7  ;;  %v7531_v21 = vld [vmem:[#allocation35_spill] sm:$0xff] }
 0x2ac   : > { %v4434_v59 = vpop.eup %4433  ;;  %v3796_v49 = vpack.c.bf16 %v2674_v61, %v2673_v55  ;;  %v2610_v58 = vmul.f32 %v6390_v29, %v2491_v52  ;;  %v2272_v63 = vadd.f32 1e-05, %v2160_v43  ;;  %1967 = vadd.xlane.f32.xlu1 %v1802_v38  ;;  %1965 = vadd.xlane.f32.xlu0 %v1801_v15  ;;  %v1857_v0 = vmul.f32 %v6647_v42, %v6647_v42 }
 0x2ad   : > { %v4436_v34 = vpop.eup %4435  ;;  %v2730_v31 = vadd.f32 %v6422_v46, %v2611_v39  ;;  %v2434_v16 = vmul.f32 %v4434_v59, %v7529_v40  ;;  %v2271_v18 = vadd.f32 1e-05, %v2159_v45  ;;  %v1896_v51 = vpop.xlane.xlu1 %1895  ;;  %v1860_v61 = vmul.f32 %v6607_v20, %v6607_v20 }
 0x2ae   : > { %v1894_v5 = vpop.xlane.xlu0 %1893  ;;  %4044 = vst [vmem:[%s6467_s8 + $0x38] sm:$0xff] %v3796_v49   ;;  %v2729_v35 = vadd.f32 %v6422_v46, %v2610_v58  ;;  %v2433_v38 = vmul.f32 %v4436_v34, %v7530_v32  ;;  %4445 = vrsqrt.f32 %v2272_v63  ;;  %v2102_v15 = vmul.f32 0.0078125, %v1896_v51  ;;  %v7534_v32 = vld [vmem:[#allocation36_spill] sm:$0xff] }
 0x2af   : > { %v2553_v4 = vmul.f32 %v6390_v29, %v2434_v16  ;;  %4447 = vrsqrt.f32 %v2271_v18  ;;  %v2101_v19 = vmul.f32 0.0078125, %v1894_v5  ;;  %v1859_v52 = vmul.f32 %v6656_v10, %v6656_v10  ;;  %v7533_v16 = vld [vmem:[#allocation37_spill] sm:$0xff] }
 0x2b0   : > { %v4438_v50 = vpop.eup %4437  ;;  %v3936_v25 = vpack.c.bf16 %v2730_v31, %v2729_v35  ;;  %v2552_v56 = vmul.f32 %v6390_v29, %v2433_v38  ;;  %v2214_v27 = vadd.f32 1e-05, %v2102_v15  ;;  %2079 = vadd.xlane.f32.xlu1 %v1858_v2  ;;  %2077 = vadd.xlane.f32.xlu0 %v1857_v0 }
 0x2b1   : > { %v4440_v12 = vpop.eup %4439  ;;  %v2672_v53 = vadd.f32 %v6422_v46, %v2553_v4  ;;  %v2490_v23 = vmul.f32 %v4438_v50, %v7531_v21  ;;  %v2213_v3 = vadd.f32 1e-05, %v2101_v19  ;;  %v2008_v55 = vpop.xlane.xlu1 %2007 }
 0x2b2   : > { %v2006_v11 = vpop.xlane.xlu0 %2005  ;;  %4072 = vst [vmem:[%s6467_s8 + $0x118] sm:$0xff] %v3936_v25   ;;  %v2671_v43 = vadd.f32 %v6422_v46, %v2552_v56  ;;  %v2489_v39 = vmul.f32 %v4440_v12, %v7532_v13  ;;  %4449 = vrsqrt.f32 %v2214_v27  ;;  %v2158_v45 = vmul.f32 0.0078125, %v2008_v55 }
 0x2b3   : > { %v2609_v59 = vmul.f32 %v6390_v29, %v2490_v23  ;;  %4451 = vrsqrt.f32 %v2213_v3  ;;  %v2157_v49 = vmul.f32 0.0078125, %v2006_v11 }
 0x2b4   : > { %v4442_v58 = vpop.eup %4441  ;;  %v3791_v63 = vpack.c.bf16 %v2672_v53, %v2671_v43  ;;  %v2608_v2 = vmul.f32 %v6390_v29, %v2489_v39  ;;  %v2270_v34 = vadd.f32 1e-05, %v2158_v45  ;;  %2083 = vadd.xlane.f32.xlu1 %v1860_v61  ;;  %2081 = vadd.xlane.f32.xlu0 %v1859_v52  ;;  %v7535_v53 = vld [vmem:[#allocation39_spill] sm:$0xff]  ;;  %v7536_v52 = vld [vmem:[#allocation38_spill] sm:$0xff] }
 0x2b5   : > { %v4444_v31 = vpop.eup %4443  ;;  %v2728_v40 = vadd.f32 %v6422_v46, %v2609_v59  ;;  %v2440_v18 = vmul.f32 %v4442_v58, %v7533_v16  ;;  %v2269_v51 = vadd.f32 1e-05, %v2157_v49  ;;  %v1908_v5 = vpop.xlane.xlu1 %1907 }
 0x2b6   : > { %v1906_v0 = vpop.xlane.xlu0 %1905  ;;  %4043 = vst [vmem:[%s6467_s8 + $0x30] sm:$0xff] %v3791_v63   ;;  %v2727_v35 = vadd.f32 %v6422_v46, %v2608_v2  ;;  %v2439_v38 = vmul.f32 %v4444_v31, %v7534_v32  ;;  %4453 = vrsqrt.f32 %v2270_v34  ;;  %v2108_v15 = vmul.f32 0.0078125, %v1908_v5  ;;  %v7537_v31 = vld [vmem:[#allocation41_spill] sm:$0xff] }
 0x2b7   : > { %v2559_v4 = vmul.f32 %v6390_v29, %v2440_v18  ;;  %4455 = vrsqrt.f32 %v2269_v51  ;;  %v2107_v19 = vmul.f32 0.0078125, %v1906_v0  ;;  %v7538_v0 = vld [vmem:[#allocation40_spill] sm:$0xff] }
 0x2b8   : > { %v4446_v50 = vpop.eup %4445  ;;  %v3931_v25 = vpack.c.bf16 %v2728_v40, %v2727_v35  ;;  %v2558_v56 = vmul.f32 %v6390_v29, %v2439_v38  ;;  %v2220_v27 = vadd.f32 1e-05, %v2108_v15 }
 0x2b9   : > { %v4448_v61 = vpop.eup %4447  ;;  %v2678_v12 = vadd.f32 %v6422_v46, %v2559_v4  ;;  %v2496_v21 = vmul.f32 %v4446_v50, %v7535_v53  ;;  %v2219_v23 = vadd.f32 1e-05, %v2107_v19  ;;  %v2020_v3 = vpop.xlane.xlu1 %2019 }
 0x2ba   : > { %v2018_v55 = vpop.xlane.xlu0 %2017  ;;  %4071 = vst [vmem:[%s6467_s8 + $0x110] sm:$0xff] %v3931_v25   ;;  %v2677_v11 = vadd.f32 %v6422_v46, %v2558_v56  ;;  %v2495_v43 = vmul.f32 %v4448_v61, %v7536_v52  ;;  %4457 = vrsqrt.f32 %v2220_v27  ;;  %v2164_v13 = vmul.f32 0.0078125, %v2020_v3  ;;  %v7539_v61 = vld [vmem:[#allocation43_spill] sm:$0xff] }
 0x2bb   : > { %v2615_v39 = vmul.f32 %v6390_v29, %v2496_v21  ;;  %4459 = vrsqrt.f32 %v2219_v23  ;;  %v2163_v45 = vmul.f32 0.0078125, %v2018_v55  ;;  %v7540_v55 = vld [vmem:[#allocation42_spill] sm:$0xff] }
 0x2bc   : > { %v4450_v59 = vpop.eup %4449  ;;  %v3806_v49 = vpack.c.bf16 %v2678_v12, %v2677_v11  ;;  %v2614_v58 = vmul.f32 %v6390_v29, %v2495_v43  ;;  %v2276_v63 = vadd.f32 1e-05, %v2164_v13 }
 0x2bd   : > { %v4452_v2 = vpop.eup %4451  ;;  %v2734_v34 = vadd.f32 %v6422_v46, %v2615_v39  ;;  %v2438_v40 = vmul.f32 %v4450_v59, %v7537_v31  ;;  %v2275_v16 = vadd.f32 1e-05, %v2163_v45  ;;  %v1904_v18 = vpop.xlane.xlu1 %1903 }
 0x2be   : > { %v1902_v51 = vpop.xlane.xlu0 %1901  ;;  %4046 = vst [vmem:[%s6467_s8 + $0x48] sm:$0xff] %v3806_v49   ;;  %v2733_v5 = vadd.f32 %v6422_v46, %v2614_v58  ;;  %v2437_v35 = vmul.f32 %v4452_v2, %v7538_v0  ;;  %4461 = vrsqrt.f32 %v2276_v63  ;;  %v2106_v32 = vmul.f32 0.0078125, %v1904_v18  ;;  %v7541_v2 = vld [vmem:[#allocation45_spill] sm:$0xff] }
 0x2bf   : > { %v2557_v38 = vmul.f32 %v6390_v29, %v2438_v40  ;;  %4463 = vrsqrt.f32 %v2275_v16  ;;  %v2105_v15 = vmul.f32 0.0078125, %v1902_v51  ;;  %v7542_v51 = vld [vmem:[#allocation44_spill] sm:$0xff] }
 0x2c0   : > { %v4454_v4 = vpop.eup %4453  ;;  %v3946_v19 = vpack.c.bf16 %v2734_v34, %v2733_v5  ;;  %v2556_v50 = vmul.f32 %v6390_v29, %v2437_v35  ;;  %v2218_v25 = vadd.f32 1e-05, %v2106_v32 }
 0x2c1   : > { %v4456_v56 = vpop.eup %4455  ;;  %v2676_v27 = vadd.f32 %v6422_v46, %v2557_v38  ;;  %v2494_v12 = vmul.f32 %v4454_v4, %v7539_v61  ;;  %v2217_v53 = vadd.f32 1e-05, %v2105_v15  ;;  %v2016_v21 = vpop.xlane.xlu1 %2015 }
 0x2c2   : > { %v2014_v23 = vpop.xlane.xlu0 %2013  ;;  %4074 = vst [vmem:[%s6467_s8 + $0x128] sm:$0xff] %v3946_v19   ;;  %v2675_v3 = vadd.f32 %v6422_v46, %v2556_v50  ;;  %v2493_v11 = vmul.f32 %v4456_v56, %v7540_v55  ;;  %4465 = vrsqrt.f32 %v2218_v25  ;;  %v2162_v52 = vmul.f32 0.0078125, %v2016_v21  ;;  %v7543_v56 = vld [vmem:[#allocation47_spill] sm:$0xff] }
 0x2c3   : > { %v2613_v43 = vmul.f32 %v6390_v29, %v2494_v12  ;;  %4467 = vrsqrt.f32 %v2217_v53  ;;  %v2161_v13 = vmul.f32 0.0078125, %v2014_v23  ;;  %v7544_v23 = vld [vmem:[#allocation46_spill] sm:$0xff] }
 0x2c4   : > { %v4458_v39 = vpop.eup %4457  ;;  %v3801_v45 = vpack.c.bf16 %v2676_v27, %v2675_v3  ;;  %v2612_v59 = vmul.f32 %v6390_v29, %v2493_v11  ;;  %v2274_v49 = vadd.f32 1e-05, %v2162_v52 }
 0x2c5   : > { %v4460_v58 = vpop.eup %4459  ;;  %v2732_v63 = vadd.f32 %v6422_v46, %v2613_v43  ;;  %v2444_v34 = vmul.f32 %v4458_v39, %v7541_v2  ;;  %v2273_v31 = vadd.f32 1e-05, %v2161_v13  ;;  %v1916_v40 = vpop.xlane.xlu1 %1915 }
 0x2c6   : > { %v1914_v16 = vpop.xlane.xlu0 %1913  ;;  %4045 = vst [vmem:[%s6467_s8 + $0x40] sm:$0xff] %v3801_v45   ;;  %v2731_v18 = vadd.f32 %v6422_v46, %v2612_v59  ;;  %v2443_v5 = vmul.f32 %v4460_v58, %v7542_v51  ;;  %4469 = vrsqrt.f32 %v2274_v49  ;;  %v2112_v0 = vmul.f32 0.0078125, %v1916_v40  ;;  %v7545_v58 = vld [vmem:[#allocation49_spill] sm:$0xff] }
 0x2c7   : > { %v2563_v35 = vmul.f32 %v6390_v29, %v2444_v34  ;;  %4471 = vrsqrt.f32 %v2273_v31  ;;  %v2111_v32 = vmul.f32 0.0078125, %v1914_v16  ;;  %v7546_v16 = vld [vmem:[#allocation48_spill] sm:$0xff] }
 0x2c8   : > { %v4462_v38 = vpop.eup %4461  ;;  %v3941_v15 = vpack.c.bf16 %v2732_v63, %v2731_v18  ;;  %v2562_v4 = vmul.f32 %v6390_v29, %v2443_v5  ;;  %v2224_v19 = vadd.f32 1e-05, %v2112_v0 }
 0x2c9   : > { %v4464_v50 = vpop.eup %4463  ;;  %v2682_v25 = vadd.f32 %v6422_v46, %v2563_v35  ;;  %v2500_v27 = vmul.f32 %v4462_v38, %v7543_v56  ;;  %v2223_v61 = vadd.f32 1e-05, %v2111_v32  ;;  %v2028_v12 = vpop.xlane.xlu1 %2027 }
 0x2ca   : > { %v2026_v53 = vpop.xlane.xlu0 %2025  ;;  %4073 = vst [vmem:[%s6467_s8 + $0x120] sm:$0xff] %v3941_v15   ;;  %v2681_v21 = vadd.f32 %v6422_v46, %v2562_v4  ;;  %v2499_v3 = vmul.f32 %v4464_v50, %v7544_v23  ;;  %4473 = vrsqrt.f32 %v2224_v19  ;;  %v2168_v55 = vmul.f32 0.0078125, %v2028_v12  ;;  %v7547_v50 = vld [vmem:[#allocation51_spill] sm:$0xff] }
 0x2cb   : > { %v2619_v11 = vmul.f32 %v6390_v29, %v2500_v27  ;;  %4475 = vrsqrt.f32 %v2223_v61  ;;  %v2167_v52 = vmul.f32 0.0078125, %v2026_v53  ;;  %v7548_v53 = vld [vmem:[#allocation50_spill] sm:$0xff] }
 0x2cc   : > { %v4466_v43 = vpop.eup %4465  ;;  %v3816_v13 = vpack.c.bf16 %v2682_v25, %v2681_v21  ;;  %v2618_v39 = vmul.f32 %v6390_v29, %v2499_v3  ;;  %v2280_v45 = vadd.f32 1e-05, %v2168_v55 }
 0x2cd   : > { %v4468_v59 = vpop.eup %4467  ;;  %v2738_v49 = vadd.f32 %v6422_v46, %v2619_v11  ;;  %v2442_v63 = vmul.f32 %v4466_v43, %v7545_v58  ;;  %v2279_v2 = vadd.f32 1e-05, %v2167_v52  ;;  %v1912_v34 = vpop.xlane.xlu1 %1911 }
 0x2ce   : > { %v1910_v31 = vpop.xlane.xlu0 %1909  ;;  %4048 = vst [vmem:[%s6467_s8 + $0x58] sm:$0xff] %v3816_v13   ;;  %v2737_v40 = vadd.f32 %v6422_v46, %v2618_v39  ;;  %v2441_v18 = vmul.f32 %v4468_v59, %v7546_v16  ;;  %4477 = vrsqrt.f32 %v2280_v45  ;;  %v2110_v51 = vmul.f32 0.0078125, %v1912_v34  ;;  %v7549_v59 = vld [vmem:[#allocation53_spill] sm:$0xff] }
 0x2cf   : > { %v2561_v5 = vmul.f32 %v6390_v29, %v2442_v63  ;;  %4479 = vrsqrt.f32 %v2279_v2  ;;  %v2109_v0 = vmul.f32 0.0078125, %v1910_v31  ;;  %v7550_v31 = vld [vmem:[#allocation52_spill] sm:$0xff] }
 0x2d0   : > { %v4470_v35 = vpop.eup %4469  ;;  %v3956_v32 = vpack.c.bf16 %v2738_v49, %v2737_v40  ;;  %v2560_v38 = vmul.f32 %v6390_v29, %v2441_v18  ;;  %v2222_v15 = vadd.f32 1e-05, %v2110_v51  ;;  %v6739_v29 = vld [vmem:[%s7024_s3] ss:$0 sm:$0xff] }
 0x2d1   : > { %v4472_v4 = vpop.eup %4471  ;;  %v2680_v19 = vadd.f32 %v6422_v46, %v2561_v5  ;;  %v2498_v25 = vmul.f32 %v4470_v35, %v7547_v50  ;;  %v2221_v56 = vadd.f32 1e-05, %v2109_v0  ;;  %v2024_v27 = vpop.xlane.xlu1 %2023 }
 0x2d2   : > { %v2022_v61 = vpop.xlane.xlu0 %2021  ;;  %4076 = vst [vmem:[%s6467_s8 + $0x138] sm:$0xff] %v3956_v32   ;;  %v2679_v12 = vadd.f32 %v6422_v46, %v2560_v38  ;;  %v2497_v21 = vmul.f32 %v4472_v4, %v7548_v53  ;;  %4481 = vrsqrt.f32 %v2222_v15  ;;  %v2166_v23 = vmul.f32 0.0078125, %v2024_v27  ;;  %v6753_v15 = vld [vmem:[%s7025_s4] ss:$0 sm:$0xff]  ;;  %v7551_v4 = vld [vmem:[#allocation55_spill] sm:$0xff] }
 0x2d3   : > { %v2617_v3 = vmul.f32 %v6739_v29, %v2498_v25  ;;  %4483 = vrsqrt.f32 %v2221_v56  ;;  %v2165_v55 = vmul.f32 0.0078125, %v2022_v61 }
 0x2d4   : > { %v4474_v11 = vpop.eup %4473  ;;  %v3811_v52 = vpack.c.bf16 %v2680_v19, %v2679_v12  ;;  %v2616_v43 = vmul.f32 %v6739_v29, %v2497_v21  ;;  %v2278_v13 = vadd.f32 1e-05, %v2166_v23 }
 0x2d5   : > { %v4476_v39 = vpop.eup %4475  ;;  %v2736_v45 = vadd.f32 %v6422_v46, %v2617_v3  ;;  %v2448_v49 = vmul.f32 %v4474_v11, %v7549_v59  ;;  %v2277_v58 = vadd.f32 1e-05, %v2165_v55  ;;  %v1924_v63 = vpop.xlane.xlu1 %1923 }
 0x2d6   : > { %v1922_v2 = vpop.xlane.xlu0 %1921  ;;  %4047 = vst [vmem:[%s6467_s8 + $0x50] sm:$0xff] %v3811_v52   ;;  %v2735_v34 = vadd.f32 %v6422_v46, %v2616_v43  ;;  %v2447_v40 = vmul.f32 %v4476_v39, %v7550_v31  ;;  %4485 = vrsqrt.f32 %v2278_v13  ;;  %v2116_v16 = vmul.f32 0.0078125, %v1924_v63 }
 0x2d7   : > { %v2567_v18 = vmul.f32 %v6739_v29, %v2448_v49  ;;  %4487 = vrsqrt.f32 %v2277_v58  ;;  %v2115_v51 = vmul.f32 0.0078125, %v1922_v2 }
 0x2d8   : > { %v4478_v5 = vpop.eup %4477  ;;  %v3951_v0 = vpack.c.bf16 %v2736_v45, %v2735_v34  ;;  %v2566_v35 = vmul.f32 %v6739_v29, %v2447_v40  ;;  %v2228_v32 = vadd.f32 1e-05, %v2116_v16 }
 0x2d9   : > { %v4480_v38 = vpop.eup %4479  ;;  %v2686_v46 = vadd.f32 %v6753_v15, %v2567_v18  ;;  %v2504_v19 = vmul.f32 %v4478_v5, %v7551_v4  ;;  %v2227_v50 = vadd.f32 1e-05, %v2115_v51  ;;  %v2036_v25 = vpop.xlane.xlu1 %2035 }
 0x2da   : > { %v2034_v56 = vpop.xlane.xlu0 %2033  ;;  %4075 = vst [vmem:[%s6467_s8 + $0x130] sm:$0xff] %v3951_v0   ;;  %v2685_v27 = vadd.f32 %v6753_v15, %v2566_v35  ;;  %v2503_v61 = vmul.f32 %v4480_v38, %v6051_v14  ;;  %4489 = vrsqrt.f32 %v2228_v32  ;;  %v2172_v12 = vmul.f32 0.0078125, %v2036_v25 }
 0x2db   : > { %v2623_v53 = vmul.f32 %v6739_v29, %v2504_v19  ;;  %4491 = vrsqrt.f32 %v2227_v50  ;;  %v2171_v21 = vmul.f32 0.0078125, %v2034_v56 }
 0x2dc   : > { %v4482_v23 = vpop.eup %4481  ;;  %v3826_v3 = vpack.c.bf16 %v2686_v46, %v2685_v27  ;;  %v2622_v55 = vmul.f32 %v6739_v29, %v2503_v61  ;;  %v2284_v11 = vadd.f32 1e-05, %v2172_v12 }
 0x2dd   : > { %v4484_v52 = vpop.eup %4483  ;;  %v2742_v43 = vadd.f32 %v6753_v15, %v2623_v53  ;;  %v2446_v13 = vmul.f32 %v4482_v23, %v6072_v8  ;;  %v2283_v39 = vadd.f32 1e-05, %v2171_v21  ;;  %v1920_v45 = vpop.xlane.xlu1 %1919 }
 0x2de   : > { %v1918_v14 = vpop.xlane.xlu0 %1917  ;;  %4050 = vst [vmem:[%s6467_s8 + $0x68] sm:$0xff] %v3826_v3   ;;  %v2741_v59 = vadd.f32 %v6753_v15, %v2622_v55  ;;  %v2445_v49 = vmul.f32 %v4484_v52, %v6075_v9  ;;  %4493 = vrsqrt.f32 %v2284_v11  ;;  %v2114_v58 = vmul.f32 0.0078125, %v1920_v45 }
 0x2df   : > { %v2565_v63 = vmul.f32 %v6739_v29, %v2446_v13  ;;  %4495 = vrsqrt.f32 %v2283_v39  ;;  %v2113_v2 = vmul.f32 0.0078125, %v1918_v14 }
 0x2e0   : > { %v4486_v34 = vpop.eup %4485  ;;  %v3966_v31 = vpack.c.bf16 %v2742_v43, %v2741_v59  ;;  %v2564_v40 = vmul.f32 %v6739_v29, %v2445_v49  ;;  %v2226_v8 = vadd.f32 1e-05, %v2114_v58 }
 0x2e1   : > { %v4488_v16 = vpop.eup %4487  ;;  %v2684_v18 = vadd.f32 %v6753_v15, %v2565_v63  ;;  %v2502_v51 = vmul.f32 %v4486_v34, %v6086_v62  ;;  %v2225_v5 = vadd.f32 1e-05, %v2113_v2  ;;  %v2032_v0 = vpop.xlane.xlu1 %2031 }
 0x2e2   : > { %v2030_v9 = vpop.xlane.xlu0 %2029  ;;  %4078 = vst [vmem:[%s6467_s8 + $0x148] sm:$0xff] %v3966_v31   ;;  %v2683_v35 = vadd.f32 %v6753_v15, %v2564_v40  ;;  %v2501_v32 = vmul.f32 %v4488_v16, %v6089_v36  ;;  %4497 = vrsqrt.f32 %v2226_v8  ;;  %v2170_v38 = vmul.f32 0.0078125, %v2032_v0 }
 0x2e3   : > { %v2621_v46 = vmul.f32 %v6739_v29, %v2502_v51  ;;  %4499 = vrsqrt.f32 %v2225_v5  ;;  %v2169_v4 = vmul.f32 0.0078125, %v2030_v9  ;;  %v7552_v5 = vld [vmem:[#allocation54_spill] sm:$0xff] }
 0x2e4   : > { %v4490_v19 = vpop.eup %4489  ;;  %v3821_v50 = vpack.c.bf16 %v2684_v18, %v2683_v35  ;;  %v2620_v25 = vmul.f32 %v6739_v29, %v2501_v32  ;;  %v2282_v62 = vadd.f32 1e-05, %v2170_v38  ;;  %v7553_v38 = vld [vmem:[#allocation57_spill] sm:$0xff] }
 0x2e5   : > { %v4492_v56 = vpop.eup %4491  ;;  %v2740_v27 = vadd.f32 %v6753_v15, %v2621_v46  ;;  %v2452_v61 = vmul.f32 %v4490_v19, %v6096_v54  ;;  %v2281_v12 = vadd.f32 1e-05, %v2169_v4  ;;  %v1932_v53 = vpop.xlane.xlu1 %1931 }
 0x2e6   : > { %v1930_v36 = vpop.xlane.xlu0 %1929  ;;  %4049 = vst [vmem:[%s6467_s8 + $0x60] sm:$0xff] %v3821_v50   ;;  %v2739_v21 = vadd.f32 %v6753_v15, %v2620_v25  ;;  %v2451_v23 = vmul.f32 %v4492_v56, %v6099_v47  ;;  %4501 = vrsqrt.f32 %v2282_v62  ;;  %v2120_v3 = vmul.f32 0.0078125, %v1932_v53  ;;  %v7554_v53 = vld [vmem:[#allocation56_spill] sm:$0xff] }
 0x2e7   : > { %v2571_v55 = vmul.f32 %v6739_v29, %v2452_v61  ;;  %4503 = vrsqrt.f32 %v2281_v12  ;;  %v2119_v11 = vmul.f32 0.0078125, %v1930_v36 }
 0x2e8   : > { %v4494_v52 = vpop.eup %4493  ;;  %v3961_v43 = vpack.c.bf16 %v2740_v27, %v2739_v21  ;;  %v2570_v13 = vmul.f32 %v6739_v29, %v2451_v23  ;;  %v2232_v54 = vadd.f32 1e-05, %v2120_v3 }
 0x2e9   : > { %v4496_v39 = vpop.eup %4495  ;;  %v2690_v45 = vadd.f32 %v6753_v15, %v2571_v55  ;;  %v2508_v14 = vmul.f32 %v4494_v52, %v6120_v26  ;;  %v2231_v59 = vadd.f32 1e-05, %v2119_v11  ;;  %v2044_v49 = vpop.xlane.xlu1 %2043  ;;  %v7555_v11 = vld [vmem:[#allocation106_spill] sm:$0xff] }
 0x2ea   : > { %v2042_v47 = vpop.xlane.xlu0 %2041  ;;  %4077 = vst [vmem:[%s6467_s8 + $0x140] sm:$0xff] %v3961_v43   ;;  %v2689_v58 = vadd.f32 %v6753_v15, %v2570_v13  ;;  %v2507_v63 = vmul.f32 %v4496_v39, %v6123_v6  ;;  %4505 = vrsqrt.f32 %v2232_v54  ;;  %v2176_v2 = vmul.f32 0.0078125, %v2044_v49 }
 0x2eb   : > { %v2627_v34 = vmul.f32 %v6739_v29, %v2508_v14  ;;  %4507 = vrsqrt.f32 %v2231_v59  ;;  %v2175_v31 = vmul.f32 0.0078125, %v2042_v47 }
 0x2ec   : > { %v4498_v40 = vpop.eup %4497  ;;  %v3836_v8 = vpack.c.bf16 %v2690_v45, %v2689_v58  ;;  %v2626_v16 = vmul.f32 %v6739_v29, %v2507_v63  ;;  %v2288_v26 = vadd.f32 1e-05, %v2176_v2  ;;  %v7556_v58 = vld [vmem:[#allocation107_spill] sm:$0xff] }
 0x2ed   : > { %v4500_v18 = vpop.eup %4499  ;;  %v2746_v51 = vadd.f32 %v6753_v15, %v2627_v34  ;;  %v2450_v0 = vmul.f32 %v4498_v40, %v7552_v5  ;;  %v2287_v9 = vadd.f32 1e-05, %v2175_v31  ;;  %v1928_v35 = vpop.xlane.xlu1 %1927 }
 0x2ee   : > { %v1926_v6 = vpop.xlane.xlu0 %1925  ;;  %4052 = vst [vmem:[%s6467_s8 + $0x78] sm:$0xff] %v3836_v8   ;;  %v2745_v32 = vadd.f32 %v6753_v15, %v2626_v16  ;;  %v2449_v46 = vmul.f32 %v4500_v18, %v7553_v38  ;;  %4509 = vrsqrt.f32 %v2288_v26  ;;  %v2118_v4 = vmul.f32 0.0078125, %v1928_v35  ;;  %v7557_v8 = vld [vmem:[#allocation58_spill] sm:$0xff]  ;;  %v7558_v38 = vld [vmem:[#allocation60_spill] sm:$0xff] }
 0x2ef   : > { %v2569_v19 = vmul.f32 %v6739_v29, %v2450_v0  ;;  %4511 = vrsqrt.f32 %v2287_v9  ;;  %v2117_v50 = vmul.f32 0.0078125, %v1926_v6 }
 0x2f0   : > { %v4502_v25 = vpop.eup %4501  ;;  %v3976_v62 = vpack.c.bf16 %v2746_v51, %v2745_v32  ;;  %v2568_v56 = vmul.f32 %v6739_v29, %v2449_v46  ;;  %v2230_v27 = vadd.f32 1e-05, %v2118_v4 }
 0x2f1   : > { %v4504_v61 = vpop.eup %4503  ;;  %v2688_v12 = vadd.f32 %v6753_v15, %v2569_v19  ;;  %v2506_v36 = vmul.f32 %v4502_v25, %v7554_v53  ;;  %v2229_v21 = vadd.f32 1e-05, %v2117_v50  ;;  %v2040_v23 = vpop.xlane.xlu1 %2039 }
 0x2f2   : > { %v2038_v3 = vpop.xlane.xlu0 %2037  ;;  %4080 = vst [vmem:[%s6467_s8 + $0x158] sm:$0xff] %v3976_v62   ;;  %v2687_v55 = vadd.f32 %v6753_v15, %v2568_v56  ;;  %v2505_v52 = vmul.f32 %v4504_v61, %v7555_v11  ;;  %4513 = vrsqrt.f32 %v2230_v27  ;;  %v2174_v43 = vmul.f32 0.0078125, %v2040_v23  ;;  %v7559_v62 = vld [vmem:[#allocation59_spill] sm:$0xff]  ;;  %v7560_v11 = vld [vmem:[#allocation62_spill] sm:$0xff] }
 0x2f3   : > { %v2625_v13 = vmul.f32 %v6739_v29, %v2506_v36  ;;  %4515 = vrsqrt.f32 %v2229_v21  ;;  %v2173_v54 = vmul.f32 0.0078125, %v2038_v3 }
 0x2f4   : > { %v4506_v39 = vpop.eup %4505  ;;  %v3831_v45 = vpack.c.bf16 %v2688_v12, %v2687_v55  ;;  %v2624_v14 = vmul.f32 %v6739_v29, %v2505_v52  ;;  %v2286_v59 = vadd.f32 1e-05, %v2174_v43 }
 0x2f5   : > { %v4508_v49 = vpop.eup %4507  ;;  %v2744_v47 = vadd.f32 %v6753_v15, %v2625_v13  ;;  %v2456_v63 = vmul.f32 %v4506_v39, %v7556_v58  ;;  %v2285_v2 = vadd.f32 1e-05, %v2173_v54  ;;  %v1940_v34 = vpop.xlane.xlu1 %1939 }
 0x2f6   : > { %v1938_v31 = vpop.xlane.xlu0 %1937  ;;  %4051 = vst [vmem:[%s6467_s8 + $0x70] sm:$0xff] %v3831_v45   ;;  %v2743_v40 = vadd.f32 %v6753_v15, %v2624_v14  ;;  %v2455_v16 = vmul.f32 %v4508_v49, %v7557_v8  ;;  %4517 = vrsqrt.f32 %v2286_v59  ;;  %v2124_v26 = vmul.f32 0.0078125, %v1940_v34 }
 0x2f7   : > { %v2575_v18 = vmul.f32 %v6739_v29, %v2456_v63  ;;  %4519 = vrsqrt.f32 %v2285_v2  ;;  %v2123_v51 = vmul.f32 0.0078125, %v1938_v31 }
 0x2f8   : > { %v4510_v5 = vpop.eup %4509  ;;  %v3971_v0 = vpack.c.bf16 %v2744_v47, %v2743_v40  ;;  %v2574_v9 = vmul.f32 %v6739_v29, %v2455_v16  ;;  %v2236_v35 = vadd.f32 1e-05, %v2124_v26  ;;  %v7561_v40 = vld [vmem:[#allocation61_spill] sm:$0xff] }
 0x2f9   : > { %v4512_v6 = vpop.eup %4511  ;;  %v2694_v32 = vadd.f32 %v6753_v15, %v2575_v18  ;;  %v2512_v46 = vmul.f32 %v4510_v5, %v7558_v38  ;;  %v2235_v4 = vadd.f32 1e-05, %v2123_v51  ;;  %v2052_v19 = vpop.xlane.xlu1 %2051  ;;  %v7562_v51 = vld [vmem:[#allocation64_spill] sm:$0xff] }
 0x2fa   : > { %v2050_v50 = vpop.xlane.xlu0 %2049  ;;  %4079 = vst [vmem:[%s6467_s8 + $0x150] sm:$0xff] %v3971_v0   ;;  %v2693_v25 = vadd.f32 %v6753_v15, %v2574_v9  ;;  %v2511_v56 = vmul.f32 %v4512_v6, %v7559_v62  ;;  %4521 = vrsqrt.f32 %v2236_v35  ;;  %v2180_v27 = vmul.f32 0.0078125, %v2052_v19 }
 0x2fb   : > { %v2631_v61 = vmul.f32 %v6739_v29, %v2512_v46  ;;  %4523 = vrsqrt.f32 %v2235_v4  ;;  %v2179_v12 = vmul.f32 0.0078125, %v2050_v50  ;;  %v7563_v50 = vld [vmem:[#allocation63_spill] sm:$0xff] }
 0x2fc   : > { %v4514_v53 = vpop.eup %4513  ;;  %v3846_v36 = vpack.c.bf16 %v2694_v32, %v2693_v25  ;;  %v2630_v21 = vmul.f32 %v6739_v29, %v2511_v56  ;;  %v2292_v23 = vadd.f32 1e-05, %v2180_v27 }
 0x2fd   : > { %v4516_v3 = vpop.eup %4515  ;;  %v2750_v55 = vadd.f32 %v6753_v15, %v2631_v61  ;;  %v2454_v52 = vmul.f32 %v4514_v53, %v7560_v11  ;;  %v2291_v43 = vadd.f32 1e-05, %v2179_v12  ;;  %v1936_v13 = vpop.xlane.xlu1 %1935  ;;  %v7564_v12 = vld [vmem:[#allocation66_spill] sm:$0xff] }
 0x2fe   : > { %v1934_v54 = vpop.xlane.xlu0 %1933  ;;  %4054 = vst [vmem:[%s6467_s8 + $0x88] sm:$0xff] %v3846_v36   ;;  %v2749_v39 = vadd.f32 %v6753_v15, %v2630_v21  ;;  %v2453_v45 = vmul.f32 %v4516_v3, %v6196_v33  ;;  %4525 = vrsqrt.f32 %v2292_v23  ;;  %v2122_v14 = vmul.f32 0.0078125, %v1936_v13 }
 0x2ff   : > { %v2573_v59 = vmul.f32 %v6739_v29, %v2454_v52  ;;  %4527 = vrsqrt.f32 %v2291_v43  ;;  %v2121_v49 = vmul.f32 0.0078125, %v1934_v54  ;;  %v7565_v54 = vld [vmem:[#allocation65_spill] sm:$0xff] }
 0x300   : > { %v4518_v47 = vpop.eup %4517  ;;  %v3986_v58 = vpack.c.bf16 %v2750_v55, %v2749_v39  ;;  %v2572_v63 = vmul.f32 %v6739_v29, %v2453_v45  ;;  %v2234_v2 = vadd.f32 1e-05, %v2122_v14 }
 0x301   : > { %v4520_v34 = vpop.eup %4519  ;;  %v2692_v31 = vadd.f32 %v6753_v15, %v2573_v59  ;;  %v2510_v8 = vmul.f32 %v4518_v47, %v7561_v40  ;;  %v2233_v16 = vadd.f32 1e-05, %v2121_v49  ;;  %v2048_v26 = vpop.xlane.xlu1 %2047 }
 0x302   : > { %v2046_v33 = vpop.xlane.xlu0 %2045  ;;  %4082 = vst [vmem:[%s6467_s8 + $0x168] sm:$0xff] %v3986_v58   ;;  %v2691_v18 = vadd.f32 %v6753_v15, %v2572_v63  ;;  %v2509_v5 = vmul.f32 %v4520_v34, %v7562_v51  ;;  %4529 = vrsqrt.f32 %v2234_v2  ;;  %v2178_v0 = vmul.f32 0.0078125, %v2048_v26 }
 0x303   : > { %v2629_v9 = vmul.f32 %v6739_v29, %v2510_v8  ;;  %4531 = vrsqrt.f32 %v2233_v16  ;;  %v2177_v35 = vmul.f32 0.0078125, %v2046_v33  ;;  %v7566_v33 = vld [vmem:[#allocation68_spill] sm:$0xff] }
 0x304   : > { %v4522_v6 = vpop.eup %4521  ;;  %v3841_v32 = vpack.c.bf16 %v2692_v31, %v2691_v18  ;;  %v2628_v38 = vmul.f32 %v6739_v29, %v2509_v5  ;;  %v2290_v46 = vadd.f32 1e-05, %v2178_v0 }
 0x305   : > { %v4524_v4 = vpop.eup %4523  ;;  %v2748_v19 = vadd.f32 %v6753_v15, %v2629_v9  ;;  %v2460_v25 = vmul.f32 %v4522_v6, %v7563_v50  ;;  %v2289_v62 = vadd.f32 1e-05, %v2177_v35  ;;  %v1948_v56 = vpop.xlane.xlu1 %1947  ;;  %v7567_v9 = vld [vmem:[#allocation67_spill] sm:$0xff] }
 0x306   : > { %v1946_v27 = vpop.xlane.xlu0 %1945  ;;  %4053 = vst [vmem:[%s6467_s8 + $0x80] sm:$0xff] %v3841_v32   ;;  %v2747_v61 = vadd.f32 %v6753_v15, %v2628_v38  ;;  %v2459_v53 = vmul.f32 %v4524_v4, %v7564_v12  ;;  %4533 = vrsqrt.f32 %v2290_v46  ;;  %v2128_v36 = vmul.f32 0.0078125, %v1948_v56  ;;  %v7568_v56 = vld [vmem:[#allocation70_spill] sm:$0xff] }
 0x307   : > { %v2579_v21 = vmul.f32 %v6739_v29, %v2460_v25  ;;  %4535 = vrsqrt.f32 %v2289_v62  ;;  %v2127_v23 = vmul.f32 0.0078125, %v1946_v27 }
 0x308   : > { %v4526_v3 = vpop.eup %4525  ;;  %v3981_v55 = vpack.c.bf16 %v2748_v19, %v2747_v61  ;;  %v2578_v11 = vmul.f32 %v6739_v29, %v2459_v53  ;;  %v2240_v52 = vadd.f32 1e-05, %v2128_v36 }
 0x309   : > { %v4528_v43 = vpop.eup %4527  ;;  %v2698_v13 = vadd.f32 %v6753_v15, %v2579_v21  ;;  %v2516_v39 = vmul.f32 %v4526_v3, %v7565_v54  ;;  %v2239_v45 = vadd.f32 1e-05, %v2127_v23  ;;  %v2060_v14 = vpop.xlane.xlu1 %2059  ;;  %v7569_v21 = vld [vmem:[#allocation69_spill] sm:$0xff] }
 0x30a   : > { %v2058_v59 = vpop.xlane.xlu0 %2057  ;;  %4081 = vst [vmem:[%s6467_s8 + $0x160] sm:$0xff] %v3981_v55   ;;  %v2697_v49 = vadd.f32 %v6753_v15, %v2578_v11  ;;  %v2515_v47 = vmul.f32 %v4528_v43, %v6240_v24  ;;  %4537 = vrsqrt.f32 %v2240_v52  ;;  %v2184_v58 = vmul.f32 0.0078125, %v2060_v14  ;;  %v7570_v14 = vld [vmem:[#allocation72_spill] sm:$0xff] }
 0x30b   : > { %v2635_v63 = vmul.f32 %v6739_v29, %v2516_v39  ;;  %4539 = vrsqrt.f32 %v2239_v45  ;;  %v2183_v2 = vmul.f32 0.0078125, %v2058_v59 }
 0x30c   : > { %v4530_v34 = vpop.eup %4529  ;;  %v3856_v31 = vpack.c.bf16 %v2698_v13, %v2697_v49  ;;  %v2634_v40 = vmul.f32 %v6739_v29, %v2515_v47  ;;  %v2296_v8 = vadd.f32 1e-05, %v2184_v58 }
 0x30d   : > { %v4532_v16 = vpop.eup %4531  ;;  %v2754_v26 = vadd.f32 %v6753_v15, %v2635_v63  ;;  %v2458_v18 = vmul.f32 %v4530_v34, %v7566_v33  ;;  %v2295_v51 = vadd.f32 1e-05, %v2183_v2  ;;  %v1944_v5 = vpop.xlane.xlu1 %1943  ;;  %v7571_v2 = vld [vmem:[#allocation71_spill] sm:$0xff] }
 0x30e   : > { %v1942_v24 = vpop.xlane.xlu0 %1941  ;;  %4056 = vst [vmem:[%s6467_s8 + $0x98] sm:$0xff] %v3856_v31   ;;  %v2753_v0 = vadd.f32 %v6753_v15, %v2634_v40  ;;  %v2457_v35 = vmul.f32 %v4532_v16, %v7567_v9  ;;  %4541 = vrsqrt.f32 %v2296_v8  ;;  %v2126_v6 = vmul.f32 0.0078125, %v1944_v5 }
 0x30f   : > { %v2577_v32 = vmul.f32 %v6739_v29, %v2458_v18  ;;  %4543 = vrsqrt.f32 %v2295_v51  ;;  %v2125_v38 = vmul.f32 0.0078125, %v1942_v24  ;;  %v7572_v24 = vld [vmem:[#allocation74_spill] sm:$0xff] }
 0x310   : > { %v4534_v46 = vpop.eup %4533  ;;  %v3996_v4 = vpack.c.bf16 %v2754_v26, %v2753_v0  ;;  %v2576_v19 = vmul.f32 %v6739_v29, %v2457_v35  ;;  %v2238_v50 = vadd.f32 1e-05, %v2126_v6 }
 0x311   : > { %v4536_v25 = vpop.eup %4535  ;;  %v2696_v62 = vadd.f32 %v6753_v15, %v2577_v32  ;;  %v2514_v27 = vmul.f32 %v4534_v46, %v7568_v56  ;;  %v2237_v61 = vadd.f32 1e-05, %v2125_v38  ;;  %v2056_v12 = vpop.xlane.xlu1 %2055  ;;  %v7573_v38 = vld [vmem:[#allocation73_spill] sm:$0xff] }
 0x312   : > { %v2054_v53 = vpop.xlane.xlu0 %2053  ;;  %4084 = vst [vmem:[%s6467_s8 + $0x178] sm:$0xff] %v3996_v4   ;;  %v2695_v36 = vadd.f32 %v6753_v15, %v2576_v19  ;;  %v2513_v23 = vmul.f32 %v4536_v25, %v7569_v21  ;;  %4545 = vrsqrt.f32 %v2238_v50  ;;  %v2182_v3 = vmul.f32 0.0078125, %v2056_v12 }
 0x313   : > { %v2633_v55 = vmul.f32 %v6739_v29, %v2514_v27  ;;  %4547 = vrsqrt.f32 %v2237_v61  ;;  %v2181_v11 = vmul.f32 0.0078125, %v2054_v53  ;;  %v7574_v53 = vld [vmem:[#allocation76_spill] sm:$0xff] }
 0x314   : > { %v4538_v52 = vpop.eup %4537  ;;  %v3851_v43 = vpack.c.bf16 %v2696_v62, %v2695_v36  ;;  %v2632_v13 = vmul.f32 %v6739_v29, %v2513_v23  ;;  %v2294_v54 = vadd.f32 1e-05, %v2182_v3 }
 0x315   : > { %v4540_v39 = vpop.eup %4539  ;;  %v2752_v45 = vadd.f32 %v6753_v15, %v2633_v55  ;;  %v2464_v59 = vmul.f32 %v4538_v52, %v7570_v14  ;;  %v2293_v49 = vadd.f32 1e-05, %v2181_v11  ;;  %v1956_v47 = vpop.xlane.xlu1 %1955 }
 0x316   : > { %v1954_v58 = vpop.xlane.xlu0 %1953  ;;  %4055 = vst [vmem:[%s6467_s8 + $0x90] sm:$0xff] %v3851_v43   ;;  %v2751_v63 = vadd.f32 %v6753_v15, %v2632_v13  ;;  %v2463_v34 = vmul.f32 %v4540_v39, %v7571_v2  ;;  %4549 = vrsqrt.f32 %v2294_v54  ;;  %v2132_v31 = vmul.f32 0.0078125, %v1956_v47  ;;  %v7575_v47 = vld [vmem:[#allocation75_spill] sm:$0xff] }
 0x317   : > { %v2583_v40 = vmul.f32 %v6739_v29, %v2464_v59  ;;  %4551 = vrsqrt.f32 %v2293_v49  ;;  %v2131_v8 = vmul.f32 0.0078125, %v1954_v58 }
 0x318   : > { %v4542_v16 = vpop.eup %4541  ;;  %v3991_v26 = vpack.c.bf16 %v2752_v45, %v2751_v63  ;;  %v2582_v33 = vmul.f32 %v6739_v29, %v2463_v34  ;;  %v2244_v18 = vadd.f32 1e-05, %v2132_v31  ;;  %v7576_v31 = vld [vmem:[#allocation78_spill] sm:$0xff] }
 0x319   : > { %v4544_v51 = vpop.eup %4543  ;;  %v2702_v5 = vadd.f32 %v6753_v15, %v2583_v40  ;;  %v2520_v0 = vmul.f32 %v4542_v16, %v7572_v24  ;;  %v2243_v9 = vadd.f32 1e-05, %v2131_v8  ;;  %v2068_v35 = vpop.xlane.xlu1 %2067 }
 0x31a   : > { %v2066_v6 = vpop.xlane.xlu0 %2065  ;;  %4083 = vst [vmem:[%s6467_s8 + $0x170] sm:$0xff] %v3991_v26   ;;  %v2701_v32 = vadd.f32 %v6753_v15, %v2582_v33  ;;  %v2519_v46 = vmul.f32 %v4544_v51, %v7573_v38  ;;  %4553 = vrsqrt.f32 %v2244_v18  ;;  %v2188_v4 = vmul.f32 0.0078125, %v2068_v35 }
 0x31b   : > { %v2639_v19 = vmul.f32 %v6739_v29, %v2520_v0  ;;  %4555 = vrsqrt.f32 %v2243_v9  ;;  %v2187_v50 = vmul.f32 0.0078125, %v2066_v6  ;;  %v7577_v9 = vld [vmem:[#allocation77_spill] sm:$0xff] }
 0x31c   : > { %v4546_v25 = vpop.eup %4545  ;;  %v3866_v62 = vpack.c.bf16 %v2702_v5, %v2701_v32  ;;  %v2638_v56 = vmul.f32 %v6739_v29, %v2519_v46  ;;  %v2300_v27 = vadd.f32 1e-05, %v2188_v4  ;;  %v7578_v4 = vld [vmem:[#allocation80_spill] sm:$0xff] }
 0x31d   : > { %v4548_v61 = vpop.eup %4547  ;;  %v2758_v12 = vadd.f32 %v6753_v15, %v2639_v19  ;;  %v2462_v36 = vmul.f32 %v4546_v25, %v7574_v53  ;;  %v2299_v21 = vadd.f32 1e-05, %v2187_v50  ;;  %v1952_v23 = vpop.xlane.xlu1 %1951 }
 0x31e   : > { %v1950_v3 = vpop.xlane.xlu0 %1949  ;;  %4058 = vst [vmem:[%s6467_s8 + $0xa8] sm:$0xff] %v3866_v62   ;;  %v2757_v55 = vadd.f32 %v6753_v15, %v2638_v56  ;;  %v2461_v11 = vmul.f32 %v4548_v61, %v6300_v44  ;;  %4557 = vrsqrt.f32 %v2300_v27  ;;  %v2130_v52 = vmul.f32 0.0078125, %v1952_v23 }
 0x31f   : > { %v2581_v43 = vmul.f32 %v6739_v29, %v2462_v36  ;;  %4559 = vrsqrt.f32 %v2299_v21  ;;  %v2129_v13 = vmul.f32 0.0078125, %v1950_v3  ;;  %v7579_v21 = vld [vmem:[#allocation79_spill] sm:$0xff] }
 0x320   : > { %v4550_v54 = vpop.eup %4549  ;;  %v4006_v39 = vpack.c.bf16 %v2758_v12, %v2757_v55  ;;  %v2580_v45 = vmul.f32 %v6739_v29, %v2461_v11  ;;  %v2242_v14 = vadd.f32 1e-05, %v2130_v52 }
 0x321   : > { %v4552_v59 = vpop.eup %4551  ;;  %v2700_v49 = vadd.f32 %v6753_v15, %v2581_v43  ;;  %v2518_v58 = vmul.f32 %v4550_v54, %v7575_v47  ;;  %v2241_v63 = vadd.f32 1e-05, %v2129_v13  ;;  %v2064_v2 = vpop.xlane.xlu1 %2063  ;;  %v7580_v43 = vld [vmem:[#allocation82_spill] sm:$0xff] }
 0x322   : > { %v2062_v44 = vpop.xlane.xlu0 %2061  ;;  %4086 = vst [vmem:[%s6467_s8 + $0x188] sm:$0xff] %v4006_v39   ;;  %v2699_v34 = vadd.f32 %v6753_v15, %v2580_v45  ;;  %v2517_v40 = vmul.f32 %v4552_v59, %v7576_v31  ;;  %4561 = vrsqrt.f32 %v2242_v14  ;;  %v2186_v8 = vmul.f32 0.0078125, %v2064_v2  ;;  %v7581_v2 = vld [vmem:[#allocation81_spill] sm:$0xff] }
 0x323   : > { %v2637_v16 = vmul.f32 %v6739_v29, %v2518_v58  ;;  %4563 = vrsqrt.f32 %v2241_v63  ;;  %v2185_v26 = vmul.f32 0.0078125, %v2062_v44 }
 0x324   : > { %v4554_v33 = vpop.eup %4553  ;;  %v3861_v18 = vpack.c.bf16 %v2700_v49, %v2699_v34  ;;  %v2636_v51 = vmul.f32 %v6739_v29, %v2517_v40  ;;  %v2298_v5 = vadd.f32 1e-05, %v2186_v8 }
 0x325   : > { %v4556_v24 = vpop.eup %4555  ;;  %v2756_v0 = vadd.f32 %v6753_v15, %v2637_v16  ;;  %v2468_v35 = vmul.f32 %v4554_v33, %v7577_v9  ;;  %v2297_v6 = vadd.f32 1e-05, %v2185_v26  ;;  %v1964_v32 = vpop.xlane.xlu1 %1963  ;;  %v7582_v16 = vld [vmem:[#allocation84_spill] sm:$0xff] }
 0x326   : > { %v1962_v38 = vpop.xlane.xlu0 %1961  ;;  %4057 = vst [vmem:[%s6467_s8 + $0xa0] sm:$0xff] %v3861_v18   ;;  %v2755_v46 = vadd.f32 %v6753_v15, %v2636_v51  ;;  %v2467_v19 = vmul.f32 %v4556_v24, %v7578_v4  ;;  %4565 = vrsqrt.f32 %v2298_v5  ;;  %v2136_v50 = vmul.f32 0.0078125, %v1964_v32  ;;  %v7583_v32 = vld [vmem:[#allocation83_spill] sm:$0xff] }
 0x327   : > { %v2587_v25 = vmul.f32 %v6739_v29, %v2468_v35  ;;  %4567 = vrsqrt.f32 %v2297_v6  ;;  %v2135_v62 = vmul.f32 0.0078125, %v1962_v38 }
 0x328   : > { %v4558_v56 = vpop.eup %4557  ;;  %v4001_v27 = vpack.c.bf16 %v2756_v0, %v2755_v46  ;;  %v2586_v61 = vmul.f32 %v6739_v29, %v2467_v19  ;;  %v2248_v12 = vadd.f32 1e-05, %v2136_v50 }
 0x329   : > { %v4560_v53 = vpop.eup %4559  ;;  %v2706_v36 = vadd.f32 %v6753_v15, %v2587_v25  ;;  %v2524_v23 = vmul.f32 %v4558_v56, %v7579_v21  ;;  %v2247_v3 = vadd.f32 1e-05, %v2135_v62  ;;  %v2076_v55 = vpop.xlane.xlu1 %2075  ;;  %v7584_v25 = vld [vmem:[#allocation86_spill] sm:$0xff] }
 0x32a   : > { %v2074_v11 = vpop.xlane.xlu0 %2073  ;;  %4085 = vst [vmem:[%s6467_s8 + $0x180] sm:$0xff] %v4001_v27   ;;  %v2705_v52 = vadd.f32 %v6753_v15, %v2586_v61  ;;  %v2523_v13 = vmul.f32 %v4560_v53, %v7580_v43  ;;  %4569 = vrsqrt.f32 %v2248_v12  ;;  %v2192_v54 = vmul.f32 0.0078125, %v2076_v55  ;;  %v7585_v55 = vld [vmem:[#allocation85_spill] sm:$0xff] }
 0x32b   : > { %v2643_v39 = vmul.f32 %v6739_v29, %v2524_v23  ;;  %4571 = vrsqrt.f32 %v2247_v3  ;;  %v2191_v45 = vmul.f32 0.0078125, %v2074_v11 }
 0x32c   : > { %v4562_v14 = vpop.eup %4561  ;;  %v3876_v59 = vpack.c.bf16 %v2706_v36, %v2705_v52  ;;  %v2642_v49 = vmul.f32 %v6739_v29, %v2523_v13  ;;  %v2304_v47 = vadd.f32 1e-05, %v2192_v54 }
 0x32d   : > { %v4564_v58 = vpop.eup %4563  ;;  %v2762_v63 = vadd.f32 %v6753_v15, %v2643_v39  ;;  %v2466_v44 = vmul.f32 %v4562_v14, %v7581_v2  ;;  %v2303_v34 = vadd.f32 1e-05, %v2191_v45  ;;  %v1960_v31 = vpop.xlane.xlu1 %1959  ;;  %v7586_v39 = vld [vmem:[#allocation88_spill] sm:$0xff] }
 0x32e   : > { %v1958_v40 = vpop.xlane.xlu0 %1957  ;;  %4060 = vst [vmem:[%s6467_s8 + $0xb8] sm:$0xff] %v3876_v59   ;;  %v2761_v8 = vadd.f32 %v6753_v15, %v2642_v49  ;;  %v2465_v26 = vmul.f32 %v4564_v58, %v7582_v16  ;;  %4573 = vrsqrt.f32 %v2304_v47  ;;  %v2134_v33 = vmul.f32 0.0078125, %v1960_v31 }
 0x32f   : > { %v2585_v18 = vmul.f32 %v6739_v29, %v2466_v44  ;;  %4575 = vrsqrt.f32 %v2303_v34  ;;  %v2133_v51 = vmul.f32 0.0078125, %v1958_v40 }
 0x330   : > { %v4566_v5 = vpop.eup %4565  ;;  %v4016_v24 = vpack.c.bf16 %v2762_v63, %v2761_v8  ;;  %v2584_v0 = vmul.f32 %v6739_v29, %v2465_v26  ;;  %v2246_v9 = vadd.f32 1e-05, %v2134_v33 }
 0x331   : > { %v4568_v35 = vpop.eup %4567  ;;  %v2704_v6 = vadd.f32 %v6753_v15, %v2585_v18  ;;  %v2522_v38 = vmul.f32 %v4566_v5, %v7583_v32  ;;  %v2245_v46 = vadd.f32 1e-05, %v2133_v51  ;;  %v2072_v4 = vpop.xlane.xlu1 %2071 }
 0x332   : > { %v2070_v19 = vpop.xlane.xlu0 %2069  ;;  %4088 = vst [vmem:[%s6467_s8 + $0x198] sm:$0xff] %v4016_v24   ;;  %v2703_v50 = vadd.f32 %v6753_v15, %v2584_v0  ;;  %v2521_v62 = vmul.f32 %v4568_v35, %v7584_v25  ;;  %4577 = vrsqrt.f32 %v2246_v9  ;;  %v2190_v56 = vmul.f32 0.0078125, %v2072_v4 }
 0x333   : > { %v2641_v27 = vmul.f32 %v6739_v29, %v2522_v38  ;;  %4579 = vrsqrt.f32 %v2245_v46  ;;  %v2189_v61 = vmul.f32 0.0078125, %v2070_v19 }
 0x334   : > { %v4570_v12 = vpop.eup %4569  ;;  %v3871_v53 = vpack.c.bf16 %v2704_v6, %v2703_v50  ;;  %v2640_v36 = vmul.f32 %v6739_v29, %v2521_v62  ;;  %v2302_v21 = vadd.f32 1e-05, %v2190_v56 }
 0x335   : > { %v4572_v23 = vpop.eup %4571  ;;  %v2760_v3 = vadd.f32 %v6753_v15, %v2641_v27  ;;  %v2472_v11 = vmul.f32 %v4570_v12, %v7585_v55  ;;  %v2301_v52 = vadd.f32 1e-05, %v2189_v61  ;;  %v1972_v43 = vpop.xlane.xlu1 %1971 }
 0x336   : > { %v1970_v13 = vpop.xlane.xlu0 %1969  ;;  %4059 = vst [vmem:[%s6467_s8 + $0xb0] sm:$0xff] %v3871_v53   ;;  %v2759_v54 = vadd.f32 %v6753_v15, %v2640_v36  ;;  %v2471_v45 = vmul.f32 %v4572_v23, %v7586_v39  ;;  %4581 = vrsqrt.f32 %v2302_v21  ;;  %v2140_v14 = vmul.f32 0.0078125, %v1972_v43 }
 0x337   : > { %v2591_v59 = vmul.f32 %v6739_v29, %v2472_v11  ;;  %4583 = vrsqrt.f32 %v2301_v52  ;;  %v2139_v49 = vmul.f32 0.0078125, %v1970_v13 }
 0x338   : > { %v4574_v47 = vpop.eup %4573  ;;  %v4011_v58 = vpack.c.bf16 %v2760_v3, %v2759_v54  ;;  %v2590_v63 = vmul.f32 %v6739_v29, %v2471_v45  ;;  %v2252_v2 = vadd.f32 1e-05, %v2140_v14 }
 0x339   : > { %v4576_v44 = vpop.eup %4575  ;;  %v2710_v34 = vadd.f32 %v6753_v15, %v2591_v59  ;;  %v2528_v31 = vmul.f32 %v4574_v47, %v6456_v57  ;;  %v2251_v40 = vadd.f32 1e-05, %v2139_v49  ;;  %v1968_v8 = vpop.xlane.xlu1 %1967 }
 0x33a   : > { %v1966_v16 = vpop.xlane.xlu0 %1965  ;;  %4087 = vst [vmem:[%s6467_s8 + $0x190] sm:$0xff] %v4011_v58   ;;  %v2709_v26 = vadd.f32 %v6753_v15, %v2590_v63  ;;  %v2527_v33 = vmul.f32 %v4576_v44, %v6462_v22  ;;  %4585 = vrsqrt.f32 %v2252_v2  ;;  %v2138_v18 = vmul.f32 0.0078125, %v1968_v8  ;;  %v4603_v58 = vld [vmem:[%s7024_s3] ss:$0 sm:$0xff] }
 0x33b   : > { %v2647_v51 = vmul.f32 %v6739_v29, %v2528_v31  ;;  %4587 = vrsqrt.f32 %v2251_v40  ;;  %v2137_v5 = vmul.f32 0.0078125, %v1966_v16 }
 0x33c   : > { %v4578_v24 = vpop.eup %4577  ;;  %v3886_v0 = vpack.c.bf16 %v2710_v34, %v2709_v26  ;;  %v2646_v9 = vmul.f32 %v6739_v29, %v2527_v33  ;;  %v2250_v57 = vadd.f32 1e-05, %v2138_v18 }
 0x33d   : > { %v4580_v35 = vpop.eup %4579  ;;  %v2766_v6 = vadd.f32 %v6753_v15, %v2647_v51  ;;  %v2470_v32 = vmul.f32 %v4578_v24, %v6493_v30  ;;  %v2249_v38 = vadd.f32 1e-05, %v2137_v5  ;;  %v2080_v46 = vpop.xlane.xlu1 %2079 }
 0x33e   : > { %v2078_v22 = vpop.xlane.xlu0 %2077  ;;  %4062 = vst [vmem:[%s6467_s8 + $0xc8] sm:$0xff] %v3886_v0   ;;  %v2765_v4 = vadd.f32 %v6753_v15, %v2646_v9  ;;  %v2469_v19 = vmul.f32 %v4580_v35, %v6499_v48  ;;  %4589 = vrsqrt.f32 %v2250_v57  ;;  %v2194_v50 = vmul.f32 0.0078125, %v2080_v46 }
 0x33f   : > { %v2589_v25 = vmul.f32 %v6739_v29, %v2470_v32  ;;  %4591 = vrsqrt.f32 %v2249_v38  ;;  %v2193_v62 = vmul.f32 0.0078125, %v2078_v22 }
 0x340   : > { %v4582_v56 = vpop.eup %4581  ;;  %v4026_v27 = vpack.c.bf16 %v2766_v6, %v2765_v4  ;;  %v2588_v61 = vmul.f32 %v6739_v29, %v2469_v19  ;;  %v2306_v30 = vadd.f32 1e-05, %v2194_v50 }
 0x341   : > { %v4584_v12 = vpop.eup %4583  ;;  %v2708_v53 = vadd.f32 %v6753_v15, %v2589_v25  ;;  %v2526_v36 = vmul.f32 %v4582_v56, %v6527_v17  ;;  %v2305_v21 = vadd.f32 1e-05, %v2193_v62  ;;  %v2084_v23 = vpop.xlane.xlu1 %2083 }
 0x342   : > { %v2082_v48 = vpop.xlane.xlu0 %2081  ;;  %4090 = vst [vmem:[%s6467_s8 + $0x1a8] sm:$0xff] %v4026_v27   ;;  %v2707_v3 = vadd.f32 %v6753_v15, %v2588_v61  ;;  %v2525_v55 = vmul.f32 %v4584_v12, %v6533_v41  ;;  %4593 = vrsqrt.f32 %v2306_v30  ;;  %v2196_v11 = vmul.f32 0.0078125, %v2084_v23 }
 0x343   : > { %v2645_v52 = vmul.f32 %v6739_v29, %v2526_v36  ;;  %4595 = vrsqrt.f32 %v2305_v21  ;;  %v2195_v43 = vmul.f32 0.0078125, %v2082_v48 }
 0x344   : > { %v4586_v13 = vpop.eup %4585  ;;  %v3881_v54 = vpack.c.bf16 %v2708_v53, %v2707_v3  ;;  %v2644_v39 = vmul.f32 %v6739_v29, %v2525_v55  ;;  %v2308_v17 = vadd.f32 1e-05, %v2196_v11 }
 0x345   : > { %v4588_v45 = vpop.eup %4587  ;;  %v2764_v14 = vadd.f32 %v6753_v15, %v2645_v52  ;;  %v2476_v59 = vmul.f32 %v4586_v13, %v6561_v37  ;;  %v2307_v49 = vadd.f32 1e-05, %v2195_v43 }
 0x346   : > { %4061 = vst [vmem:[%s6467_s8 + $0xc0] sm:$0xff] %v3881_v54   ;;  %v2763_v41 = vadd.f32 %v6753_v15, %v2644_v39  ;;  %v2475_v47 = vmul.f32 %v4588_v45, %v6567_v1  ;;  %4597 = vrsqrt.f32 %v2308_v17 }
 0x347   : > { %v2595_v63 = vmul.f32 %v4603_v58, %v2476_v59  ;;  %4599 = vrsqrt.f32 %v2307_v49 }
 0x348   : > { %v4590_v29 = vpop.eup %4589  ;;  %v4021_v2 = vpack.c.bf16 %v2764_v14, %v2763_v41  ;;  %v2594_v44 = vmul.f32 %v4603_v58, %v2475_v47 }
 0x349   : > { %v4592_v34 = vpop.eup %4591  ;;  %v2714_v37 = vadd.f32 %v6753_v15, %v2595_v63  ;;  %v2474_v31 = vmul.f32 %v4590_v29, %v6611_v28  ;;  %v4604_v28 = vld [vmem:[%s7025_s4] ss:$0 sm:$0xff] }
 0x34a   : > { %4089 = vst [vmem:[%s6467_s8 + $0x1a0] sm:$0xff] %v4021_v2   ;;  %v2713_v40 = vadd.f32 %v6753_v15, %v2594_v44  ;;  %v2473_v1 = vmul.f32 %v4592_v34, %v6617_v60 }
 0x34b   : > { %v2593_v8 = vmul.f32 %v4603_v58, %v2474_v31 }
 0x34c   : > { %v4594_v16 = vpop.eup %4593  ;;  %v3896_v26 = vpack.c.bf16 %v2714_v37, %v2713_v40  ;;  %v2592_v33 = vmul.f32 %v4603_v58, %v2473_v1 }
 0x34d   : > { %v4596_v18 = vpop.eup %4595  ;;  %v2712_v51 = vadd.f32 %v6753_v15, %v2593_v8  ;;  %v2530_v5 = vmul.f32 %v4594_v16, %v6641_v7 }
 0x34e   : > { %4064 = vst [vmem:[%s6467_s8 + $0xd8] sm:$0xff] %v3896_v26   ;;  %v2711_v24 = vadd.f32 %v4604_v28, %v2592_v33  ;;  %v2529_v60 = vmul.f32 %v4596_v18, %v6647_v42 }
 0x34f   : > { %v2649_v0 = vmul.f32 %v4603_v58, %v2530_v5 }
 0x350   : > { %v4598_v9 = vpop.eup %4597  ;;  %v3891_v57 = vpack.c.bf16 %v2712_v51, %v2711_v24  ;;  %v2648_v35 = vmul.f32 %v4603_v58, %v2529_v60 }
 0x351   : > { %v4600_v6 = vpop.eup %4599  ;;  %v2768_v32 = vadd.f32 %v4604_v28, %v2649_v0  ;;  %v2532_v7 = vmul.f32 %v4598_v9, %v6607_v20 }
 0x352   : > { %4063 = vst [vmem:[%s6467_s8 + $0xd0] sm:$0xff] %v3891_v57   ;;  %v2767_v15 = vadd.f32 %v4604_v28, %v2648_v35  ;;  %v2531_v38 = vmul.f32 %v4600_v6, %v6656_v10 }
 0x353   : > { %v2651_v46 = vmul.f32 %v4603_v58, %v2532_v7 }
 0x354   : > { %v4031_v22 = vpack.c.bf16 %v2768_v32, %v2767_v15  ;;  %v2650_v42 = vmul.f32 %v4603_v58, %v2531_v38 }
 0x355   : > { %v2770_v4 = vadd.f32 %v4604_v28, %v2651_v46 }
 0x356   : > { %4091 = vst [vmem:[%s6467_s8 + $0x1b0] sm:$0xff] %v4031_v22   ;;  %v2769_v19 = vadd.f32 %v4604_v28, %v2650_v42 }
 0x358   : > { %v4036_v20 = vpack.c.bf16 %v2770_v4, %v2769_v19 }
 0x35a   : > { %4092 = vst [vmem:[%s6467_s8 + $0x1b8] sm:$0xff] %v4036_v20  }
 0x35b   : > { %4618 = shalt.err (!%p4615_p3)
}
 0x35c   : > { %s4619_s26 = scalar_lea.hbm %s6973_s6, 7168  ;;  %s4623_s13 = scalar_lea.hbm %s7026_s5, 50176 }
 0x35d   : > { %p4620_p4 = scmp.ne.s32.totalorder %s6973_s6, %s4619_s26  ;;  %p4624_p9 = scmp.lt.u32.totalorder %s6973_s6, %s7026_s5 }
 0x35e   : > { %p4625_p10 = scmp.lt.u32.totalorder %s4623_s13, %s4619_s26  ;;  %p4627_p12 = scmp.lt.u32.totalorder %s4619_s26, %s6973_s6 }
 0x35f   : > { %p4621_p7 = pnand %p4620_p4, %p4740_p5 }
 0x360   : > { %p4626_p11 = por %p4625_p10, %p4624_p9 }
 0x361   : > { %p4622_p8 = pneg %p4621_p7 }
 0x362   : > { %p4628_p13 = por %p4627_p12, %p4626_p11 }
 0x364   : > { %p4629_p0 = pnand %p4628_p13, %p4622_p8 }
 0x366   : > { %4632 = shalt.err (!%p4629_p0)
}
 0x367   : > { %s4670_s16 = smov 64   ;;  %s4671_s17 = smov 4  }
 0x368   : > { %4277 = dma.vmem_to_hbm [thread:$0]  (%p4740_p5), %s6975_s23, 7168, %s6973_s6, %s6980_s22, %s4670_s16, %s4670_s16, %s4671_s17  }
 0x369 PF: > { %p4283_p1 = scmp.ge.s32.totalorder %s4667_s21, 2  ;;  %s3360_s25 = sand.u32 1, %s4655_s18  }
 0x36a   : > { %s3361_s30 = scalar_lea.sflag [#allocation3], %s3360_s25 }
 0x36b   : > { %p4280_p2 = pnand %p4283_p1, %p4744_p6 }
 0x36d   : > { %4650 = dma.done.wait (!%p4280_p2), %s3361_s30, 7168  }
 0x36e   : > { %4652 = vsyncadd (!%p4280_p2), %s3361_s30, 4294960128  ;;  %p15_p3 = scmp.ge.s32.totalorder %s4727_s24, 9   ;;  %s7587_s18 = smov %s4659_s19 }
 0x36f   : > { %s7588_s19 = smov %s4663_s20  ;;  %s7589_s20 = smov %s4738_s27 }
 0x370   : > { %s7590_s21 = smov %s4727_s24  ;;  %17 = sbr.rel (!%p15_p3) target bundleno = 3 (0x3), region = 75 }
 0x377   :  { %3366 = vsyncpa [#allocation3], 1 }
 0x378   :  { %3368 = vsyncpa [#allocation3 + $0x1], 1 }

</bundles_post_ra>
